<compile_context>
chip_gen: v5e
topology: v5e:2x2
jax: 0.10.0
libtpu: 0.0.40
codegen_flags: <defaults>
</compile_context>

<pallas_src>
import functools

import jax
import jax.numpy as jnp
from jax.experimental import pallas as pl
from jax.experimental.pallas import tpu as pltpu


# ----------------------------- JAX glue helpers ------------------------------

def _round_up(x, m):
    return -(-x // m) * m


def _lin_coords(in_size, out_size):
    # align_corners=True source coordinates (PyTorch F.interpolate semantics).
    if out_size == 1:
        src = jnp.zeros((1,), jnp.float32)
    else:
        src = jnp.arange(out_size, dtype=jnp.float32) * ((in_size - 1) / (out_size - 1))
    i0 = jnp.clip(jnp.floor(src).astype(jnp.int32), 0, max(in_size - 1, 0))
    i1 = jnp.minimum(i0 + 1, in_size - 1)
    w = src - i0.astype(jnp.float32)
    return i0, i1, w


def resize_bilinear_align_corners(x, oh, ow):
    # x: (N, H, W, C) f32 -> (N, oh, ow, C); bilinear, align_corners=True.
    y0, y1, wy = _lin_coords(x.shape[1], oh)
    x0, x1, wx = _lin_coords(x.shape[2], ow)
    wy = wy[None, :, None, None]
    wx = wx[None, None, :, None]
    r0 = x[:, y0, :, :]
    r1 = x[:, y1, :, :]
    top = r0[:, :, x0, :] * (1.0 - wx) + r0[:, :, x1, :] * wx
    bot = r1[:, :, x0, :] * (1.0 - wx) + r1[:, :, x1, :] * wx
    return top * (1.0 - wy) + bot * wy


def adaptive_avg_pool(x, k):
    # Replicates torch.nn.AdaptiveAvgPool2d(k) bin arithmetic.
    N, H, W, C = x.shape
    hs = [(i * H) // k for i in range(k)]
    he = [-(-((i + 1) * H) // k) for i in range(k)]
    ws = [(j * W) // k for j in range(k)]
    we = [-(-((j + 1) * W) // k) for j in range(k)]
    rows = []
    for i in range(k):
        cols = []
        for j in range(k):
            cols.append(jnp.mean(x[:, hs[i]:he[i], ws[j]:we[j], :], axis=(1, 2)))
        rows.append(jnp.stack(cols, axis=1))
    return jnp.stack(rows, axis=1)  # (N, k, k, C)


# ------------------------------ Pallas kernels --------------------------------

def _pyr_kernel(x_ref, w_ref, s_ref, b_ref, o_ref):
    # ALL 4 pyramid branches in a single grid step (the whole thing is launch
    # overhead-bound); per-branch 1x1 conv + folded BN + ReLU.
    # x_ref: (4, N*36, C) bf16; w_ref: (4, C, Cm) bf16; s/b: (4, 1, Cm) f32.
    for b in range(x_ref.shape[0]):
        y = jnp.dot(x_ref[b], w_ref[b], preferred_element_type=jnp.float32)
        o_ref[b] = jnp.maximum(y * s_ref[b] + b_ref[b], 0.0)


def pyramid_branches(p_stack, w_stack, s_stack, b_stack):
    # p_stack: (4, N*36, C) bf16 -> (4, N*36, Cm) f32
    B, NS, C = p_stack.shape
    Cm = w_stack.shape[-1]
    return pl.pallas_call(
        _pyr_kernel,
        out_shape=jax.ShapeDtypeStruct((B, NS, Cm), jnp.float32),
        grid_spec=pltpu.PrefetchScalarGridSpec(
            num_scalar_prefetch=0,
            grid=(1,),
            in_specs=[
                pl.BlockSpec((B, NS, C), lambda i: (0, 0, 0)),
                pl.BlockSpec((B, C, Cm), lambda i: (0, 0, 0)),
                pl.BlockSpec((B, 1, Cm), lambda i: (0, 0, 0)),
                pl.BlockSpec((B, 1, Cm), lambda i: (0, 0, 0)),
            ],
            out_specs=pl.BlockSpec((B, NS, Cm), lambda i: (0, 0, 0)),
        ),
        compiler_params=pltpu.CompilerParams(dimension_semantics=("arbitrary",)),
    )(p_stack, w_stack, s_stack, b_stack)


def _head_kernel(x_ref, w1_ref, s1_ref, b1_ref, w2_ref, b2_ref, o_ref, *, width):
    # x_ref : (1, 3, (H+2)*W, Kp) bf16 - three width-pre-shifted (dw=0,1,2),
    #         row-flattened, spatially padded feature slabs for this image.
    # w1_ref: (3, 3, Kp, Cmp) bf16   3x3 conv weights (full K, resident).
    # s1/b1 : (1, Cmp) f32           folded eval-mode BN scale / bias.
    # w2_ref: (Cmp, Cop) bf16        1x1 classifier weights; b2: (1, Cop) f32.
    # o_ref : (1, Cop, H*W) f32      channel-major output block.
    HW = o_ref.shape[2]

    # 3x3 conv = 9 shifted bf16 matmuls accumulated in a local f32 value.
    # Shift (dh, dw) reads rows [dh*W, dh*W + H*W) of the dw-pre-shifted slab:
    # start offsets 0 / W / 2W are static and 16-aligned (W=16) -> pure views,
    # no relayout copies, no im2col slab.
    acc = None
    for dh in range(3):
        for dw in range(3):
            xs = x_ref[0, dw, dh * width:dh * width + HW, :]
            d = jnp.dot(xs, w1_ref[dh, dw], preferred_element_type=jnp.float32)
            acc = d if acc is None else acc + d

    # folded BN (eval) + ReLU; Dropout(0.1) is identity in eval mode.
    y = jnp.maximum(acc * s1_ref[...] + b1_ref[...], 0.0)
    out = jnp.dot(y.astype(jnp.bfloat16), w2_ref[...],
                  preferred_element_type=jnp.float32) + b2_ref[...]   # 1x1 conv + bias
    # Store channel-major (Cop x H*W): lane dim stays the 128-multiple H*W,
    # Cop is only padded to a multiple of 8 (sublane) -> small transpose/store.
    o_ref[0] = out.T.astype(o_ref.dtype)


def head_conv(xs, w1, s1, b1, w2, b2, *, width):
    # xs: (N, 3, (H+2)*W, Kp) bf16 -> out: (N, Cop, H*W) f32 (channel-major)
    N, _, HP2W, Kp = xs.shape
    HW = HP2W - 2 * width
    Cmp = w1.shape[-1]
    Cop = w2.shape[-1]

    flops = 2 * N * (HW * 9 * Kp * Cmp + HW * Cmp * Cop)
    bytes_accessed = xs.size * 2 + (w1.size + w2.size) * 2 + N * Cop * HW * 4

    kern = functools.partial(_head_kernel, width=width)
    return pl.pallas_call(
        kern,
        out_shape=jax.ShapeDtypeStruct((N, Cop, HW), jnp.float32),
        grid_spec=pltpu.PrefetchScalarGridSpec(
            num_scalar_prefetch=0,
            grid=(N,),                          # one step per image; parallel for megacore
            in_specs=[
                pl.BlockSpec((1, 3, HP2W, Kp), lambda n: (n, 0, 0, 0)),
                pl.BlockSpec((3, 3, Kp, Cmp), lambda n: (0, 0, 0, 0)),
                pl.BlockSpec((1, Cmp), lambda n: (0, 0)),
                pl.BlockSpec((1, Cmp), lambda n: (0, 0)),
                pl.BlockSpec((Cmp, Cop), lambda n: (0, 0)),
                pl.BlockSpec((1, Cop), lambda n: (0, 0)),
            ],
            out_specs=pl.BlockSpec((1, Cop, HW), lambda n: (n, 0, 0)),
        ),
        compiler_params=pltpu.CompilerParams(
            dimension_semantics=("parallel",),
            # ~3 MiB resident here; at real PSPHead sizes (Cin5~4k, Cmp=512)
            # re-derive block sizes against v7x's 64 MiB VMEM and reset this.
            vmem_limit_bytes=32 * 1024 * 1024,
        ),
        cost_estimate=pl.CostEstimate(flops=int(flops), transcendentals=0,
                                      bytes_accessed=int(bytes_accessed)),
    )(xs, w1, s1, b1, w2, b2)


# ----------------------------- parameters (synthetic) --------------------------

def make_params(key, in_channels, out_channels):
    C = in_channels
    Cm = C // 4                 # inter_channels (== pyramid branch out channels)
    Cin5 = 2 * C + 5            # conv5 input channels
    ks = jax.random.split(key, 8)

    def bn_fold(k, ch, eps=1e-5):
        kg, kb, km, kv = jax.random.split(k, 4)
        gamma = 1.0 + 0.1 * jax.random.normal(kg, (ch,), jnp.float32)
        beta = 0.1 * jax.random.normal(kb, (ch,), jnp.float32)
        mean = 0.1 * jax.random.normal(km, (ch,), jnp.float32)
        var = jnp.abs(jax.random.normal(kv, (ch,), jnp.float32)) + 0.5
        scale = gamma / jnp.sqrt(var + eps)      # eval-mode BN folded into scale/bias
        bias = beta - mean * scale
        return scale, bias

    # PyramidPooling: 4 branches of 1x1 conv (C -> C//4, no bias) + BN + ReLU, stacked.
    kw = jax.random.split(ks[0], 4)
    kb = jax.random.split(ks[1], 4)
    w_pyr = jnp.stack([0.1 * jax.random.normal(kw[i], (C, Cm), jnp.float32)
                       for i in range(4)])                     # (4, C, Cm)
    sb = [bn_fold(kb[i], Cm) for i in range(4)]
    s_pyr = jnp.stack([s for s, _ in sb])[:, None, :]          # (4, 1, Cm)
    b_pyr = jnp.stack([b for _, b in sb])[:, None, :]

    # conv5: Conv2d(Cin5, Cm, 3, pad=1, no bias) + BN + ReLU + Dropout + Conv2d(Cm, out, 1)
    w1 = 0.1 * jax.random.normal(ks[2], (3, 3, Cin5, Cm), jnp.float32)   # HWIO
    s1, b1 = bn_fold(ks[3], Cm)
    w2 = 0.1 * jax.random.normal(ks[4], (Cm, out_channels), jnp.float32)
    b2 = 0.1 * jax.random.normal(ks[5], (1, out_channels), jnp.float32)
    return dict(w_pyr=w_pyr, s_pyr=s_pyr, b_pyr=b_pyr,
                w1=w1, s1=s1.reshape(1, Cm), b1=b1.reshape(1, Cm), w2=w2, b2=b2)


# ----------------------------------- forward -----------------------------------

def psp_head_dep_forward(params, x_nchw, dep_nchw):
    # x: (N, C, H, W), dep: (N, 1, Hd, Wd) - PyTorch NCHW at the boundary.
    x = jnp.transpose(x_nchw, (0, 2, 3, 1)).astype(jnp.float32)     # NHWC
    dep = jnp.transpose(dep_nchw, (0, 2, 3, 1)).astype(jnp.float32)
    N, H, W, C = x.shape
    Cm = params["w1"].shape[-1]
    Co = params["w2"].shape[-1]
    Cin5 = 2 * C + 5

    # ---- depth branch: upsample + pooled pyramids (no convs, 1 channel, JAX glue) ----
    dep = resize_bilinear_align_corners(dep, H, W)
    dep_feats = [dep]
    for k in (1, 2, 3, 6):
        dep_feats.append(resize_bilinear_align_corners(adaptive_avg_pool(dep, k), H, W))
    dep_cat = jnp.concatenate(dep_feats, axis=-1)                    # (N, H, W, 5)

    # ---- PyramidPooling on x: pooled 1x1 conv + BN + ReLU, all 4 branches, 1 grid step ----
    pooled = []
    for k in (1, 2, 3, 6):
        p = adaptive_avg_pool(x, k).reshape(N, k * k, C)
        pooled.append(jnp.pad(p, ((0, 0), (0, 36 - k * k), (0, 0))))  # pad spatial to 36 (~KBs)
    p_stack = jnp.stack(pooled, axis=0).reshape(4, N * 36, C).astype(jnp.bfloat16)
    y_stack = pyramid_branches(p_stack, params["w_pyr"].astype(jnp.bfloat16),
                               params["s_pyr"], params["b_pyr"])
    y_stack = y_stack.reshape(4, N, 36, Cm)
    x_feats = [x]
    for i, k in enumerate((1, 2, 3, 6)):
        y = y_stack[i, :, :k * k, :].reshape(N, k, k, Cm)
        x_feats.append(resize_bilinear_align_corners(y, H, W))
    feat = jnp.concatenate(x_feats + [dep_cat], axis=-1)             # (N, H, W, 2C+5)

    # ---- conv5 head: fused 3x3 conv + BN + ReLU + [Dropout=id in eval] + 1x1 conv ----
    # TODO(synk): train-mode Dropout(0.1) would need pltpu.prng_* masking in the kernel.
    Kp = _round_up(Cin5, 128)           # input channels padded lane-dense (K dim)
    Cmp = _round_up(Cm, 128)            # inter channels padded lane-dense
    Cop = _round_up(Co, 8)              # output channels: sublane dim, multiple of 8 only

    # W should be a multiple of 8 (ideally 16 for bf16) so the in-kernel dh*W row
    # offsets are sublane-aligned views; W=16 here.
    fp = jnp.pad(feat, ((0, 0), (1, 1), (1, 1), (0, Kp - Cin5))).astype(jnp.bfloat16)
    # Three width-pre-shifted, row-flattened slabs (dw = 0,1,2): slab_dw[n, i*W+j, :]
    # = fp[n, i, j+dw, :].  All 9 conv shifts then become static row-offset slices.
    xs = jnp.stack([fp[:, :, dw:dw + W, :] for dw in range(3)], axis=1)
    xs = xs.reshape(N, 3, (H + 2) * W, Kp)                           # (N, 3, (H+2)*W, Kp)

    w1p = jnp.pad(params["w1"], ((0, 0), (0, 0), (0, Kp - Cin5), (0, Cmp - Cm))
                  ).astype(jnp.bfloat16)
    s1p = jnp.pad(params["s1"], ((0, 0), (0, Cmp - Cm)))
    b1p = jnp.pad(params["b1"], ((0, 0), (0, Cmp - Cm)))
    w2p = jnp.pad(params["w2"], ((0, Cmp - Cm), (0, Cop - Co))).astype(jnp.bfloat16)
    b2p = jnp.pad(params["b2"], ((0, 0), (0, Cop - Co)))

    out = head_conv(xs, w1p, s1p, b1p, w2p, b2p, width=W)            # (N, Cop, H*W)
    # Already channel-major: just reshape + slice the padded classes away (no transpose).
    return out.reshape(N, Cop, H, W)[:, :Co]


# ------------------------------------ main --------------------------------------

if __name__ == "__main__":
    key = jax.random.PRNGKey(0)
    kx, kd, kp = jax.random.split(key, 3)

    N, C, H, W = 2, 64, 16, 16       # in_channels=64 -> inter_channels=16
    out_channels = 8
    x = jax.random.normal(kx, (N, C, H, W), jnp.float32)
    dep = jax.random.normal(kd, (N, 1, 8, 8), jnp.float32)   # depth map, upsampled to (H, W)

    params = make_params(kp, C, out_channels)
    fwd = jax.jit(psp_head_dep_forward)
    out = fwd(params, x, dep)
    jax.block_until_ready(out)
    assert out.shape == (N, out_channels, H, W), out.shape
    assert bool(jnp.all(jnp.isfinite(out)))
    print("KERNEL_OK")
</pallas_src>

<mosaic_0001>
module attributes {stable_mosaic.version = 11 : i64} {
  func.func @_pyr_kernel(%arg0: i32, %arg1: memref<4x72x64xbf16, #tpu.memory_space<vmem>>, %arg2: memref<4x64x16xbf16, #tpu.memory_space<vmem>>, %arg3: memref<4x1x16xf32, #tpu.memory_space<vmem>>, %arg4: memref<4x1x16xf32, #tpu.memory_space<vmem>>, %arg5: memref<4x72x16xf32, #tpu.memory_space<vmem>>) attributes {dimension_semantics = [#tpu.dimension_semantics<arbitrary>], iteration_bounds = array<i64: 1>, scalar_prefetch = 0 : i64, scratch_operands = 0 : i64, tpu.core_type = #tpu.core_type<tc>, window_params = [{pipeline_mode = #tpu.pipeline_mode<synchronous>, transform_indices = @transform_0, window_bounds = array<i64: 4, 72, 64>}, {pipeline_mode = #tpu.pipeline_mode<synchronous>, transform_indices = @transform_1, window_bounds = array<i64: 4, 64, 16>}, {pipeline_mode = #tpu.pipeline_mode<synchronous>, transform_indices = @transform_2, window_bounds = array<i64: 4, 1, 16>}, {pipeline_mode = #tpu.pipeline_mode<synchronous>, transform_indices = @transform_3, window_bounds = array<i64: 4, 1, 16>}, {pipeline_mode = #tpu.pipeline_mode<synchronous>, transform_indices = @transform_4, window_bounds = array<i64: 4, 72, 16>}]} {
    %c0 = arith.constant 0 : index
    %c0_0 = arith.constant 0 : index
    %c0_1 = arith.constant 0 : index
    %0 = vector.load %arg1[%c0, %c0_0, %c0_1] : memref<4x72x64xbf16, #tpu.memory_space<vmem>>, vector<1x72x64xbf16>
    %1 = vector.shape_cast %0 : vector<1x72x64xbf16> to vector<72x64xbf16>
    %c0_2 = arith.constant 0 : index
    %c0_3 = arith.constant 0 : index
    %c0_4 = arith.constant 0 : index
    %2 = vector.load %arg2[%c0_2, %c0_3, %c0_4] : memref<4x64x16xbf16, #tpu.memory_space<vmem>>, vector<1x64x16xbf16>
    %3 = vector.shape_cast %2 : vector<1x64x16xbf16> to vector<64x16xbf16>
    %cst = arith.constant dense<0.000000e+00> : vector<72x16xf32>
    %4 = tpu.matmul %1, %3, %cst {dimension_numbers = #tpu.dot_dimension_numbers<[1], [0], [0], [1], [0, 0, 1, 1], [], []>} : vector<72x64xbf16>, vector<64x16xbf16>, vector<72x16xf32> -> vector<72x16xf32>
    %c0_5 = arith.constant 0 : index
    %c0_6 = arith.constant 0 : index
    %c0_7 = arith.constant 0 : index
    %5 = vector.load %arg3[%c0_5, %c0_6, %c0_7] : memref<4x1x16xf32, #tpu.memory_space<vmem>>, vector<1x1x16xf32>
    %6 = vector.shape_cast %5 : vector<1x1x16xf32> to vector<1x16xf32>
    %7 = vector.broadcast %6 : vector<1x16xf32> to vector<72x16xf32>
    %8 = arith.mulf %4, %7 : vector<72x16xf32>
    %c0_8 = arith.constant 0 : index
    %c0_9 = arith.constant 0 : index
    %c0_10 = arith.constant 0 : index
    %9 = vector.load %arg4[%c0_8, %c0_9, %c0_10] : memref<4x1x16xf32, #tpu.memory_space<vmem>>, vector<1x1x16xf32>
    %10 = vector.shape_cast %9 : vector<1x1x16xf32> to vector<1x16xf32>
    %11 = vector.broadcast %10 : vector<1x16xf32> to vector<72x16xf32>
    %12 = arith.addf %8, %11 : vector<72x16xf32>
    %cst_11 = arith.constant 0.000000e+00 : f32
    %13 = vector.broadcast %cst_11 : f32 to vector<72x16xf32>
    %14 = arith.maximumf %12, %13 : vector<72x16xf32>
    %c0_12 = arith.constant 0 : index
    %c0_13 = arith.constant 0 : index
    %c0_14 = arith.constant 0 : index
    %15 = vector.load %arg5[%c0_12, %c0_13, %c0_14] : memref<4x72x16xf32, #tpu.memory_space<vmem>>, vector<1x72x16xf32>
    %16 = vector.shape_cast %15 : vector<1x72x16xf32> to vector<72x16xf32>
    %17 = vector.shape_cast %14 : vector<72x16xf32> to vector<1x72x16xf32>
    tpu.vector_store %arg5[%c0_12, %c0_13, %c0_14], %17 {strides = array<i32>} : memref<4x72x16xf32, #tpu.memory_space<vmem>>, vector<1x72x16xf32>,
    %c1 = arith.constant 1 : index
    %c0_15 = arith.constant 0 : index
    %c0_16 = arith.constant 0 : index
    %18 = vector.load %arg1[%c1, %c0_15, %c0_16] : memref<4x72x64xbf16, #tpu.memory_space<vmem>>, vector<1x72x64xbf16>
    %19 = vector.shape_cast %18 : vector<1x72x64xbf16> to vector<72x64xbf16>
    %c1_17 = arith.constant 1 : index
    %c0_18 = arith.constant 0 : index
    %c0_19 = arith.constant 0 : index
    %20 = vector.load %arg2[%c1_17, %c0_18, %c0_19] : memref<4x64x16xbf16, #tpu.memory_space<vmem>>, vector<1x64x16xbf16>
    %21 = vector.shape_cast %20 : vector<1x64x16xbf16> to vector<64x16xbf16>
    %cst_20 = arith.constant dense<0.000000e+00> : vector<72x16xf32>
    %22 = tpu.matmul %19, %21, %cst_20 {dimension_numbers = #tpu.dot_dimension_numbers<[1], [0], [0], [1], [0, 0, 1, 1], [], []>} : vector<72x64xbf16>, vector<64x16xbf16>, vector<72x16xf32> -> vector<72x16xf32>
    %c1_21 = arith.constant 1 : index
    %c0_22 = arith.constant 0 : index
    %c0_23 = arith.constant 0 : index
    %23 = vector.load %arg3[%c1_21, %c0_22, %c0_23] : memref<4x1x16xf32, #tpu.memory_space<vmem>>, vector<1x1x16xf32>
    %24 = vector.shape_cast %23 : vector<1x1x16xf32> to vector<1x16xf32>
    %25 = vector.broadcast %24 : vector<1x16xf32> to vector<72x16xf32>
    %26 = arith.mulf %22, %25 : vector<72x16xf32>
    %c1_24 = arith.constant 1 : index
    %c0_25 = arith.constant 0 : index
    %c0_26 = arith.constant 0 : index
    %27 = vector.load %arg4[%c1_24, %c0_25, %c0_26] : memref<4x1x16xf32, #tpu.memory_space<vmem>>, vector<1x1x16xf32>
    %28 = vector.shape_cast %27 : vector<1x1x16xf32> to vector<1x16xf32>
    %29 = vector.broadcast %28 : vector<1x16xf32> to vector<72x16xf32>
    %30 = arith.addf %26, %29 : vector<72x16xf32>
    %cst_27 = arith.constant 0.000000e+00 : f32
    %31 = vector.broadcast %cst_27 : f32 to vector<72x16xf32>
    %32 = arith.maximumf %30, %31 : vector<72x16xf32>
    %c1_28 = arith.constant 1 : index
    %c0_29 = arith.constant 0 : index
    %c0_30 = arith.constant 0 : index
    %33 = vector.load %arg5[%c1_28, %c0_29, %c0_30] : memref<4x72x16xf32, #tpu.memory_space<vmem>>, vector<1x72x16xf32>
    %34 = vector.shape_cast %33 : vector<1x72x16xf32> to vector<72x16xf32>
    %35 = vector.shape_cast %32 : vector<72x16xf32> to vector<1x72x16xf32>
    tpu.vector_store %arg5[%c1_28, %c0_29, %c0_30], %35 {strides = array<i32>} : memref<4x72x16xf32, #tpu.memory_space<vmem>>, vector<1x72x16xf32>,
    %c2 = arith.constant 2 : index
    %c0_31 = arith.constant 0 : index
    %c0_32 = arith.constant 0 : index
    %36 = vector.load %arg1[%c2, %c0_31, %c0_32] : memref<4x72x64xbf16, #tpu.memory_space<vmem>>, vector<1x72x64xbf16>
    %37 = vector.shape_cast %36 : vector<1x72x64xbf16> to vector<72x64xbf16>
    %c2_33 = arith.constant 2 : index
    %c0_34 = arith.constant 0 : index
    %c0_35 = arith.constant 0 : index
    %38 = vector.load %arg2[%c2_33, %c0_34, %c0_35] : memref<4x64x16xbf16, #tpu.memory_space<vmem>>, vector<1x64x16xbf16>
    %39 = vector.shape_cast %38 : vector<1x64x16xbf16> to vector<64x16xbf16>
    %cst_36 = arith.constant dense<0.000000e+00> : vector<72x16xf32>
    %40 = tpu.matmul %37, %39, %cst_36 {dimension_numbers = #tpu.dot_dimension_numbers<[1], [0], [0], [1], [0, 0, 1, 1], [], []>} : vector<72x64xbf16>, vector<64x16xbf16>, vector<72x16xf32> -> vector<72x16xf32>
    %c2_37 = arith.constant 2 : index
    %c0_38 = arith.constant 0 : index
    %c0_39 = arith.constant 0 : index
    %41 = vector.load %arg3[%c2_37, %c0_38, %c0_39] : memref<4x1x16xf32, #tpu.memory_space<vmem>>, vector<1x1x16xf32>
    %42 = vector.shape_cast %41 : vector<1x1x16xf32> to vector<1x16xf32>
    %43 = vector.broadcast %42 : vector<1x16xf32> to vector<72x16xf32>
    %44 = arith.mulf %40, %43 : vector<72x16xf32>
    %c2_40 = arith.constant 2 : index
    %c0_41 = arith.constant 0 : index
    %c0_42 = arith.constant 0 : index
    %45 = vector.load %arg4[%c2_40, %c0_41, %c0_42] : memref<4x1x16xf32, #tpu.memory_space<vmem>>, vector<1x1x16xf32>
    %46 = vector.shape_cast %45 : vector<1x1x16xf32> to vector<1x16xf32>
    %47 = vector.broadcast %46 : vector<1x16xf32> to vector<72x16xf32>
    %48 = arith.addf %44, %47 : vector<72x16xf32>
    %cst_43 = arith.constant 0.000000e+00 : f32
    %49 = vector.broadcast %cst_43 : f32 to vector<72x16xf32>
    %50 = arith.maximumf %48, %49 : vector<72x16xf32>
    %c2_44 = arith.constant 2 : index
    %c0_45 = arith.constant 0 : index
    %c0_46 = arith.constant 0 : index
    %51 = vector.load %arg5[%c2_44, %c0_45, %c0_46] : memref<4x72x16xf32, #tpu.memory_space<vmem>>, vector<1x72x16xf32>
    %52 = vector.shape_cast %51 : vector<1x72x16xf32> to vector<72x16xf32>
    %53 = vector.shape_cast %50 : vector<72x16xf32> to vector<1x72x16xf32>
    tpu.vector_store %arg5[%c2_44, %c0_45, %c0_46], %53 {strides = array<i32>} : memref<4x72x16xf32, #tpu.memory_space<vmem>>, vector<1x72x16xf32>,
    %c3 = arith.constant 3 : index
    %c0_47 = arith.constant 0 : index
    %c0_48 = arith.constant 0 : index
    %54 = vector.load %arg1[%c3, %c0_47, %c0_48] : memref<4x72x64xbf16, #tpu.memory_space<vmem>>, vector<1x72x64xbf16>
    %55 = vector.shape_cast %54 : vector<1x72x64xbf16> to vector<72x64xbf16>
    %c3_49 = arith.constant 3 : index
    %c0_50 = arith.constant 0 : index
    %c0_51 = arith.constant 0 : index
    %56 = vector.load %arg2[%c3_49, %c0_50, %c0_51] : memref<4x64x16xbf16, #tpu.memory_space<vmem>>, vector<1x64x16xbf16>
    %57 = vector.shape_cast %56 : vector<1x64x16xbf16> to vector<64x16xbf16>
    %cst_52 = arith.constant dense<0.000000e+00> : vector<72x16xf32>
    %58 = tpu.matmul %55, %57, %cst_52 {dimension_numbers = #tpu.dot_dimension_numbers<[1], [0], [0], [1], [0, 0, 1, 1], [], []>} : vector<72x64xbf16>, vector<64x16xbf16>, vector<72x16xf32> -> vector<72x16xf32>
    %c3_53 = arith.constant 3 : index
    %c0_54 = arith.constant 0 : index
    %c0_55 = arith.constant 0 : index
    %59 = vector.load %arg3[%c3_53, %c0_54, %c0_55] : memref<4x1x16xf32, #tpu.memory_space<vmem>>, vector<1x1x16xf32>
    %60 = vector.shape_cast %59 : vector<1x1x16xf32> to vector<1x16xf32>
    %61 = vector.broadcast %60 : vector<1x16xf32> to vector<72x16xf32>
    %62 = arith.mulf %58, %61 : vector<72x16xf32>
    %c3_56 = arith.constant 3 : index
    %c0_57 = arith.constant 0 : index
    %c0_58 = arith.constant 0 : index
    %63 = vector.load %arg4[%c3_56, %c0_57, %c0_58] : memref<4x1x16xf32, #tpu.memory_space<vmem>>, vector<1x1x16xf32>
    %64 = vector.shape_cast %63 : vector<1x1x16xf32> to vector<1x16xf32>
    %65 = vector.broadcast %64 : vector<1x16xf32> to vector<72x16xf32>
    %66 = arith.addf %62, %65 : vector<72x16xf32>
    %cst_59 = arith.constant 0.000000e+00 : f32
    %67 = vector.broadcast %cst_59 : f32 to vector<72x16xf32>
    %68 = arith.maximumf %66, %67 : vector<72x16xf32>
    %c3_60 = arith.constant 3 : index
    %c0_61 = arith.constant 0 : index
    %c0_62 = arith.constant 0 : index
    %69 = vector.load %arg5[%c3_60, %c0_61, %c0_62] : memref<4x72x16xf32, #tpu.memory_space<vmem>>, vector<1x72x16xf32>
    %70 = vector.shape_cast %69 : vector<1x72x16xf32> to vector<72x16xf32>
    %71 = vector.shape_cast %68 : vector<72x16xf32> to vector<1x72x16xf32>
    tpu.vector_store %arg5[%c3_60, %c0_61, %c0_62], %71 {strides = array<i32>} : memref<4x72x16xf32, #tpu.memory_space<vmem>>, vector<1x72x16xf32>,
    return
  }
  func.func @transform_0(%arg0: i32) -> (i32, i32, i32) {
    %c0_i32 = arith.constant 0 : i32
    %c0_i32_0 = arith.constant 0 : i32
    %c0_i32_1 = arith.constant 0 : i32
    %c0_i32_2 = arith.constant 0 : i32
    return %c0_i32, %c0_i32_0, %c0_i32_1 : i32, i32, i32
  }
  func.func @transform_1(%arg0: i32) -> (i32, i32, i32) {
    %c0_i32 = arith.constant 0 : i32
    %c0_i32_0 = arith.constant 0 : i32
    %c0_i32_1 = arith.constant 0 : i32
    %c0_i32_2 = arith.constant 0 : i32
    return %c0_i32, %c0_i32_0, %c0_i32_1 : i32, i32, i32
  }
  func.func @transform_2(%arg0: i32) -> (i32, i32, i32) {
    %c0_i32 = arith.constant 0 : i32
    %c0_i32_0 = arith.constant 0 : i32
    %c0_i32_1 = arith.constant 0 : i32
    %c0_i32_2 = arith.constant 0 : i32
    return %c0_i32, %c0_i32_0, %c0_i32_1 : i32, i32, i32
  }
  func.func @transform_3(%arg0: i32) -> (i32, i32, i32) {
    %c0_i32 = arith.constant 0 : i32
    %c0_i32_0 = arith.constant 0 : i32
    %c0_i32_1 = arith.constant 0 : i32
    %c0_i32_2 = arith.constant 0 : i32
    return %c0_i32, %c0_i32_0, %c0_i32_1 : i32, i32, i32
  }
  func.func @transform_4(%arg0: i32) -> (i32, i32, i32) {
    %c0_i32 = arith.constant 0 : i32
    %c0_i32_0 = arith.constant 0 : i32
    %c0_i32_1 = arith.constant 0 : i32
    %c0_i32_2 = arith.constant 0 : i32
    return %c0_i32, %c0_i32_0, %c0_i32_1 : i32, i32, i32
  }
}

module attributes {stable_mosaic.version = 11 : i64} {
  func.func @_head_kernel(%arg0: i32, %arg1: memref<1x3x288x256xbf16, #tpu.memory_space<vmem>>, %arg2: memref<3x3x256x128xbf16, #tpu.memory_space<vmem>>, %arg3: memref<1x128xf32, #tpu.memory_space<vmem>>, %arg4: memref<1x128xf32, #tpu.memory_space<vmem>>, %arg5: memref<128x8xbf16, #tpu.memory_space<vmem>>, %arg6: memref<1x8xf32, #tpu.memory_space<vmem>>, %arg7: memref<1x8x256xf32, #tpu.memory_space<vmem>>) attributes {dimension_semantics = [#tpu.dimension_semantics<parallel>], iteration_bounds = array<i64: 2>, scalar_prefetch = 0 : i64, scratch_operands = 0 : i64, tpu.core_type = #tpu.core_type<tc>, window_params = [{transform_indices = @transform_0, window_bounds = array<i64: 1, 3, 288, 256>}, {pipeline_mode = #tpu.pipeline_mode<synchronous>, transform_indices = @transform_1, window_bounds = array<i64: 3, 3, 256, 128>}, {pipeline_mode = #tpu.pipeline_mode<synchronous>, transform_indices = @transform_2, window_bounds = array<i64: 1, 128>}, {pipeline_mode = #tpu.pipeline_mode<synchronous>, transform_indices = @transform_3, window_bounds = array<i64: 1, 128>}, {pipeline_mode = #tpu.pipeline_mode<synchronous>, transform_indices = @transform_4, window_bounds = array<i64: 128, 8>}, {pipeline_mode = #tpu.pipeline_mode<synchronous>, transform_indices = @transform_5, window_bounds = array<i64: 1, 8>}, {transform_indices = @transform_6, window_bounds = array<i64: 1, 8, 256>}]} {
    %c0 = arith.constant 0 : index
    %c0_0 = arith.constant 0 : index
    %c0_1 = arith.constant 0 : index
    %c0_2 = arith.constant 0 : index
    %0 = vector.load %arg1[%c0, %c0_0, %c0_1, %c0_2] : memref<1x3x288x256xbf16, #tpu.memory_space<vmem>>, vector<1x1x256x256xbf16>
    %1 = vector.shape_cast %0 : vector<1x1x256x256xbf16> to vector<256x256xbf16>
    %c0_3 = arith.constant 0 : index
    %c0_4 = arith.constant 0 : index
    %c0_5 = arith.constant 0 : index
    %c0_6 = arith.constant 0 : index
    %2 = vector.load %arg2[%c0_3, %c0_4, %c0_5, %c0_6] : memref<3x3x256x128xbf16, #tpu.memory_space<vmem>>, vector<1x1x256x128xbf16>
    %3 = vector.shape_cast %2 : vector<1x1x256x128xbf16> to vector<256x128xbf16>
    %cst = arith.constant dense<0.000000e+00> : vector<256x128xf32>
    %4 = tpu.matmul %1, %3, %cst {dimension_numbers = #tpu.dot_dimension_numbers<[1], [0], [0], [1], [0, 0, 1, 1], [], []>} : vector<256x256xbf16>, vector<256x128xbf16>, vector<256x128xf32> -> vector<256x128xf32>
    %c0_7 = arith.constant 0 : index
    %c1 = arith.constant 1 : index
    %c0_8 = arith.constant 0 : index
    %c0_9 = arith.constant 0 : index
    %5 = vector.load %arg1[%c0_7, %c1, %c0_8, %c0_9] : memref<1x3x288x256xbf16, #tpu.memory_space<vmem>>, vector<1x1x256x256xbf16>
    %6 = vector.shape_cast %5 : vector<1x1x256x256xbf16> to vector<256x256xbf16>
    %c0_10 = arith.constant 0 : index
    %c1_11 = arith.constant 1 : index
    %c0_12 = arith.constant 0 : index
    %c0_13 = arith.constant 0 : index
    %7 = vector.load %arg2[%c0_10, %c1_11, %c0_12, %c0_13] : memref<3x3x256x128xbf16, #tpu.memory_space<vmem>>, vector<1x1x256x128xbf16>
    %8 = vector.shape_cast %7 : vector<1x1x256x128xbf16> to vector<256x128xbf16>
    %cst_14 = arith.constant dense<0.000000e+00> : vector<256x128xf32>
    %9 = tpu.matmul %6, %8, %cst_14 {dimension_numbers = #tpu.dot_dimension_numbers<[1], [0], [0], [1], [0, 0, 1, 1], [], []>} : vector<256x256xbf16>, vector<256x128xbf16>, vector<256x128xf32> -> vector<256x128xf32>
    %10 = arith.addf %4, %9 : vector<256x128xf32>
    %c0_15 = arith.constant 0 : index
    %c2 = arith.constant 2 : index
    %c0_16 = arith.constant 0 : index
    %c0_17 = arith.constant 0 : index
    %11 = vector.load %arg1[%c0_15, %c2, %c0_16, %c0_17] : memref<1x3x288x256xbf16, #tpu.memory_space<vmem>>, vector<1x1x256x256xbf16>
    %12 = vector.shape_cast %11 : vector<1x1x256x256xbf16> to vector<256x256xbf16>
    %c0_18 = arith.constant 0 : index
    %c2_19 = arith.constant 2 : index
    %c0_20 = arith.constant 0 : index
    %c0_21 = arith.constant 0 : index
    %13 = vector.load %arg2[%c0_18, %c2_19, %c0_20, %c0_21] : memref<3x3x256x128xbf16, #tpu.memory_space<vmem>>, vector<1x1x256x128xbf16>
    %14 = vector.shape_cast %13 : vector<1x1x256x128xbf16> to vector<256x128xbf16>
    %cst_22 = arith.constant dense<0.000000e+00> : vector<256x128xf32>
    %15 = tpu.matmul %12, %14, %cst_22 {dimension_numbers = #tpu.dot_dimension_numbers<[1], [0], [0], [1], [0, 0, 1, 1], [], []>} : vector<256x256xbf16>, vector<256x128xbf16>, vector<256x128xf32> -> vector<256x128xf32>
    %16 = arith.addf %10, %15 : vector<256x128xf32>
    %c0_23 = arith.constant 0 : index
    %c0_24 = arith.constant 0 : index
    %c16 = arith.constant 16 : index
    %c0_25 = arith.constant 0 : index
    %17 = vector.load %arg1[%c0_23, %c0_24, %c16, %c0_25] : memref<1x3x288x256xbf16, #tpu.memory_space<vmem>>, vector<1x1x256x256xbf16>
    %18 = vector.shape_cast %17 : vector<1x1x256x256xbf16> to vector<256x256xbf16>
    %c1_26 = arith.constant 1 : index
    %c0_27 = arith.constant 0 : index
    %c0_28 = arith.constant 0 : index
    %c0_29 = arith.constant 0 : index
    %19 = vector.load %arg2[%c1_26, %c0_27, %c0_28, %c0_29] : memref<3x3x256x128xbf16, #tpu.memory_space<vmem>>, vector<1x1x256x128xbf16>
    %20 = vector.shape_cast %19 : vector<1x1x256x128xbf16> to vector<256x128xbf16>
    %cst_30 = arith.constant dense<0.000000e+00> : vector<256x128xf32>
    %21 = tpu.matmul %18, %20, %cst_30 {dimension_numbers = #tpu.dot_dimension_numbers<[1], [0], [0], [1], [0, 0, 1, 1], [], []>} : vector<256x256xbf16>, vector<256x128xbf16>, vector<256x128xf32> -> vector<256x128xf32>
    %22 = arith.addf %16, %21 : vector<256x128xf32>
    %c0_31 = arith.constant 0 : index
    %c1_32 = arith.constant 1 : index
    %c16_33 = arith.constant 16 : index
    %c0_34 = arith.constant 0 : index
    %23 = vector.load %arg1[%c0_31, %c1_32, %c16_33, %c0_34] : memref<1x3x288x256xbf16, #tpu.memory_space<vmem>>, vector<1x1x256x256xbf16>
    %24 = vector.shape_cast %23 : vector<1x1x256x256xbf16> to vector<256x256xbf16>
    %c1_35 = arith.constant 1 : index
    %c1_36 = arith.constant 1 : index
    %c0_37 = arith.constant 0 : index
    %c0_38 = arith.constant 0 : index
    %25 = vector.load %arg2[%c1_35, %c1_36, %c0_37, %c0_38] : memref<3x3x256x128xbf16, #tpu.memory_space<vmem>>, vector<1x1x256x128xbf16>
    %26 = vector.shape_cast %25 : vector<1x1x256x128xbf16> to vector<256x128xbf16>
    %cst_39 = arith.constant dense<0.000000e+00> : vector<256x128xf32>
    %27 = tpu.matmul %24, %26, %cst_39 {dimension_numbers = #tpu.dot_dimension_numbers<[1], [0], [0], [1], [0, 0, 1, 1], [], []>} : vector<256x256xbf16>, vector<256x128xbf16>, vector<256x128xf32> -> vector<256x128xf32>
    %28 = arith.addf %22, %27 : vector<256x128xf32>
    %c0_40 = arith.constant 0 : index
    %c2_41 = arith.constant 2 : index
    %c16_42 = arith.constant 16 : index
    %c0_43 = arith.constant 0 : index
    %29 = vector.load %arg1[%c0_40, %c2_41, %c16_42, %c0_43] : memref<1x3x288x256xbf16, #tpu.memory_space<vmem>>, vector<1x1x256x256xbf16>
    %30 = vector.shape_cast %29 : vector<1x1x256x256xbf16> to vector<256x256xbf16>
    %c1_44 = arith.constant 1 : index
    %c2_45 = arith.constant 2 : index
    %c0_46 = arith.constant 0 : index
    %c0_47 = arith.constant 0 : index
    %31 = vector.load %arg2[%c1_44, %c2_45, %c0_46, %c0_47] : memref<3x3x256x128xbf16, #tpu.memory_space<vmem>>, vector<1x1x256x128xbf16>
    %32 = vector.shape_cast %31 : vector<1x1x256x128xbf16> to vector<256x128xbf16>
    %cst_48 = arith.constant dense<0.000000e+00> : vector<256x128xf32>
    %33 = tpu.matmul %30, %32, %cst_48 {dimension_numbers = #tpu.dot_dimension_numbers<[1], [0], [0], [1], [0, 0, 1, 1], [], []>} : vector<256x256xbf16>, vector<256x128xbf16>, vector<256x128xf32> -> vector<256x128xf32>
    %34 = arith.addf %28, %33 : vector<256x128xf32>
    %c0_49 = arith.constant 0 : index
    %c0_50 = arith.constant 0 : index
    %c32 = arith.constant 32 : index
    %c0_51 = arith.constant 0 : index
    %35 = vector.load %arg1[%c0_49, %c0_50, %c32, %c0_51] : memref<1x3x288x256xbf16, #tpu.memory_space<vmem>>, vector<1x1x256x256xbf16>
    %36 = vector.shape_cast %35 : vector<1x1x256x256xbf16> to vector<256x256xbf16>
    %c2_52 = arith.constant 2 : index
    %c0_53 = arith.constant 0 : index
    %c0_54 = arith.constant 0 : index
    %c0_55 = arith.constant 0 : index
    %37 = vector.load %arg2[%c2_52, %c0_53, %c0_54, %c0_55] : memref<3x3x256x128xbf16, #tpu.memory_space<vmem>>, vector<1x1x256x128xbf16>
    %38 = vector.shape_cast %37 : vector<1x1x256x128xbf16> to vector<256x128xbf16>
    %cst_56 = arith.constant dense<0.000000e+00> : vector<256x128xf32>
    %39 = tpu.matmul %36, %38, %cst_56 {dimension_numbers = #tpu.dot_dimension_numbers<[1], [0], [0], [1], [0, 0, 1, 1], [], []>} : vector<256x256xbf16>, vector<256x128xbf16>, vector<256x128xf32> -> vector<256x128xf32>
    %40 = arith.addf %34, %39 : vector<256x128xf32>
    %c0_57 = arith.constant 0 : index
    %c1_58 = arith.constant 1 : index
    %c32_59 = arith.constant 32 : index
    %c0_60 = arith.constant 0 : index
    %41 = vector.load %arg1[%c0_57, %c1_58, %c32_59, %c0_60] : memref<1x3x288x256xbf16, #tpu.memory_space<vmem>>, vector<1x1x256x256xbf16>
    %42 = vector.shape_cast %41 : vector<1x1x256x256xbf16> to vector<256x256xbf16>
    %c2_61 = arith.constant 2 : index
    %c1_62 = arith.constant 1 : index
    %c0_63 = arith.constant 0 : index
    %c0_64 = arith.constant 0 : index
    %43 = vector.load %arg2[%c2_61, %c1_62, %c0_63, %c0_64] : memref<3x3x256x128xbf16, #tpu.memory_space<vmem>>, vector<1x1x256x128xbf16>
    %44 = vector.shape_cast %43 : vector<1x1x256x128xbf16> to vector<256x128xbf16>
    %cst_65 = arith.constant dense<0.000000e+00> : vector<256x128xf32>
    %45 = tpu.matmul %42, %44, %cst_65 {dimension_numbers = #tpu.dot_dimension_numbers<[1], [0], [0], [1], [0, 0, 1, 1], [], []>} : vector<256x256xbf16>, vector<256x128xbf16>, vector<256x128xf32> -> vector<256x128xf32>
    %46 = arith.addf %40, %45 : vector<256x128xf32>
    %c0_66 = arith.constant 0 : index
    %c2_67 = arith.constant 2 : index
    %c32_68 = arith.constant 32 : index
    %c0_69 = arith.constant 0 : index
    %47 = vector.load %arg1[%c0_66, %c2_67, %c32_68, %c0_69] : memref<1x3x288x256xbf16, #tpu.memory_space<vmem>>, vector<1x1x256x256xbf16>
    %48 = vector.shape_cast %47 : vector<1x1x256x256xbf16> to vector<256x256xbf16>
    %c2_70 = arith.constant 2 : index
    %c2_71 = arith.constant 2 : index
    %c0_72 = arith.constant 0 : index
    %c0_73 = arith.constant 0 : index
    %49 = vector.load %arg2[%c2_70, %c2_71, %c0_72, %c0_73] : memref<3x3x256x128xbf16, #tpu.memory_space<vmem>>, vector<1x1x256x128xbf16>
    %50 = vector.shape_cast %49 : vector<1x1x256x128xbf16> to vector<256x128xbf16>
    %cst_74 = arith.constant dense<0.000000e+00> : vector<256x128xf32>
    %51 = tpu.matmul %48, %50, %cst_74 {dimension_numbers = #tpu.dot_dimension_numbers<[1], [0], [0], [1], [0, 0, 1, 1], [], []>} : vector<256x256xbf16>, vector<256x128xbf16>, vector<256x128xf32> -> vector<256x128xf32>
    %52 = arith.addf %46, %51 : vector<256x128xf32>
    %c0_75 = arith.constant 0 : index
    %c0_76 = arith.constant 0 : index
    %53 = vector.load %arg3[%c0_75, %c0_76] : memref<1x128xf32, #tpu.memory_space<vmem>>, vector<1x128xf32>
    %54 = vector.broadcast %53 : vector<1x128xf32> to vector<256x128xf32>
    %55 = arith.mulf %52, %54 : vector<256x128xf32>
    %c0_77 = arith.constant 0 : index
    %c0_78 = arith.constant 0 : index
    %56 = vector.load %arg4[%c0_77, %c0_78] : memref<1x128xf32, #tpu.memory_space<vmem>>, vector<1x128xf32>
    %57 = vector.broadcast %56 : vector<1x128xf32> to vector<256x128xf32>
    %58 = arith.addf %55, %57 : vector<256x128xf32>
    %cst_79 = arith.constant 0.000000e+00 : f32
    %59 = vector.broadcast %cst_79 : f32 to vector<256x128xf32>
    %60 = arith.maximumf %58, %59 : vector<256x128xf32>
    %61 = arith.truncf %60 : vector<256x128xf32> to vector<256x128xbf16>
    %c0_80 = arith.constant 0 : index
    %c0_81 = arith.constant 0 : index
    %62 = vector.load %arg5[%c0_80, %c0_81] : memref<128x8xbf16, #tpu.memory_space<vmem>>, vector<128x8xbf16>
    %cst_82 = arith.constant dense<0.000000e+00> : vector<256x8xf32>
    %63 = tpu.matmul %61, %62, %cst_82 {dimension_numbers = #tpu.dot_dimension_numbers<[1], [0], [0], [1], [0, 0, 1, 1], [], []>} : vector<256x128xbf16>, vector<128x8xbf16>, vector<256x8xf32> -> vector<256x8xf32>
    %c0_83 = arith.constant 0 : index
    %c0_84 = arith.constant 0 : index
    %64 = vector.load %arg6[%c0_83, %c0_84] : memref<1x8xf32, #tpu.memory_space<vmem>>, vector<1x8xf32>
    %65 = vector.broadcast %64 : vector<1x8xf32> to vector<256x8xf32>
    %66 = arith.addf %63, %65 : vector<256x8xf32>
    %67 = tpu.transpose %66, [1, 0] : vector<256x8xf32> -> vector<8x256xf32>
    %c0_85 = arith.constant 0 : index
    %c0_86 = arith.constant 0 : index
    %c0_87 = arith.constant 0 : index
    %68 = vector.load %arg7[%c0_85, %c0_86, %c0_87] : memref<1x8x256xf32, #tpu.memory_space<vmem>>, vector<1x8x256xf32>
    %69 = vector.shape_cast %68 : vector<1x8x256xf32> to vector<8x256xf32>
    %70 = vector.shape_cast %67 : vector<8x256xf32> to vector<1x8x256xf32>
    tpu.vector_store %arg7[%c0_85, %c0_86, %c0_87], %70 {strides = array<i32>} : memref<1x8x256xf32, #tpu.memory_space<vmem>>, vector<1x8x256xf32>,
    return
  }
  func.func @transform_0(%arg0: i32) -> (i32, i32, i32, i32) {
    %c0_i32 = arith.constant 0 : i32
    %c0_i32_0 = arith.constant 0 : i32
    %c0_i32_1 = arith.constant 0 : i32
    %c0_i32_2 = arith.constant 0 : i32
    return %arg0, %c0_i32, %c0_i32_0, %c0_i32_1 : i32, i32, i32, i32
  }
  func.func @transform_1(%arg0: i32) -> (i32, i32, i32, i32) {
    %c0_i32 = arith.constant 0 : i32
    %c0_i32_0 = arith.constant 0 : i32
    %c0_i32_1 = arith.constant 0 : i32
    %c0_i32_2 = arith.constant 0 : i32
    %c0_i32_3 = arith.constant 0 : i32
    return %c0_i32, %c0_i32_0, %c0_i32_1, %c0_i32_2 : i32, i32, i32, i32
  }
  func.func @transform_2(%arg0: i32) -> (i32, i32) {
    %c0_i32 = arith.constant 0 : i32
    %c0_i32_0 = arith.constant 0 : i32
    %c0_i32_1 = arith.constant 0 : i32
    return %c0_i32, %c0_i32_0 : i32, i32
  }
  func.func @transform_3(%arg0: i32) -> (i32, i32) {
    %c0_i32 = arith.constant 0 : i32
    %c0_i32_0 = arith.constant 0 : i32
    %c0_i32_1 = arith.constant 0 : i32
    return %c0_i32, %c0_i32_0 : i32, i32
  }
  func.func @transform_4(%arg0: i32) -> (i32, i32) {
    %c0_i32 = arith.constant 0 : i32
    %c0_i32_0 = arith.constant 0 : i32
    %c0_i32_1 = arith.constant 0 : i32
    return %c0_i32, %c0_i32_0 : i32, i32
  }
  func.func @transform_5(%arg0: i32) -> (i32, i32) {
    %c0_i32 = arith.constant 0 : i32
    %c0_i32_0 = arith.constant 0 : i32
    %c0_i32_1 = arith.constant 0 : i32
    return %c0_i32, %c0_i32_0 : i32, i32
  }
  func.func @transform_6(%arg0: i32) -> (i32, i32, i32) {
    %c0_i32 = arith.constant 0 : i32
    %c0_i32_0 = arith.constant 0 : i32
    %c0_i32_1 = arith.constant 0 : i32
    return %arg0, %c0_i32, %c0_i32_0 : i32, i32, i32
  }
}

</mosaic_0001>

<bundles_post_ra>
// kernel: psp_head_dep_forward.2
= control target key start
LH: loop header
LB: loop body
LE: loop exit
PB: predicated region body
PF: predicated region fallthrough
CT: control target
= control target key end

     0   :  { %vm82_vm0 = vcmask 523264   ;;  %vm166_vm1 = vcmask 130048   ;;  %s1344_s1 = inlined_call_operand.vmem [shape: bf16[4,64,16], index: 1, kind: input, shape index: {}]   ;;  %s1345_s2 = inlined_call_operand.vmem [shape: f32[4,1,16], index: 2, kind: input, shape index: {}]   ;;  %s1346_s3 = inlined_call_operand.vmem [shape: f32[4,1,16], index: 3, kind: input, shape index: {}]   ;;  %s1347_s0 = inlined_call_operand.vmem [shape: bf16[4,72,64], index: 0, kind: input, shape index: {}]   ;;  %s1348_s4 = inlined_call_operand.vmem [shape: f32[4,72,16], index: 4, kind: output, shape index: {}]  }
   0x1   :  { %v902_v0 = vld [vmem:[%s1344_s1 + $0x18] sm:$0xff]  ;;  %v901_v4 = vld [vmem:[%s1344_s1 + $0x10] sm:$0xff]  ;;  %v900_v8 = vld [vmem:[%s1344_s1 + $0x8] sm:$0xff] }
   0x2   :  { %v910_v1 = vld [vmem:[%s1344_s1 + $0x38] sm:$0xff]  ;;  %102 = vmatpush.bf16.msra.mxu0 %v902_v0  ;;  %v909_v5 = vld [vmem:[%s1344_s1 + $0x30] sm:$0xff]  ;;  %v908_v9 = vld [vmem:[%s1344_s1 + $0x28] sm:$0xff] }
   0x3   :  { %v918_v2 = vld [vmem:[%s1344_s1 + $0x58] sm:$0xff]  ;;  %261 = vmatpush.bf16.msra.mxu1 %v910_v1  ;;  %v917_v6 = vld [vmem:[%s1344_s1 + $0x50] sm:$0xff]  ;;  %v916_v10 = vld [vmem:[%s1344_s1 + $0x48] sm:$0xff] }
   0x4   :  { %v926_v3 = vld [vmem:[%s1344_s1 + $0x78] sm:$0xff]  ;;  %422 = vmatpush.bf16.msra.mxu2 %v918_v2  ;;  %v925_v7 = vld [vmem:[%s1344_s1 + $0x70] sm:$0xff]  ;;  %v924_v11 = vld [vmem:[%s1344_s1 + $0x68] sm:$0xff] }
   0x5   :  { %583 = vmatpush.bf16.msra.mxu3 %v926_v3  ;;  %v899_v12 = vld [vmem:[%s1344_s1] sm:$0xff]  ;;  %v911_v18 = vld [vmem:[%s1347_s0 + $0x48] sm:$0xff]  ;;  %v912_v22 = vld [vmem:[%s1347_s0 + $0x50] sm:$0xff] }
   0x6   :  { %103 = vmatpush.bf16.msra.mxu0 %v901_v4  ;;  %v907_v13 = vld [vmem:[%s1344_s1 + $0x20] sm:$0xff]  ;;  %v919_v19 = vld [vmem:[%s1347_s0 + $0x6c] sm:$0xff]  ;;  %v920_v23 = vld [vmem:[%s1347_s0 + $0x74] sm:$0xff] }
   0x7   :  { %262 = vmatpush.bf16.msra.mxu1 %v909_v5  ;;  %v915_v14 = vld [vmem:[%s1344_s1 + $0x40] sm:$0xff]  ;;  %v896_v20 = vld [vmem:[%s1347_s0 + $0x8] sm:$0xff]  ;;  %v897_v24 = vld [vmem:[%s1347_s0 + $0x10] sm:$0xff] }
   0x8   :  { %423 = vmatpush.bf16.msra.mxu2 %v917_v6  ;;  %v923_v15 = vld [vmem:[%s1344_s1 + $0x60] sm:$0xff]  ;;  %v904_v21 = vld [vmem:[%s1347_s0 + $0x2c] sm:$0xff]  ;;  %v905_v25 = vld [vmem:[%s1347_s0 + $0x34] sm:$0xff] }
   0x9   :  { %584 = vmatpush.bf16.msra.mxu3 %v925_v7  ;;  %v895_v16 = vld [vmem:[%s1347_s0] sm:$0xff]  ;;  %v913_v26 = vld [vmem:[%s1347_s0 + $0x58] sm:$0xff]  ;;  %v773_v34 = vld [vmem:[%s1347_s0 + $0x68] sm:$0xf] }
   0xa   :  { %104 = vmatpush.bf16.msra.mxu0 %v900_v8  ;;  %v903_v17 = vld [vmem:[%s1347_s0 + $0x24] sm:$0xff]  ;;  %v921_v27 = vld [vmem:[%s1347_s0 + $0x7c] sm:$0xff]  ;;  %v838_v35 = vld [vmem:[%s1347_s0 + $0x8c] sm:$0xf]  ;;  %v373_v38 = vunpack.c.l.b16 %v773_v34 }
   0xb   :  { %263 = vmatpush.bf16.msra.mxu1 %v908_v9  ;;  %v898_v28 = vld [vmem:[%s1347_s0 + $0x18] sm:$0xff]  ;;  %v914_v30 = vld [vmem:[%s1347_s0 + $0x60] sm:$0xff]  ;;  %v534_v39 = vunpack.c.l.b16 %v838_v35 }
   0xc   :  { %424 = vmatpush.bf16.msra.mxu2 %v916_v10  ;;  %v906_v29 = vld [vmem:[%s1347_s0 + $0x3c] sm:$0xff]  ;;  %v922_v31 = vld [vmem:[%s1347_s0 + $0x84] sm:$0xff]  ;;  %v378_v42 = vpack.c.b16 %v373_v38, %v373_v38 }
   0xd   :  { %585 = vmatpush.bf16.msra.mxu3 %v924_v11  ;;  %v26_v32 = vld [vmem:[%s1347_s0 + $0x20] sm:$0xf]  ;;  %v708_v33 = vld [vmem:[%s1347_s0 + $0x44] sm:$0xf]  ;;  %v539_v43 = vpack.c.b16 %v534_v39, %v534_v39 }
   0xe   :  { %105 = vmatpush.bf16.msra.mxu0 %v899_v12  ;;  %v52_v36 = vunpack.c.l.b16 %v26_v32  ;;  %v212_v37 = vunpack.c.l.b16 %v708_v33  ;;  %v1091_v44 = vld [vmem:[%s1345_s2] ss:$0 sm:$0xff]  ;;  %v1096_v45 = vld [vmem:[%s1345_s2 + $0x1] ss:$0 sm:$0xff]  ;;  %v1115_v54 = vld [vmem:[%s1345_s2 + $0x2] ss:$0 sm:$0xff] }
   0xf   :  { %264 = vmatpush.bf16.msra.mxu1 %v907_v13  ;;  %v1101_v46 = vld [vmem:[%s1346_s3] ss:$0 sm:$0xff]  ;;  %v1106_v47 = vld [vmem:[%s1346_s3 + $0x1] ss:$0 sm:$0xff]  ;;  %v1120_v55 = vld [vmem:[%s1345_s2 + $0x3] ss:$0 sm:$0xff] }
  0x10   :  { %425 = vmatpush.bf16.msra.mxu2 %v915_v14  ;;  %v57_v40 = vpack.c.b16 %v52_v36, %v52_v36  ;;  %v217_v41 = vpack.c.b16 %v212_v37, %v212_v37  ;;  %v1125_v58 = vld [vmem:[%s1346_s3 + $0x2] ss:$0 sm:$0xff]  ;;  %v1130_v59 = vld [vmem:[%s1346_s3 + $0x3] ss:$0 sm:$0xff] }
  0x11   :  { %586 = vmatpush.bf16.msra.mxu3 %v923_v15  ;;  %695 = vmatmul.msk.bf16.vlgmr.msra.gmra.mxu0 %vm82_vm0, %v895_v16 }
  0x12   :  { %749 = vmatmul.msk.bf16.vlgmr.msra.gmra.mxu1 %vm82_vm0, %v903_v17 }
  0x13   :  { %814 = vmatmul.msk.bf16.vlgmr.msra.gmra.mxu2 %vm82_vm0, %v911_v18 }
  0x14   :  { %879 = vmatmul.msk.bf16.vlgmr.msra.gmra.mxu3 %vm82_vm0, %v919_v19 }
  0x21   :  { %696 = vmatmul.msk.bf16.gmra.mxu0 %vm82_vm0, %v896_v20 }
  0x22   :  { %750 = vmatmul.msk.bf16.gmra.mxu1 %vm82_vm0, %v904_v21 }
  0x23   :  { %815 = vmatmul.msk.bf16.gmra.mxu2 %vm82_vm0, %v912_v22 }
  0x24   :  { %880 = vmatmul.msk.bf16.gmra.mxu3 %vm82_vm0, %v920_v23 }
  0x31   :  { %697 = vmatmul.msk.bf16.gmra.mxu0 %vm82_vm0, %v897_v24 }
  0x32   :  { %751 = vmatmul.msk.bf16.gmra.mxu1 %vm82_vm0, %v905_v25 }
  0x33   :  { %816 = vmatmul.msk.bf16.gmra.mxu2 %vm82_vm0, %v913_v26 }
  0x34   :  { %881 = vmatmul.msk.bf16.gmra.mxu3 %vm82_vm0, %v921_v27 }
  0x41   :  { %698 = vmatmul.msk.bf16.gmra.mxu0 %vm82_vm0, %v898_v28 }
  0x42   :  { %752 = vmatmul.msk.bf16.gmra.mxu1 %vm82_vm0, %v906_v29 }
  0x43   :  { %817 = vmatmul.msk.bf16.gmra.mxu2 %vm82_vm0, %v914_v30 }
  0x44   :  { %882 = vmatmul.msk.bf16.gmra.mxu3 %vm82_vm0, %v922_v31 }
  0x51   :  { %699 = vmatmul.msk.bf16.gmra.mxu0 %vm82_vm0, %v57_v40 }
  0x52   :  { %753 = vmatmul.msk.bf16.gmra.mxu1 %vm82_vm0, %v217_v41 }
  0x53   :  { %818 = vmatmul.msk.bf16.gmra.mxu2 %vm82_vm0, %v378_v42 }
  0x54   :  { %883 = vmatmul.msk.bf16.gmra.mxu3 %vm82_vm0, %v539_v43 }
  0x8e   :  { %v107_v48 = vpop.f32.mrf.mxu0 }
  0x8f   :  { %v266_v49 = vpop.f32.mrf.mxu1  ;;  %v135_v50 = vmul.f32 %v1091_v44, %v107_v48 }
  0x90   :  { %v295_v51 = vmul.f32 %v1096_v45, %v266_v49 }
  0x91   :  { %v148_v52 = vadd.f32 %v1101_v46, %v135_v50 }
  0x92   :  { %v309_v53 = vadd.f32 %v1106_v47, %v295_v51 }
  0x93   :  { %v157_v56 = vmax.f32 %v148_v52, 0.0 }
  0x94   :  { %v318_v57 = vmax.f32 %v309_v53, 0.0 }
  0x95   :  { %167 = vst.msk [vmem:[%s1348_s4] sm:$0xff] %vm166_vm1, %v157_v56 }
  0x96   :  { %v427_v60 = vpop.f32.mrf.mxu2  ;;  %756 = vst.msk [vmem:[%s1348_s4 + $0x48] sm:$0xff] %vm166_vm1, %v318_v57  ;;  %v109_v0 = vpop.f32.mrf.mxu0 }
  0x97   :  { %v588_v61 = vpop.f32.mrf.mxu3  ;;  %v456_v62 = vmul.f32 %v1115_v54, %v427_v60  ;;  %v268_v1 = vpop.f32.mrf.mxu1  ;;  %v136_v2 = vmul.f32 %v1091_v44, %v109_v0 }
  0x98   :  { %v617_v63 = vmul.f32 %v1120_v55, %v588_v61  ;;  %v296_v3 = vmul.f32 %v1096_v45, %v268_v1 }
  0x99   :  { %v470_v4 = vadd.f32 %v1125_v58, %v456_v62  ;;  %v149_v6 = vadd.f32 %v1101_v46, %v136_v2 }
  0x9a   :  { %v631_v5 = vadd.f32 %v1130_v59, %v617_v63  ;;  %v310_v7 = vadd.f32 %v1106_v47, %v296_v3 }
  0x9b   :  { %v479_v8 = vmax.f32 %v470_v4, 0.0  ;;  %v158_v10 = vmax.f32 %v149_v6, 0.0 }
  0x9c   :  { %v640_v9 = vmax.f32 %v631_v5, 0.0  ;;  %v319_v11 = vmax.f32 %v310_v7, 0.0 }
  0x9d   :  { %821 = vst.msk [vmem:[%s1348_s4 + $0x90] sm:$0xff] %vm166_vm1, %v479_v8 }
  0x9e   :  { %886 = vst.msk [vmem:[%s1348_s4 + $0xd8] sm:$0xff] %vm166_vm1, %v640_v9  ;;  %v429_v12 = vpop.f32.mrf.mxu2  ;;  %v112_v16 = vpop.f32.mrf.mxu0 }
  0x9f   :  { %v590_v13 = vpop.f32.mrf.mxu3  ;;  %168 = vst.msk [vmem:[%s1348_s4 + $0x8] sm:$0xff] %vm166_vm1, %v158_v10  ;;  %v457_v14 = vmul.f32 %v1115_v54, %v429_v12  ;;  %v271_v17 = vpop.f32.mrf.mxu1  ;;  %v137_v18 = vmul.f32 %v1091_v44, %v112_v16 }
  0xa0   :  { %v618_v15 = vmul.f32 %v1120_v55, %v590_v13  ;;  %757 = vst.msk [vmem:[%s1348_s4 + $0x50] sm:$0xff] %vm166_vm1, %v319_v11  ;;  %v297_v19 = vmul.f32 %v1096_v45, %v271_v17 }
  0xa1   :  { %v471_v20 = vadd.f32 %v1125_v58, %v457_v14  ;;  %v150_v22 = vadd.f32 %v1101_v46, %v137_v18 }
  0xa2   :  { %v632_v21 = vadd.f32 %v1130_v59, %v618_v15  ;;  %v311_v23 = vadd.f32 %v1106_v47, %v297_v19 }
  0xa3   :  { %v480_v24 = vmax.f32 %v471_v20, 0.0  ;;  %v159_v26 = vmax.f32 %v150_v22, 0.0 }
  0xa4   :  { %v641_v25 = vmax.f32 %v632_v21, 0.0  ;;  %v320_v27 = vmax.f32 %v311_v23, 0.0 }
  0xa5   :  { %822 = vst.msk [vmem:[%s1348_s4 + $0x98] sm:$0xff] %vm166_vm1, %v480_v24 }
  0xa6   :  { %887 = vst.msk [vmem:[%s1348_s4 + $0xe0] sm:$0xff] %vm166_vm1, %v641_v25  ;;  %v432_v28 = vpop.f32.mrf.mxu2  ;;  %v114_v32 = vpop.f32.mrf.mxu0 }
  0xa7   :  { %v593_v29 = vpop.f32.mrf.mxu3  ;;  %169 = vst.msk [vmem:[%s1348_s4 + $0x10] sm:$0xff] %vm166_vm1, %v159_v26  ;;  %v458_v30 = vmul.f32 %v1115_v54, %v432_v28  ;;  %v273_v33 = vpop.f32.mrf.mxu1  ;;  %v138_v34 = vmul.f32 %v1091_v44, %v114_v32 }
  0xa8   :  { %v619_v31 = vmul.f32 %v1120_v55, %v593_v29  ;;  %758 = vst.msk [vmem:[%s1348_s4 + $0x58] sm:$0xff] %vm166_vm1, %v320_v27  ;;  %v298_v35 = vmul.f32 %v1096_v45, %v273_v33 }
  0xa9   :  { %v472_v36 = vadd.f32 %v1125_v58, %v458_v30  ;;  %v151_v38 = vadd.f32 %v1101_v46, %v138_v34 }
  0xaa   :  { %v633_v37 = vadd.f32 %v1130_v59, %v619_v31  ;;  %v312_v39 = vadd.f32 %v1106_v47, %v298_v35 }
  0xab   :  { %v481_v40 = vmax.f32 %v472_v36, 0.0  ;;  %v160_v42 = vmax.f32 %v151_v38, 0.0 }
  0xac   :  { %v642_v41 = vmax.f32 %v633_v37, 0.0  ;;  %v321_v43 = vmax.f32 %v312_v39, 0.0 }
  0xad   :  { %823 = vst.msk [vmem:[%s1348_s4 + $0xa0] sm:$0xff] %vm166_vm1, %v481_v40 }
  0xae   :  { %888 = vst.msk [vmem:[%s1348_s4 + $0xe8] sm:$0xff] %vm166_vm1, %v642_v41  ;;  %v434_v48 = vpop.f32.mrf.mxu2  ;;  %v117_v52 = vpop.f32.mrf.mxu0 }
  0xaf   :  { %v595_v49 = vpop.f32.mrf.mxu3  ;;  %170 = vst.msk [vmem:[%s1348_s4 + $0x18] sm:$0xff] %vm166_vm1, %v160_v42  ;;  %v459_v50 = vmul.f32 %v1115_v54, %v434_v48  ;;  %v276_v53 = vpop.f32.mrf.mxu1  ;;  %v139_v56 = vmul.f32 %v1091_v44, %v117_v52 }
  0xb0   :  { %v620_v51 = vmul.f32 %v1120_v55, %v595_v49  ;;  %759 = vst.msk [vmem:[%s1348_s4 + $0x60] sm:$0xff] %vm166_vm1, %v321_v43  ;;  %v299_v57 = vmul.f32 %v1096_v45, %v276_v53 }
  0xb1   :  { %v473_v60 = vadd.f32 %v1125_v58, %v459_v50  ;;  %v152_v62 = vadd.f32 %v1101_v46, %v139_v56 }
  0xb2   :  { %v634_v61 = vadd.f32 %v1130_v59, %v620_v51  ;;  %v313_v63 = vadd.f32 %v1106_v47, %v299_v57 }
  0xb3   :  { %v482_v0 = vmax.f32 %v473_v60, 0.0  ;;  %v161_v2 = vmax.f32 %v152_v62, 0.0 }
  0xb4   :  { %v643_v1 = vmax.f32 %v634_v61, 0.0  ;;  %v322_v3 = vmax.f32 %v313_v63, 0.0 }
  0xb5   :  { %824 = vst.msk [vmem:[%s1348_s4 + $0xa8] sm:$0xff] %vm166_vm1, %v482_v0 }
  0xb6   :  { %889 = vst.msk [vmem:[%s1348_s4 + $0xf0] sm:$0xff] %vm166_vm1, %v643_v1  ;;  %v437_v4 = vpop.f32.mrf.mxu2  ;;  %v119_v8 = vpop.f32.mrf.mxu0 }
  0xb7   :  { %v598_v5 = vpop.f32.mrf.mxu3  ;;  %171 = vst.msk [vmem:[%s1348_s4 + $0x20] sm:$0xff] %vm166_vm1, %v161_v2  ;;  %v460_v6 = vmul.f32 %v1115_v54, %v437_v4  ;;  %v278_v9 = vpop.f32.mrf.mxu1  ;;  %v140_v10 = vmul.f32 %v1091_v44, %v119_v8 }
  0xb8   :  { %v621_v7 = vmul.f32 %v1120_v55, %v598_v5  ;;  %760 = vst.msk [vmem:[%s1348_s4 + $0x68] sm:$0xff] %vm166_vm1, %v322_v3  ;;  %v300_v11 = vmul.f32 %v1096_v45, %v278_v9 }
  0xb9   :  { %v474_v12 = vadd.f32 %v1125_v58, %v460_v6  ;;  %v153_v14 = vadd.f32 %v1101_v46, %v140_v10 }
  0xba   :  { %v635_v13 = vadd.f32 %v1130_v59, %v621_v7  ;;  %v314_v15 = vadd.f32 %v1106_v47, %v300_v11 }
  0xbb   :  { %v483_v16 = vmax.f32 %v474_v12, 0.0  ;;  %v162_v18 = vmax.f32 %v153_v14, 0.0 }
  0xbc   :  { %v644_v17 = vmax.f32 %v635_v13, 0.0  ;;  %v323_v19 = vmax.f32 %v314_v15, 0.0 }
  0xbd   :  { %825 = vst.msk [vmem:[%s1348_s4 + $0xb0] sm:$0xff] %vm166_vm1, %v483_v16 }
  0xbe   :  { %890 = vst.msk [vmem:[%s1348_s4 + $0xf8] sm:$0xff] %vm166_vm1, %v644_v17  ;;  %v439_v20 = vpop.f32.mrf.mxu2  ;;  %v122_v24 = vpop.f32.mrf.mxu0 }
  0xbf   :  { %v600_v21 = vpop.f32.mrf.mxu3  ;;  %172 = vst.msk [vmem:[%s1348_s4 + $0x28] sm:$0xff] %vm166_vm1, %v162_v18  ;;  %v461_v22 = vmul.f32 %v1115_v54, %v439_v20  ;;  %v281_v25 = vpop.f32.mrf.mxu1  ;;  %v141_v26 = vmul.f32 %v1091_v44, %v122_v24 }
  0xc0   :  { %v622_v23 = vmul.f32 %v1120_v55, %v600_v21  ;;  %761 = vst.msk [vmem:[%s1348_s4 + $0x70] sm:$0xff] %vm166_vm1, %v323_v19  ;;  %v301_v27 = vmul.f32 %v1096_v45, %v281_v25 }
  0xc1   :  { %v475_v28 = vadd.f32 %v1125_v58, %v461_v22  ;;  %v154_v30 = vadd.f32 %v1101_v46, %v141_v26 }
  0xc2   :  { %v636_v29 = vadd.f32 %v1130_v59, %v622_v23  ;;  %v315_v31 = vadd.f32 %v1106_v47, %v301_v27 }
  0xc3   :  { %v484_v32 = vmax.f32 %v475_v28, 0.0  ;;  %v163_v34 = vmax.f32 %v154_v30, 0.0 }
  0xc4   :  { %v645_v33 = vmax.f32 %v636_v29, 0.0  ;;  %v324_v35 = vmax.f32 %v315_v31, 0.0 }
  0xc5   :  { %826 = vst.msk [vmem:[%s1348_s4 + $0xb8] sm:$0xff] %vm166_vm1, %v484_v32 }
  0xc6   :  { %891 = vst.msk [vmem:[%s1348_s4 + $0x100] sm:$0xff] %vm166_vm1, %v645_v33  ;;  %v442_v36 = vpop.f32.mrf.mxu2  ;;  %v124_v40 = vpop.f32.mrf.mxu0 }
  0xc7   :  { %v603_v37 = vpop.f32.mrf.mxu3  ;;  %173 = vst.msk [vmem:[%s1348_s4 + $0x30] sm:$0xff] %vm166_vm1, %v163_v34  ;;  %v462_v38 = vmul.f32 %v1115_v54, %v442_v36  ;;  %v283_v41 = vpop.f32.mrf.mxu1  ;;  %v142_v42 = vmul.f32 %v1091_v44, %v124_v40 }
  0xc8   :  { %v623_v39 = vmul.f32 %v1120_v55, %v603_v37  ;;  %762 = vst.msk [vmem:[%s1348_s4 + $0x78] sm:$0xff] %vm166_vm1, %v324_v35  ;;  %v302_v43 = vmul.f32 %v1096_v45, %v283_v41 }
  0xc9   :  { %v476_v48 = vadd.f32 %v1125_v58, %v462_v38  ;;  %v155_v50 = vadd.f32 %v1101_v46, %v142_v42 }
  0xca   :  { %v637_v49 = vadd.f32 %v1130_v59, %v623_v39  ;;  %v316_v51 = vadd.f32 %v1106_v47, %v302_v43 }
  0xcb   :  { %v485_v52 = vmax.f32 %v476_v48, 0.0  ;;  %v164_v56 = vmax.f32 %v155_v50, 0.0 }
  0xcc   :  { %v646_v53 = vmax.f32 %v637_v49, 0.0  ;;  %v325_v57 = vmax.f32 %v316_v51, 0.0 }
  0xcd   :  { %827 = vst.msk [vmem:[%s1348_s4 + $0xc0] sm:$0xff] %vm166_vm1, %v485_v52 }
  0xce   :  { %892 = vst.msk [vmem:[%s1348_s4 + $0x108] sm:$0xff] %vm166_vm1, %v646_v53  ;;  %v444_v60 = vpop.f32.mrf.mxu2  ;;  %v127_v0 = vpop.f32.mrf.mxu0 }
  0xcf   :  { %v605_v61 = vpop.f32.mrf.mxu3  ;;  %174 = vst.msk [vmem:[%s1348_s4 + $0x38] sm:$0xff] %vm166_vm1, %v164_v56  ;;  %v463_v62 = vmul.f32 %v1115_v54, %v444_v60  ;;  %v286_v1 = vpop.f32.mrf.mxu1  ;;  %v143_v2 = vmul.f32 %v1091_v44, %v127_v0 }
  0xd0   :  { %v624_v63 = vmul.f32 %v1120_v55, %v605_v61  ;;  %763 = vst.msk [vmem:[%s1348_s4 + $0x80] sm:$0xff] %vm166_vm1, %v325_v57  ;;  %v303_v3 = vmul.f32 %v1096_v45, %v286_v1 }
  0xd1   :  { %v477_v4 = vadd.f32 %v1125_v58, %v463_v62  ;;  %v156_v6 = vadd.f32 %v1101_v46, %v143_v2 }
  0xd2   :  { %v638_v5 = vadd.f32 %v1130_v59, %v624_v63  ;;  %v317_v7 = vadd.f32 %v1106_v47, %v303_v3 }
  0xd3   :  { %v486_v8 = vmax.f32 %v477_v4, 0.0  ;;  %v165_v10 = vmax.f32 %v156_v6, 0.0 }
  0xd4   :  { %v647_v9 = vmax.f32 %v638_v5, 0.0  ;;  %v326_v11 = vmax.f32 %v317_v7, 0.0 }
  0xd5   :  { %828 = vst.msk [vmem:[%s1348_s4 + $0xc8] sm:$0xff] %vm166_vm1, %v486_v8 }
  0xd6   :  { %893 = vst.msk [vmem:[%s1348_s4 + $0x110] sm:$0xff] %vm166_vm1, %v647_v9  ;;  %v447_v44 = vpop.f32.mrf.mxu2  ;;  %v129_v12 = vpop.f32.mrf.mxu0 }
  0xd7   :  { %v608_v45 = vpop.f32.mrf.mxu3  ;;  %175 = vst.msk [vmem:[%s1348_s4 + $0x40] sm:$0xff] %vm166_vm1, %v165_v10  ;;  %v464_v46 = vmul.f32 %v1115_v54, %v447_v44  ;;  %v288_v13 = vpop.f32.mrf.mxu1 }
  0xd8   :  { %v625_v47 = vmul.f32 %v1120_v55, %v608_v45  ;;  %764 = vst.msk [vmem:[%s1348_s4 + $0x88] sm:$0xff] %vm166_vm1, %v326_v11 }
  0xd9   :  { %v478_v14 = vadd.f32 %v1125_v58, %v464_v46 }
  0xda   :  { %v639_v15 = vadd.f32 %v1130_v59, %v625_v47 }
  0xdb   :  { %v487_v16 = vmax.f32 %v478_v14, 0.0 }
  0xdc   :  { %v648_v17 = vmax.f32 %v639_v15, 0.0 }
  0xdd   :  { %829 = vst.msk [vmem:[%s1348_s4 + $0xd0] sm:$0xff] %vm166_vm1, %v487_v16 }
  0xde   :  { %894 = vst.msk [vmem:[%s1348_s4 + $0x118] sm:$0xff] %vm166_vm1, %v648_v17  ;;  %v449_v54 = vpop.f32.mrf.mxu2 }
  0xdf   :  { %v610_v55 = vpop.f32.mrf.mxu3 }

// kernel: psp_head_dep_forward.3
= control target key start
LH: loop header
LB: loop body
LE: loop exit
PB: predicated region body
PF: predicated region fallthrough
CT: control target
= control target key end

     0   :  { %s8104_s21 = smov 0   ;;  %s10090_s0 = inlined_call_operand.vmem [shape: bf16[2,3,288,256], index: 0, kind: input, shape index: {}]   ;;  %s10091_s1 = inlined_call_operand.vmem [shape: bf16[3,3,256,128], index: 1, kind: input, shape index: {}]   ;;  %s10092_s2 = inlined_call_operand.vmem [shape: f32[1,128], index: 2, kind: input, shape index: {}]   ;;  %s10093_s3 = inlined_call_operand.vmem [shape: f32[1,128], index: 3, kind: input, shape index: {}]   ;;  %s10094_s4 = inlined_call_operand.vmem [shape: bf16[128,8], index: 4, kind: input, shape index: {}]   ;;  %s10095_s5 = inlined_call_operand.vmem [shape: f32[1,8], index: 5, kind: input, shape index: {}]   ;;  %s10096_s6 = inlined_call_operand.vmem [shape: f32[2,8,256], index: 6, kind: output, shape index: {}]  }
   0x1 LB: > { %s5366_s22 = sadd.s32 4294967295, %s8067_s21   ;;  %p5370_p0 = scmp.ge.s32.totalorder %s8067_s21, 1  ;;  %s8067_s21 = sphi %s8104_s21, %s16_s21  }
   0x2   : > { %p212_p1 = scmp.lt.s32.totalorder %s8067_s21, 3 }
   0x4   : > { %p213_p2 = pnand %p5370_p0, %p212_p1 }
   0x6   : > { %216 = sbr.rel (%p213_p2) target bundleno = 1585 (0x631), region = 44 }
   0xb   : > { %v7672_v0 = vld [vmem:[%s10091_s1 + $0xb8] sm:$0xff]  ;;  %v7671_v3 = vld [vmem:[%s10091_s1 + $0xb0] sm:$0xff]  ;;  %v7670_v6 = vld [vmem:[%s10091_s1 + $0xa8] sm:$0xff]  ;;  %p242_p3 = scmp.lt.s32.totalorder %s5366_s22, 1 }
   0xc   : > { %v8118_v1 = vld [vmem:[%s10091_s1 + $0xf8] sm:$0xff]  ;;  %638 = vmatpush.bf16.msra.mxu0 %v7672_v0  ;;  %8025 = vmatpush.bf16.msra.mxu3 %v7672_v0  ;;  %v8133_v4 = vld [vmem:[%s10091_s1 + $0xf0] sm:$0xff]  ;;  %v8148_v7 = vld [vmem:[%s10091_s1 + $0xe8] sm:$0xff] }
   0xd   : > { %v8123_v2 = vld [vmem:[%s10091_s1 + $0x38] sm:$0xff]  ;;  %727 = vmatpush.bf16.msra.mxu1 %v8118_v1  ;;  %v8138_v5 = vld [vmem:[%s10091_s1 + $0x30] sm:$0xff]  ;;  %v8153_v8 = vld [vmem:[%s10091_s1 + $0x28] sm:$0xff]  ;;  %s10136_s22 = smov (!%p242_p3, %s5366_s22), 1 }
   0xe   : > { %1072 = vmatpush.bf16.msra.mxu2 %v8123_v2  ;;  %v7669_v9 = vld [vmem:[%s10091_s1 + $0xa0] sm:$0xff]  ;;  %v7668_v12 = vld [vmem:[%s10091_s1 + $0x98] sm:$0xff]  ;;  %v7667_v15 = vld [vmem:[%s10091_s1 + $0x90] sm:$0xff]  ;;  %s8049_s9 = smul.u32 864, %s10136_s22  ;;  %s7584_s16 = sshll.u32 %s10136_s22, 4 }
   0xf   : > { %v8165_v10 = vld [vmem:[%s10091_s1 + $0xe0] sm:$0xff]  ;;  %v8184_v13 = vld [vmem:[%s10091_s1 + $0xd8] sm:$0xff]  ;;  %v8200_v16 = vld [vmem:[%s10091_s1 + $0xd0] sm:$0xff]  ;;  %s251_s20 = scalar_lea.vmem %s10096_s6, %s7584_s16 }
  0x10   : > { %639 = vmatpush.bf16.msra.mxu0 %v7671_v3  ;;  %8026 = vmatpush.bf16.msra.mxu3 %v7671_v3  ;;  %v8170_v11 = vld [vmem:[%s10091_s1 + $0x20] sm:$0xff]  ;;  %v8189_v14 = vld [vmem:[%s10091_s1 + $0x18] sm:$0xff]  ;;  %v8205_v17 = vld [vmem:[%s10091_s1 + $0x10] sm:$0xff]  ;;  %s8213_s18 = scalar_lea.vmem %s10090_s0, %s8049_s9 }
  0x11   : > { %728 = vmatpush.bf16.msra.mxu1 %v8133_v4  ;;  %v7666_v18 = vld [vmem:[%s10091_s1 + $0x88] sm:$0xff]  ;;  %v7665_v21 = vld [vmem:[%s10091_s1 + $0x80] sm:$0xff]  ;;  %v7720_v32 = vld [vmem:[%s10091_s1 + $0x138] sm:$0xff] }
  0x12   : > { %1073 = vmatpush.bf16.msra.mxu2 %v8138_v5  ;;  %v7674_v19 = vld [vmem:[%s10091_s1 + $0xc8] sm:$0xff]  ;;  %v8231_v22 = vld [vmem:[%s10091_s1 + $0xc0] sm:$0xff]  ;;  %v7728_v37 = vld [vmem:[%s10091_s1 + $0x178] sm:$0xff] }
  0x13   : > { %v8223_v20 = vld [vmem:[%s10091_s1 + $0x8] sm:$0xff]  ;;  %v8236_v23 = vld [vmem:[%s10091_s1] sm:$0xff]  ;;  %v7719_v38 = vld [vmem:[%s10091_s1 + $0x130] sm:$0xff] }
  0x14   : > { %640 = vmatpush.bf16.msra.mxu0 %v7670_v6  ;;  %8027 = vmatpush.bf16.msra.mxu3 %v7670_v6  ;;  %v5440_v24 = vld [vmem:[%s8213_s18 + $0x120] sm:$0xf]  ;;  %v7634_v25 = vld [vmem:[%s8213_s18 + $0x124] sm:$0xf0]  ;;  %v7633_v28 = vld [vmem:[%s8213_s18 + $0x124] sm:$0xf] }
  0x15   : > { %729 = vmatpush.bf16.msra.mxu1 %v8148_v7  ;;  %v5536_v26 = vld [vmem:[%s8213_s18 + $0x1e0] sm:$0xf]  ;;  %v7658_v27 = vld [vmem:[%s8213_s18 + $0x1e4] sm:$0xf0]  ;;  %v5442_v29 = vld [vmem:[%s8213_s18 + $0x128] sm:$0xf0]  ;;  %v5441_v33 = vor.u32 %v7634_v25, %v5440_v24 }
  0x16   : > { %1074 = vmatpush.bf16.msra.mxu2 %v8153_v8  ;;  %v5632_v30 = vld [vmem:[%s8213_s18] sm:$0xf]  ;;  %v7586_v31 = vld [vmem:[%s8213_s18 + $0x4] sm:$0xf0]  ;;  %v5537_v34 = vor.u32 %v7658_v27, %v5536_v26  ;;  %v5445_v35 = vor.u32 %v7633_v28, %v5442_v29  ;;  %v7727_v39 = vld [vmem:[%s10091_s1 + $0x170] sm:$0xff] }
  0x17   : > { %v5633_v36 = vor.u32 %v7586_v31, %v5632_v30  ;;  %v5448_v40 = vld [vmem:[%s8213_s18 + $0x130] sm:$0xf]  ;;  %v7636_v41 = vld [vmem:[%s8213_s18 + $0x134] sm:$0xf0]  ;;  %v7635_v44 = vld [vmem:[%s8213_s18 + $0x134] sm:$0xf] }
  0x18   : > { %641 = vmatpush.bf16.msra.mxu0 %v7669_v9  ;;  %8028 = vmatpush.bf16.msra.mxu3 %v7669_v9  ;;  %v5544_v42 = vld [vmem:[%s8213_s18 + $0x1f0] sm:$0xf]  ;;  %v7660_v43 = vld [vmem:[%s8213_s18 + $0x1f4] sm:$0xf0]  ;;  %v5450_v45 = vld [vmem:[%s8213_s18 + $0x138] sm:$0xf0]  ;;  %v5449_v48 = vor.u32 %v7636_v41, %v5448_v40 }
  0x19   : > { %730 = vmatpush.bf16.msra.mxu1 %v8165_v10  ;;  %v5640_v46 = vld [vmem:[%s8213_s18 + $0x10] sm:$0xf]  ;;  %v7588_v47 = vld [vmem:[%s8213_s18 + $0x14] sm:$0xf0]  ;;  %v5545_v49 = vor.u32 %v7660_v43, %v5544_v42  ;;  %v5453_v50 = vor.u32 %v7635_v44, %v5450_v45  ;;  %v7718_v52 = vld [vmem:[%s10091_s1 + $0x128] sm:$0xff] }
  0x1a   : > { %1075 = vmatpush.bf16.msra.mxu2 %v8170_v11  ;;  %v5641_v51 = vor.u32 %v7588_v47, %v5640_v46  ;;  %v7726_v53 = vld [vmem:[%s10091_s1 + $0x168] sm:$0xff]  ;;  %v5456_v54 = vld [vmem:[%s8213_s18 + $0x140] sm:$0xf]  ;;  %v7637_v58 = vld [vmem:[%s8213_s18 + $0x144] sm:$0xf] }
  0x1b   : > { %v7638_v55 = vld [vmem:[%s8213_s18 + $0x144] sm:$0xf0]  ;;  %v5552_v56 = vld [vmem:[%s8213_s18 + $0x200] sm:$0xf]  ;;  %v5458_v59 = vld [vmem:[%s8213_s18 + $0x148] sm:$0xf0] }
  0x1c   : > { %642 = vmatpush.bf16.msra.mxu0 %v7668_v12  ;;  %8029 = vmatpush.bf16.msra.mxu3 %v7668_v12  ;;  %v7662_v57 = vld [vmem:[%s8213_s18 + $0x204] sm:$0xf0]  ;;  %v5648_v60 = vld [vmem:[%s8213_s18 + $0x20] sm:$0xf]  ;;  %v5457_v62 = vor.u32 %v7638_v55, %v5456_v54  ;;  %v5461_v0 = vor.u32 %v7637_v58, %v5458_v59  ;;  %v5464_v3 = vld [vmem:[%s8213_s18 + $0x150] sm:$0xf] }
  0x1d   : > { %731 = vmatpush.bf16.msra.mxu1 %v8184_v13  ;;  %v7590_v61 = vld [vmem:[%s8213_s18 + $0x24] sm:$0xf0]  ;;  %v5553_v63 = vor.u32 %v7662_v57, %v5552_v56  ;;  %v5560_v6 = vld [vmem:[%s8213_s18 + $0x210] sm:$0xf]  ;;  %v7639_v9 = vld [vmem:[%s8213_s18 + $0x154] sm:$0xf] }
  0x1e   : > { %1076 = vmatpush.bf16.msra.mxu2 %v8189_v14  ;;  %v5656_v12 = vld [vmem:[%s8213_s18 + $0x30] sm:$0xf]  ;;  %v5474_v24 = vld [vmem:[%s8213_s18 + $0x168] sm:$0xf0]  ;;  %v5664_v25 = vld [vmem:[%s8213_s18 + $0x40] sm:$0xf] }
  0x1f   : > { %v7594_v26 = vld [vmem:[%s8213_s18 + $0x44] sm:$0xf0]  ;;  %v7716_v29 = vld [vmem:[%s10091_s1 + $0x118] sm:$0xff]  ;;  %v5480_v30 = vld [vmem:[%s8213_s18 + $0x170] sm:$0xf] }
  0x20   : > { %643 = vmatpush.bf16.msra.mxu0 %v7667_v15  ;;  %8030 = vmatpush.bf16.msra.mxu3 %v7667_v15  ;;  %v7644_v31 = vld [vmem:[%s8213_s18 + $0x174] sm:$0xf0]  ;;  %v5488_v42 = vld [vmem:[%s8213_s18 + $0x180] sm:$0xf]  ;;  %v7646_v43 = vld [vmem:[%s8213_s18 + $0x184] sm:$0xf0] }
  0x21   : > { %732 = vmatpush.bf16.msra.mxu1 %v8200_v16  ;;  %v7645_v44 = vld [vmem:[%s8213_s18 + $0x184] sm:$0xf]  ;;  %v5554_v46 = vld [vmem:[%s8213_s18 + $0x208] sm:$0xf0]  ;;  %v7632_v54 = vld [vmem:[%s10091_s1 + $0x78] sm:$0xff] }
  0x22   : > { %1077 = vmatpush.bf16.msra.mxu2 %v8205_v17  ;;  %v7661_v45 = vld [vmem:[%s8213_s18 + $0x204] sm:$0xf]  ;;  %v5490_v47 = vld [vmem:[%s8213_s18 + $0x188] sm:$0xf0]  ;;  %v7715_v55 = vld [vmem:[%s10091_s1 + $0x110] sm:$0xff] }
  0x23   : > { %v7723_v56 = vld [vmem:[%s10091_s1 + $0x150] sm:$0xff]  ;;  %v7648_v59 = vld [vmem:[%s8213_s18 + $0x194] sm:$0xf0] }
  0x24   : > { %644 = vmatpush.bf16.msra.mxu0 %v7666_v18  ;;  %8031 = vmatpush.bf16.msra.mxu3 %v7666_v18  ;;  %v7642_v18 = vld [vmem:[%s8213_s18 + $0x164] sm:$0xf0]  ;;  %v7631_v57 = vld [vmem:[%s10091_s1 + $0x70] sm:$0xff] }
  0x25   : > { %733 = vmatpush.bf16.msra.mxu1 %v7674_v19  ;;  %v5496_v58 = vld [vmem:[%s8213_s18 + $0x190] sm:$0xf] }
  0x26   : > { %1078 = vmatpush.bf16.msra.mxu2 %v8223_v20 }
  0x28   : > { %645 = vmatpush.bf16.msra.mxu0 %v7665_v21  ;;  %8032 = vmatpush.bf16.msra.mxu3 %v7665_v21  ;;  %v7657_v21 = vld [vmem:[%s8213_s18 + $0x1e4] sm:$0xf] }
  0x29   : > { %734 = vmatpush.bf16.msra.mxu1 %v8231_v22 }
  0x2a   : > { %1079 = vmatpush.bf16.msra.mxu2 %v8236_v23 }
  0x2b   : > { %646 = vmatmul.bf16.vlgmr.msra.gmra.mxu0 %v5441_v33  ;;  %706 = vmatmul.bf16.vlgmr.msra.gmra.mxu3 %v5537_v34  ;;  %v7659_v33 = vld [vmem:[%s8213_s18 + $0x1f4] sm:$0xf]  ;;  %v5546_v34 = vld [vmem:[%s8213_s18 + $0x1f8] sm:$0xf0] }
  0x2c   : > { %8033 = vmatpush.bf16.msrb.mxu3 %v8118_v1  ;;  %1572 = vmatpush.bf16.msrb.mxu0 %v7720_v32  ;;  %v5649_v1 = vor.u32 %v7590_v61, %v5648_v60  ;;  %v7643_v32 = vld [vmem:[%s8213_s18 + $0x174] sm:$0xf] }
  0x2d   : > { %735 = vmatmul.bf16.vlgmr.msra.gmra.mxu1 %v5445_v35  ;;  %1080 = vmatmul.bf16.vlgmr.msra.gmra.mxu2 %v5633_v36  ;;  %v5482_v35 = vld [vmem:[%s8213_s18 + $0x178] sm:$0xf0]  ;;  %v5672_v36 = vld [vmem:[%s8213_s18 + $0x50] sm:$0xf]  ;;  %v7647_v60 = vld [vmem:[%s8213_s18 + $0x194] sm:$0xf] }
  0x2e   : > { %1661 = vmatpush.bf16.msrb.mxu1 %v7728_v37  ;;  %v7596_v37 = vld [vmem:[%s8213_s18 + $0x54] sm:$0xf0]  ;;  %v5485_v40 = vor.u32 %v7643_v32, %v5482_v35  ;;  %v7663_v61 = vld [vmem:[%s8213_s18 + $0x214] sm:$0xf] }
  0x2f   : > { %v5673_v41 = vor.u32 %v7596_v37, %v5672_v36  ;;  %v7652_v35 = vld [vmem:[%s8213_s18 + $0x1b4] sm:$0xf0]  ;;  %v7651_v36 = vld [vmem:[%s8213_s18 + $0x1b4] sm:$0xf]  ;;  %v5736_v37 = vld [vmem:[%s8213_s18 + $0xd0] sm:$0xf] }
  0x30   : > { %8034 = vmatpush.bf16.msrb.mxu3 %v8133_v4  ;;  %1573 = vmatpush.bf16.msrb.mxu0 %v7719_v38  ;;  %v7640_v4 = vld [vmem:[%s8213_s18 + $0x154] sm:$0xf0]  ;;  %v5481_v38 = vor.u32 %v7644_v31, %v5480_v30 }
  0x32   : > { %1662 = vmatpush.bf16.msrb.mxu1 %v7727_v39  ;;  %v5549_v39 = vor.u32 %v7659_v33, %v5546_v34  ;;  %v7627_v33 = vld [vmem:[%s10091_s1 + $0x50] sm:$0xff] }
  0x33   : > { %v5512_v34 = vld [vmem:[%s8213_s18 + $0x1b0] sm:$0xf] }
  0x34   : > { %8035 = vmatpush.bf16.msrb.mxu3 %v8148_v7  ;;  %1574 = vmatpush.bf16.msrb.mxu0 %v7718_v52  ;;  %v7664_v7 = vld [vmem:[%s8213_s18 + $0x214] sm:$0xf0]  ;;  %v5493_v52 = vor.u32 %v7645_v44, %v5490_v47  ;;  %v5513_v44 = vor.u32 %v7652_v35, %v5512_v34  ;;  %v5720_v34 = vld [vmem:[%s8213_s18 + $0xb0] sm:$0xf] }
  0x35   : > { %v5561_v15 = vor.u32 %v7664_v7, %v5560_v6  ;;  %v7608_v35 = vld [vmem:[%s8213_s18 + $0xb4] sm:$0xf0] }
  0x36   : > { %1663 = vmatpush.bf16.msrb.mxu1 %v7726_v53 }
  0x38   : > { %8036 = vmatpush.bf16.msrb.mxu3 %v8165_v10  ;;  %v5466_v10 = vld [vmem:[%s8213_s18 + $0x158] sm:$0xf0] }
  0x3b   : > { %651 = vmatmul.bf16.gmra.mxu0 %v5449_v48  ;;  %711 = vmatmul.bf16.gmra.mxu3 %v5545_v49  ;;  %v5680_v48 = vld [vmem:[%s8213_s18 + $0x60] sm:$0xf]  ;;  %v7598_v49 = vld [vmem:[%s8213_s18 + $0x64] sm:$0xf0] }
  0x3c   : > { %8037 = vmatpush.bf16.msrb.mxu3 %v8184_v13  ;;  %v7592_v13 = vld [vmem:[%s8213_s18 + $0x34] sm:$0xf0]  ;;  %v5681_v53 = vor.u32 %v7598_v49, %v5680_v48 }
  0x3d   : > { %740 = vmatmul.bf16.gmra.mxu1 %v5453_v50  ;;  %1085 = vmatmul.bf16.gmra.mxu2 %v5641_v51  ;;  %v5489_v50 = vor.u32 %v7646_v43, %v5488_v42  ;;  %v5557_v51 = vor.u32 %v7661_v45, %v5554_v46 }
  0x40   : > { %8038 = vmatpush.bf16.msrb.mxu3 %v8200_v16  ;;  %v5469_v16 = vor.u32 %v7639_v9, %v5466_v10  ;;  %v7630_v9 = vld [vmem:[%s10091_s1 + $0x68] sm:$0xff]  ;;  %v7629_v10 = vld [vmem:[%s10091_s1 + $0x60] sm:$0xff] }
  0x44   : > { %8039 = vmatpush.bf16.msrb.mxu3 %v7674_v19  ;;  %v7641_v19 = vld [vmem:[%s8213_s18 + $0x164] sm:$0xf] }
  0x45   : > { %v5477_v28 = vor.u32 %v7641_v19, %v5474_v24  ;;  %v7602_v19 = vld [vmem:[%s8213_s18 + $0x84] sm:$0xf0] }
  0x48   : > { %8040 = vmatpush.bf16.msrb.mxu3 %v8231_v22  ;;  %v5538_v22 = vld [vmem:[%s8213_s18 + $0x1e8] sm:$0xf0] }
  0x4b   : > { %656 = vmatmul.bf16.gmra.mxu0 %v5457_v62  ;;  %716 = vmatmul.bf16.gmra.mxu3 %v5553_v63  ;;  %v5562_v62 = vld [vmem:[%s8213_s18 + $0x218] sm:$0xf0] }
  0x4c   : > { %8041 = vmatpush.bf16.msra.mxu3 %v8123_v2  ;;  %v5465_v2 = vor.u32 %v7640_v4, %v5464_v3  ;;  %v5498_v63 = vld [vmem:[%s8213_s18 + $0x198] sm:$0xf0]  ;;  %v5497_v3 = vor.u32 %v7648_v59, %v5496_v58  ;;  %v5565_v4 = vor.u32 %v7663_v61, %v5562_v62  ;;  %v7625_v61 = vld [vmem:[%s10091_s1 + $0x40] sm:$0xff] }
  0x4d   : > { %745 = vmatmul.bf16.gmra.mxu1 %v5461_v0  ;;  %1090 = vmatmul.bf16.gmra.mxu2 %v5649_v1  ;;  %v5688_v0 = vld [vmem:[%s8213_s18 + $0x70] sm:$0xf]  ;;  %v7600_v1 = vld [vmem:[%s8213_s18 + $0x74] sm:$0xf0]  ;;  %v5501_v6 = vor.u32 %v7647_v60, %v5498_v63  ;;  %v5520_v62 = vld [vmem:[%s8213_s18 + $0x1c0] sm:$0xf] }
  0x4e   : > { %v5689_v7 = vor.u32 %v7600_v1, %v5688_v0  ;;  %v7654_v63 = vld [vmem:[%s8213_s18 + $0x1c4] sm:$0xf0]  ;;  %v7653_v0 = vld [vmem:[%s8213_s18 + $0x1c4] sm:$0xf]  ;;  %v5744_v1 = vld [vmem:[%s8213_s18 + $0xe0] sm:$0xf] }
  0x50   : > { %8042 = vmatpush.bf16.msra.mxu3 %v8138_v5  ;;  %v5657_v5 = vor.u32 %v7592_v13, %v5656_v12  ;;  %v7714_v12 = vld [vmem:[%s10091_s1 + $0x108] sm:$0xff] }
  0x51   : > { %v7722_v13 = vld [vmem:[%s10091_s1 + $0x148] sm:$0xff] }
  0x54   : > { %8043 = vmatpush.bf16.msra.mxu3 %v8153_v8  ;;  %v7717_v8 = vld [vmem:[%s10091_s1 + $0x120] sm:$0xff] }
  0x55   : > { %1575 = vmatpush.bf16.msrb.mxu0 %v7717_v8  ;;  %v5728_v8 = vld [vmem:[%s8213_s18 + $0xc0] sm:$0xf] }
  0x58   : > { %8044 = vmatpush.bf16.msra.mxu3 %v8170_v11  ;;  %v7725_v11 = vld [vmem:[%s10091_s1 + $0x160] sm:$0xff] }
  0x59   : > { %1664 = vmatpush.bf16.msrb.mxu1 %v7725_v11  ;;  %1576 = vmatpush.bf16.msrb.mxu0 %v7716_v29  ;;  %v7610_v11 = vld [vmem:[%s8213_s18 + $0xc4] sm:$0xf0] }
  0x5b   : > { %661 = vmatmul.bf16.gmra.mxu0 %v5465_v2  ;;  %721 = vmatmul.bf16.gmra.mxu3 %v5561_v15  ;;  %v5504_v2 = vld [vmem:[%s8213_s18 + $0x1a0] sm:$0xf]  ;;  %v7650_v15 = vld [vmem:[%s8213_s18 + $0x1a4] sm:$0xf0] }
  0x5c   : > { %8045 = vmatpush.bf16.msra.mxu3 %v8189_v14  ;;  %v5472_v14 = vld [vmem:[%s8213_s18 + $0x160] sm:$0xf] }
  0x5d   : > { %750 = vmatmul.bf16.gmra.mxu1 %v5469_v16  ;;  %1095 = vmatmul.bf16.gmra.mxu2 %v5657_v5  ;;  %v5473_v27 = vor.u32 %v7642_v18, %v5472_v14  ;;  %v7768_v16 = vld [vmem:[%s10091_s1 + $0x1b8] sm:$0xff]  ;;  %v7649_v5 = vld [vmem:[%s8213_s18 + $0x1a4] sm:$0xf]  ;;  %v5506_v14 = vld [vmem:[%s8213_s18 + $0x1a8] sm:$0xf0] }
  0x5e   : > { %1577 = vmatpush.bf16.msrb.mxu0 %v7715_v55  ;;  %v5696_v18 = vld [vmem:[%s8213_s18 + $0x80] sm:$0xf]  ;;  %2103 = vmatpush.bf16.msrb.mxu2 %v7768_v16 }
  0x60   : > { %8046 = vmatpush.bf16.msra.mxu3 %v8205_v17  ;;  %v5541_v17 = vor.u32 %v7657_v21, %v5538_v22  ;;  %v5505_v21 = vor.u32 %v7650_v15, %v5504_v2  ;;  %v5729_v22 = vor.u32 %v7610_v11, %v5728_v8  ;;  %v7776_v11 = vld [vmem:[%s10091_s1 + $0x1f8] sm:$0xff] }
  0x62   : > { %1578 = vmatpush.bf16.msrb.mxu0 %v7714_v12  ;;  %v5521_v12 = vor.u32 %v7654_v63, %v5520_v62 }
  0x64   : > { %8047 = vmatpush.bf16.msra.mxu3 %v8223_v20  ;;  %v5665_v20 = vor.u32 %v7594_v26, %v5664_v25  ;;  %v5509_v25 = vor.u32 %v7649_v5, %v5506_v14  ;;  %v5697_v26 = vor.u32 %v7602_v19, %v5696_v18 }
  0x68   : > { %8048 = vmatpush.bf16.msra.mxu3 %v8236_v23  ;;  %v7724_v23 = vld [vmem:[%s10091_s1 + $0x158] sm:$0xff] }
  0x69   : > { %1665 = vmatpush.bf16.msrb.mxu1 %v7724_v23 }
  0x6b   : > { %666 = vmatmul.bf16.gmra.mxu0 %v5473_v27  ;;  %795 = vmatmul.bf16.vlgmr.msrb.gmra.mxu3 %v5541_v17 }
  0x6c   : > { %1161 = vmatpush.bf16.msrb.mxu3 %v7632_v54  ;;  %v7767_v54 = vld [vmem:[%s10091_s1 + $0x1b0] sm:$0xff] }
  0x6d   : > { %755 = vmatmul.bf16.gmra.mxu1 %v5477_v28  ;;  %1100 = vmatmul.bf16.gmra.mxu2 %v5665_v20  ;;  %v7628_v28 = vld [vmem:[%s10091_s1 + $0x58] sm:$0xff] }
  0x6e   : > { %1666 = vmatpush.bf16.msrb.mxu1 %v7723_v56  ;;  %2104 = vmatpush.bf16.msrb.mxu2 %v7767_v54  ;;  %v5634_v54 = vld [vmem:[%s8213_s18 + $0x8] sm:$0xf0] }
  0x70   : > { %1162 = vmatpush.bf16.msrb.mxu3 %v7631_v57 }
  0x72   : > { %1667 = vmatpush.bf16.msrb.mxu1 %v7722_v13 }
  0x74   : > { %1163 = vmatpush.bf16.msrb.mxu3 %v7630_v9 }
  0x78   : > { %1164 = vmatpush.bf16.msrb.mxu3 %v7629_v10 }
  0x7b   : > { %671 = vmatmul.bf16.gmra.mxu0 %v5481_v38  ;;  %800 = vmatmul.bf16.gmra.mxu3 %v5549_v39  ;;  %v7612_v38 = vld [vmem:[%s8213_s18 + $0xd4] sm:$0xf0]  ;;  %v5514_v39 = vld [vmem:[%s8213_s18 + $0x1b8] sm:$0xf0] }
  0x7c   : > { %1165 = vmatpush.bf16.msrb.mxu3 %v7628_v28  ;;  %v5737_v45 = vor.u32 %v7612_v38, %v5736_v37  ;;  %v5517_v47 = vor.u32 %v7651_v36, %v5514_v39  ;;  %v7656_v28 = vld [vmem:[%s8213_s18 + $0x1d4] sm:$0xf0] }
  0x7d   : > { %760 = vmatmul.bf16.gmra.mxu1 %v5485_v40  ;;  %1105 = vmatmul.bf16.gmra.mxu2 %v5673_v41  ;;  %v5704_v40 = vld [vmem:[%s8213_s18 + $0x90] sm:$0xf]  ;;  %v7604_v41 = vld [vmem:[%s8213_s18 + $0x94] sm:$0xf0] }
  0x7e   : > { %v5705_v48 = vor.u32 %v7604_v41, %v5704_v40 }
  0x80   : > { %1166 = vmatpush.bf16.msrb.mxu3 %v7627_v33  ;;  %v5530_v33 = vld [vmem:[%s8213_s18 + $0x1d8] sm:$0xf0] }
  0x8b   : > { %676 = vmatmul.bf16.gmra.mxu0 %v5489_v50  ;;  %805 = vmatmul.bf16.gmra.mxu3 %v5557_v51  ;;  %v7626_v51 = vld [vmem:[%s10091_s1 + $0x48] sm:$0xff] }
  0x8c   : > { %1167 = vmatpush.bf16.msrb.mxu3 %v7626_v51 }
  0x8d   : > { %765 = vmatmul.bf16.gmra.mxu1 %v5493_v52  ;;  %1110 = vmatmul.bf16.gmra.mxu2 %v5681_v53  ;;  %v7713_v52 = vld [vmem:[%s10091_s1 + $0x100] sm:$0xff] }
  0x8e   : > { %v7721_v53 = vld [vmem:[%s10091_s1 + $0x140] sm:$0xff]  ;;  %1579 = vmatpush.bf16.msrb.mxu0 %v7713_v52 }
  0x8f   : > { %1668 = vmatpush.bf16.msrb.mxu1 %v7721_v53  ;;  %v7585_v53 = vld [vmem:[%s8213_s18 + $0x4] sm:$0xf] }
  0x90   : > { %1168 = vmatpush.bf16.msrb.mxu3 %v7625_v61  ;;  %v5890_v61 = vld [vmem:[%s8213_s18 + $0x248] sm:$0xf0] }
  0x9b   : > { %681 = vmatmul.bf16.gmra.mxu0 %v5497_v3  ;;  %810 = vmatmul.bf16.gmra.mxu3 %v5565_v4  ;;  %v7614_v3 = vld [vmem:[%s8213_s18 + $0xe4] sm:$0xf0]  ;;  %v5522_v4 = vld [vmem:[%s8213_s18 + $0x1c8] sm:$0xf0] }
  0x9c   : > { %v5745_v13 = vor.u32 %v7614_v3, %v5744_v1  ;;  %v5525_v15 = vor.u32 %v7653_v0, %v5522_v4  ;;  %v5637_v0 = vor.u32 %v7585_v53, %v5634_v54  ;;  %v7589_v53 = vld [vmem:[%s8213_s18 + $0x24] sm:$0xf]  ;;  %v5650_v54 = vld [vmem:[%s8213_s18 + $0x28] sm:$0xf0] }
  0x9d   : > { %770 = vmatmul.bf16.gmra.mxu1 %v5501_v6  ;;  %1115 = vmatmul.bf16.gmra.mxu2 %v5689_v7  ;;  %v5712_v6 = vld [vmem:[%s8213_s18 + $0xa0] sm:$0xf]  ;;  %v7606_v7 = vld [vmem:[%s8213_s18 + $0xa4] sm:$0xf0] }
  0x9e   : > { %v5713_v16 = vor.u32 %v7606_v7, %v5712_v6 }
  0xa8   : > { %v647_v24 = vpop.f32.mrf.mxu0 }
  0xaa   : > { %v736_v27 = vpop.f32.mrf.mxu1 }
  0xab   : > { %v737_v17 = vadd.f32 %v736_v27, %v647_v24  ;;  %686 = vmatmul.bf16.gmra.mxu0 %v5505_v21  ;;  %1140 = vmatmul.bf16.vlgmr.msra.gmra.mxu3 %v5729_v22  ;;  %v7766_v27 = vld [vmem:[%s10091_s1 + $0x1a8] sm:$0xff] }
  0xac   : > { %2192 = vmatpush.bf16.msra.mxu3 %v7776_v11  ;;  %2105 = vmatpush.bf16.msrb.mxu2 %v7766_v27  ;;  %v5896_v27 = vld [vmem:[%s8213_s18 + $0x250] sm:$0xf] }
  0xad   : > { %775 = vmatmul.bf16.gmra.mxu1 %v5509_v25  ;;  %1120 = vmatmul.bf16.gmra.mxu2 %v5697_v26  ;;  %v7816_v25 = vld [vmem:[%s10091_s1 + $0x238] sm:$0xff] }
  0xae   : > { %v8388_v20 = vpop.f32.mrf.mxu3  ;;  %v7824_v26 = vld [vmem:[%s10091_s1 + $0x278] sm:$0xff]  ;;  %2634 = vmatpush.bf16.msra.mxu0 %v7816_v25  ;;  %v7587_v25 = vld [vmem:[%s8213_s18 + $0x14] sm:$0xf] }
  0xaf   : > { %2723 = vmatpush.bf16.msra.mxu1 %v7824_v26  ;;  %v5642_v26 = vld [vmem:[%s8213_s18 + $0x18] sm:$0xf0] }
  0xb0   : > { %v1081_v29 = vpop.f32.mrf.mxu2  ;;  %v649_v30 = vpop.f32.mrf.mxu0 }
  0xb1   : > { %v8390_v23 = vadd.f32 %v1081_v29, %v737_v17  ;;  %v5528_v17 = vld [vmem:[%s8213_s18 + $0x1d0] sm:$0xf]  ;;  %v7655_v29 = vld [vmem:[%s8213_s18 + $0x1d4] sm:$0xf] }
  0xb2   : > { %v738_v31 = vpop.f32.mrf.mxu1  ;;  %v5529_v38 = vor.u32 %v7656_v28, %v5528_v17  ;;  %v5533_v41 = vor.u32 %v7655_v29, %v5530_v33  ;;  %v7683_v17 = vld [vmem:[%s8213_s18 + $0x254] sm:$0xf]  ;;  %v5898_v28 = vld [vmem:[%s8213_s18 + $0x258] sm:$0xf0]  ;;  %v5645_v33 = vor.u32 %v7587_v25, %v5642_v26  ;;  %v7814_v26 = vld [vmem:[%s10091_s1 + $0x228] sm:$0xff] }
  0xb3   : > { %v8392_v32 = vadd.f32 %v738_v31, %v649_v30  ;;  %v5752_v30 = vld [vmem:[%s8213_s18 + $0xf0] sm:$0xf]  ;;  %v7616_v31 = vld [vmem:[%s8213_s18 + $0xf4] sm:$0xf0] }
  0xb4   : > { %v5753_v39 = vor.u32 %v7616_v31, %v5752_v30 }
  0xb6   : > { %v8405_v42 = vpop.f32.mrf.mxu3 }
  0xb8   : > { %v8407_v43 = vpop.f32.mrf.mxu2  ;;  %v652_v46 = vpop.f32.mrf.mxu0 }
  0xba   : > { %v741_v49 = vpop.f32.mrf.mxu1 }
  0xbb   : > { %v742_v50 = vadd.f32 %v741_v49, %v652_v46  ;;  %691 = vmatmul.bf16.gmra.mxu0 %v5513_v44  ;;  %1145 = vmatmul.bf16.gmra.mxu3 %v5737_v45  ;;  %v5721_v44 = vor.u32 %v7608_v35, %v5720_v34 }
  0xbd   : > { %780 = vmatmul.bf16.gmra.mxu1 %v5517_v47  ;;  %1125 = vmatmul.bf16.gmra.mxu2 %v5705_v48 }
  0xbe   : > { %v8421_v55 = vpop.f32.mrf.mxu3 }
  0xc0   : > { %v1086_v56 = vpop.f32.mrf.mxu2  ;;  %v654_v58 = vpop.f32.mrf.mxu0 }
  0xc1   : > { %v8423_v57 = vadd.f32 %v1086_v56, %v742_v50  ;;  %v5888_v56 = vld [vmem:[%s8213_s18 + $0x240] sm:$0xf] }
  0xc2   : > { %v743_v59 = vpop.f32.mrf.mxu1 }
  0xc3   : > { %v8425_v60 = vadd.f32 %v743_v59, %v654_v58  ;;  %v7682_v58 = vld [vmem:[%s8213_s18 + $0x244] sm:$0xf0]  ;;  %v7681_v59 = vld [vmem:[%s8213_s18 + $0x244] sm:$0xf] }
  0xc4   : > { %v5889_v1 = vor.u32 %v7682_v58, %v5888_v56  ;;  %v5893_v4 = vor.u32 %v7681_v59, %v5890_v61  ;;  %v5904_v56 = vld [vmem:[%s8213_s18 + $0x260] sm:$0xf]  ;;  %v7686_v58 = vld [vmem:[%s8213_s18 + $0x264] sm:$0xf0]  ;;  %v7685_v59 = vld [vmem:[%s8213_s18 + $0x264] sm:$0xf] }
  0xc5   : > { %v5906_v61 = vld [vmem:[%s8213_s18 + $0x268] sm:$0xf0] }
  0xc6   : > { %v8438_v9 = vpop.f32.mrf.mxu3 }
  0xc8   : > { %v8440_v10 = vpop.f32.mrf.mxu2  ;;  %v657_v2 = vpop.f32.mrf.mxu0 }
  0xca   : > { %v746_v5 = vpop.f32.mrf.mxu1 }
  0xcb   : > { %v747_v8 = vadd.f32 %v746_v5, %v657_v2  ;;  %696 = vmatmul.bf16.gmra.mxu0 %v5521_v12  ;;  %1150 = vmatmul.bf16.gmra.mxu3 %v5745_v13  ;;  %v7775_v12 = vld [vmem:[%s10091_s1 + $0x1f0] sm:$0xff]  ;;  %v7765_v13 = vld [vmem:[%s10091_s1 + $0x1a0] sm:$0xff] }
  0xcc   : > { %2193 = vmatpush.bf16.msra.mxu3 %v7775_v12  ;;  %2106 = vmatpush.bf16.msrb.mxu2 %v7765_v13 }
  0xcd   : > { %785 = vmatmul.bf16.gmra.mxu1 %v5525_v15  ;;  %1130 = vmatmul.bf16.gmra.mxu2 %v5713_v16 }
  0xce   : > { %v8445_v14 = vpop.f32.mrf.mxu3 }
  0xd0   : > { %v1091_v18 = vpop.f32.mrf.mxu2  ;;  %v659_v21 = vpop.f32.mrf.mxu0 }
  0xd1   : > { %v8447_v19 = vadd.f32 %v1091_v18, %v747_v8 }
  0xd2   : > { %v748_v22 = vpop.f32.mrf.mxu1 }
  0xd3   : > { %v8449_v24 = vadd.f32 %v748_v22, %v659_v21  ;;  %v7815_v21 = vld [vmem:[%s10091_s1 + $0x230] sm:$0xff] }
  0xd4   : > { %v7823_v22 = vld [vmem:[%s10091_s1 + $0x270] sm:$0xff]  ;;  %2635 = vmatpush.bf16.msra.mxu0 %v7815_v21 }
  0xd5   : > { %2724 = vmatpush.bf16.msra.mxu1 %v7823_v22 }
  0xd6   : > { %v8468_v36 = vpop.f32.mrf.mxu3 }
  0xd8   : > { %v8470_v37 = vpop.f32.mrf.mxu2  ;;  %v662_v40 = vpop.f32.mrf.mxu0  ;;  %2636 = vmatpush.bf16.msra.mxu0 %v7814_v26 }
  0xda   : > { %v751_v45 = vpop.f32.mrf.mxu1 }
  0xdb   : > { %v752_v46 = vadd.f32 %v751_v45, %v662_v40  ;;  %701 = vmatmul.bf16.gmra.mxu0 %v5529_v38  ;;  %1155 = vmatmul.bf16.gmra.mxu3 %v5753_v39  ;;  %v5901_v38 = vor.u32 %v7683_v17, %v5898_v28  ;;  %v5658_v17 = vld [vmem:[%s8213_s18 + $0x38] sm:$0xf0]  ;;  %v5912_v28 = vld [vmem:[%s8213_s18 + $0x270] sm:$0xf] }
  0xdd   : > { %790 = vmatmul.bf16.gmra.mxu1 %v5533_v41  ;;  %1135 = vmatmul.bf16.gmra.mxu2 %v5721_v44 }
  0xde   : > { %v8472_v47 = vpop.f32.mrf.mxu3 }
  0xe0   : > { %v1096_v48 = vpop.f32.mrf.mxu2  ;;  %v664_v50 = vpop.f32.mrf.mxu0 }
  0xe1   : > { %v8474_v49 = vadd.f32 %v1096_v48, %v752_v46 }
  0xe2   : > { %v753_v51 = vpop.f32.mrf.mxu1 }
  0xe3   : > { %v8476_v52 = vadd.f32 %v753_v51, %v664_v50  ;;  %v7764_v51 = vld [vmem:[%s10091_s1 + $0x198] sm:$0xff] }
  0xe4   : > { %2107 = vmatpush.bf16.msrb.mxu2 %v7764_v51 }
  0xe6   : > { %v8484_v62 = vpop.f32.mrf.mxu3 }
  0xe8   : > { %v8486_v63 = vpop.f32.mrf.mxu2  ;;  %v667_v3 = vpop.f32.mrf.mxu0 }
  0xea   : > { %v756_v6 = vpop.f32.mrf.mxu1 }
  0xeb   : > { %v757_v7 = vadd.f32 %v756_v6, %v667_v3  ;;  %1169 = vmatmul.bf16.vlgmr.msrb.gmra.mxu3 %v5637_v0  ;;  %1580 = vmatmul.bf16.vlgmr.msrb.gmra.mxu0 %v5889_v1  ;;  %v5653_v3 = vor.u32 %v7589_v53, %v5650_v54 }
  0xed   : > { %1669 = vmatmul.bf16.vlgmr.msrb.gmra.mxu1 %v5893_v4  ;;  %v5905_v4 = vor.u32 %v7686_v58, %v5904_v56 }
  0xee   : > { %v796_v2 = vpop.f32.mrf.mxu3 }
  0xef   : > { %v8495_v15 = vadd.f32 %v796_v2, %v8388_v20  ;;  %v7684_v20 = vld [vmem:[%s8213_s18 + $0x254] sm:$0xf0] }
  0xf0   : > { %v1101_v16 = vpop.f32.mrf.mxu2  ;;  %v669_v8 = vpop.f32.mrf.mxu0  ;;  %v5897_v34 = vor.u32 %v7684_v20, %v5896_v27  ;;  %v7822_v27 = vld [vmem:[%s10091_s1 + $0x268] sm:$0xff]  ;;  %v7591_v20 = vld [vmem:[%s8213_s18 + $0x34] sm:$0xf] }
  0xf1   : > { %v8497_v5 = vadd.f32 %v1101_v16, %v757_v7  ;;  %v5909_v7 = vor.u32 %v7685_v59, %v5906_v61  ;;  %2725 = vmatpush.bf16.msra.mxu1 %v7822_v27 }
  0xf2   : > { %v758_v11 = vpop.f32.mrf.mxu1 }
  0xf3   : > { %v8499_v18 = vadd.f32 %v758_v11, %v669_v8 }
  0xf6   : > { %v798_v29 = vpop.f32.mrf.mxu3 }
  0xf7   : > { %v8514_v30 = vadd.f32 %v798_v29, %v8405_v42  ;;  %v7687_v29 = vld [vmem:[%s8213_s18 + $0x274] sm:$0xf] }
  0xf8   : > { %v8516_v31 = vpop.f32.mrf.mxu2  ;;  %v672_v35 = vpop.f32.mrf.mxu0 }
  0xfa   : > { %v761_v39 = vpop.f32.mrf.mxu1 }
  0xfb   : > { %v762_v40 = vadd.f32 %v761_v39, %v672_v35  ;;  %1174 = vmatmul.bf16.gmra.mxu3 %v5645_v33  ;;  %1585 = vmatmul.bf16.gmra.mxu0 %v5897_v34  ;;  %v5914_v33 = vld [vmem:[%s8213_s18 + $0x278] sm:$0xf0]  ;;  %v5661_v39 = vor.u32 %v7591_v20, %v5658_v17 }
  0xfd   : > { %1674 = vmatmul.bf16.gmra.mxu1 %v5901_v38 }
  0xfe   : > { %v801_v41 = vpop.f32.mrf.mxu3 }
  0xff   : > { %v8519_v42 = vadd.f32 %v801_v41, %v8421_v55 }
 0x100   : > { %v1106_v44 = vpop.f32.mrf.mxu2  ;;  %v674_v46 = vpop.f32.mrf.mxu0 }
 0x101   : > { %v8521_v45 = vadd.f32 %v1106_v44, %v762_v40  ;;  %v5917_v44 = vor.u32 %v7687_v29, %v5914_v33 }
 0x102   : > { %v763_v48 = vpop.f32.mrf.mxu1 }
 0x103   : > { %v8523_v50 = vadd.f32 %v763_v48, %v674_v46 }
 0x106   : > { %v803_v55 = vpop.f32.mrf.mxu3 }
 0x107   : > { %v8535_v0 = vadd.f32 %v803_v55, %v8438_v9  ;;  %v7774_v9 = vld [vmem:[%s10091_s1 + $0x1e8] sm:$0xff]  ;;  %v7593_v55 = vld [vmem:[%s8213_s18 + $0x44] sm:$0xf] }
 0x108   : > { %v8537_v1 = vpop.f32.mrf.mxu2  ;;  %v677_v6 = vpop.f32.mrf.mxu0  ;;  %2194 = vmatpush.bf16.msra.mxu3 %v7774_v9 }
 0x10a   : > { %v766_v12 = vpop.f32.mrf.mxu1 }
 0x10b   : > { %v767_v13 = vadd.f32 %v766_v12, %v677_v6  ;;  %1179 = vmatmul.bf16.gmra.mxu3 %v5653_v3  ;;  %1590 = vmatmul.bf16.gmra.mxu0 %v5905_v4  ;;  %v5666_v3 = vld [vmem:[%s8213_s18 + $0x48] sm:$0xf0]  ;;  %v5920_v4 = vld [vmem:[%s8213_s18 + $0x280] sm:$0xf]  ;;  %v7690_v6 = vld [vmem:[%s8213_s18 + $0x284] sm:$0xf0] }
 0x10c   : > { %v5922_v12 = vld [vmem:[%s8213_s18 + $0x288] sm:$0xf0] }
 0x10d   : > { %1679 = vmatmul.bf16.gmra.mxu1 %v5909_v7  ;;  %v7689_v7 = vld [vmem:[%s8213_s18 + $0x284] sm:$0xf] }
 0x10e   : > { %v806_v2 = vpop.f32.mrf.mxu3 }
 0x10f   : > { %v8543_v16 = vadd.f32 %v806_v2, %v8445_v14  ;;  %v7688_v14 = vld [vmem:[%s8213_s18 + $0x274] sm:$0xf0] }
 0x110   : > { %v1111_v8 = vpop.f32.mrf.mxu2  ;;  %v679_v21 = vpop.f32.mrf.mxu0  ;;  %v5913_v40 = vor.u32 %v7688_v14, %v5912_v28 }
 0x111   : > { %v8545_v11 = vadd.f32 %v1111_v8, %v767_v13  ;;  %v5921_v8 = vor.u32 %v7690_v6, %v5920_v4 }
 0x112   : > { %v768_v22 = vpop.f32.mrf.mxu1 }
 0x113   : > { %v8547_v25 = vadd.f32 %v768_v22, %v679_v21  ;;  %v5925_v22 = vor.u32 %v7689_v7, %v5922_v12 }
 0x116   : > { %v808_v34 = vpop.f32.mrf.mxu3 }
 0x117   : > { %v8562_v35 = vadd.f32 %v808_v34, %v8468_v36  ;;  %v7763_v36 = vld [vmem:[%s10091_s1 + $0x190] sm:$0xff] }
 0x118   : > { %v8564_v38 = vpop.f32.mrf.mxu2  ;;  %v682_v41 = vpop.f32.mrf.mxu0  ;;  %2108 = vmatpush.bf16.msrb.mxu2 %v7763_v36  ;;  %v7691_v36 = vld [vmem:[%s8213_s18 + $0x294] sm:$0xf] }
 0x11a   : > { %v771_v46 = vpop.f32.mrf.mxu1 }
 0x11b   : > { %v772_v48 = vadd.f32 %v771_v46, %v682_v41  ;;  %1184 = vmatmul.bf16.gmra.mxu3 %v5661_v39  ;;  %1595 = vmatmul.bf16.gmra.mxu0 %v5913_v40  ;;  %v7813_v39 = vld [vmem:[%s10091_s1 + $0x220] sm:$0xff]  ;;  %v7762_v41 = vld [vmem:[%s10091_s1 + $0x188] sm:$0xff]  ;;  %v5928_v46 = vld [vmem:[%s8213_s18 + $0x290] sm:$0xf] }
 0x11c   : > { %v7821_v40 = vld [vmem:[%s10091_s1 + $0x260] sm:$0xff]  ;;  %2637 = vmatpush.bf16.msra.mxu0 %v7813_v39  ;;  %2109 = vmatpush.bf16.msrb.mxu2 %v7762_v41 }
 0x11d   : > { %1684 = vmatmul.bf16.gmra.mxu1 %v5917_v44  ;;  %v5674_v44 = vld [vmem:[%s8213_s18 + $0x58] sm:$0xf0] }
 0x11e   : > { %v811_v51 = vpop.f32.mrf.mxu3  ;;  %2726 = vmatpush.bf16.msra.mxu1 %v7821_v40 }
 0x11f   : > { %v8570_v53 = vadd.f32 %v811_v51, %v8472_v47  ;;  %v5669_v47 = vor.u32 %v7593_v55, %v5666_v3  ;;  %v5930_v51 = vld [vmem:[%s8213_s18 + $0x298] sm:$0xf0] }
 0x120   : > { %v1116_v54 = vpop.f32.mrf.mxu2  ;;  %v684_v58 = vpop.f32.mrf.mxu0  ;;  %v5933_v6 = vor.u32 %v7691_v36, %v5930_v51  ;;  %v7772_v51 = vld [vmem:[%s10091_s1 + $0x1d8] sm:$0xff] }
 0x121   : > { %v8572_v56 = vadd.f32 %v1116_v54, %v772_v48  ;;  %v7692_v48 = vld [vmem:[%s8213_s18 + $0x294] sm:$0xf0] }
 0x122   : > { %v773_v59 = vpop.f32.mrf.mxu1  ;;  %v5929_v3 = vor.u32 %v7692_v48, %v5928_v46 }
 0x123   : > { %v8574_v61 = vadd.f32 %v773_v59, %v684_v58 }
 0x126   : > { %v813_v13 = vpop.f32.mrf.mxu3 }
 0x127   : > { %v8583_v9 = vadd.f32 %v813_v13, %v8484_v62  ;;  %v7773_v62 = vld [vmem:[%s10091_s1 + $0x1e0] sm:$0xff] }
 0x128   : > { %v8585_v2 = vpop.f32.mrf.mxu2  ;;  %v687_v21 = vpop.f32.mrf.mxu0  ;;  %2195 = vmatpush.bf16.msra.mxu3 %v7773_v62  ;;  %v5682_v62 = vld [vmem:[%s8213_s18 + $0x68] sm:$0xf0] }
 0x12a   : > { %v776_v26 = vpop.f32.mrf.mxu1 }
 0x12b   : > { %v777_v27 = vadd.f32 %v776_v26, %v687_v21  ;;  %1189 = vmatmul.bf16.gmra.mxu3 %v5669_v47  ;;  %1600 = vmatmul.bf16.gmra.mxu0 %v5921_v8 }
 0x12c   : > { %2196 = vmatpush.bf16.msra.mxu3 %v7772_v51  ;;  %v7730_v51 = vld [vmem:[%s8213_s18 + $0x14] sm:$0xf0] }
 0x12d   : > { %1689 = vmatmul.bf16.gmra.mxu1 %v5925_v22 }
 0x12e   : > { %v1141_v20 = vpop.f32.mrf.mxu3 }
 0x12f   : > { %v8591_v28 = vadd.f32 %v1141_v20, %v8495_v15  ;;  %v7595_v15 = vld [vmem:[%s8213_s18 + $0x54] sm:$0xf]  ;;  %v5936_v20 = vld [vmem:[%s8213_s18 + $0x2a0] sm:$0xf] }
 0x130   : > { %v1121_v17 = vpop.f32.mrf.mxu2  ;;  %v689_v29 = vpop.f32.mrf.mxu0  ;;  %v5677_v55 = vor.u32 %v7595_v15, %v5674_v44 }
 0x131   : > { %v8593_v14 = vadd.f32 %v1121_v17, %v777_v27  ;;  %v7597_v27 = vld [vmem:[%s8213_s18 + $0x64] sm:$0xf]  ;;  %v7694_v17 = vld [vmem:[%s8213_s18 + $0x2a4] sm:$0xf0] }
 0x132   : > { %v778_v33 = vpop.f32.mrf.mxu1  ;;  %v5937_v15 = vor.u32 %v7694_v17, %v5936_v20  ;;  %v5946_v20 = vld [vmem:[%s8213_s18 + $0x2b8] sm:$0xf0] }
 0x133   : > { %v8595_v34 = vadd.f32 %v778_v33, %v689_v29  ;;  %v7693_v29 = vld [vmem:[%s8213_s18 + $0x2a4] sm:$0xf]  ;;  %v5938_v33 = vld [vmem:[%s8213_s18 + $0x2a8] sm:$0xf0] }
 0x134   : > { %v5941_v46 = vor.u32 %v7693_v29, %v5938_v33 }
 0x136   : > { %v1143_v54 = vpop.f32.mrf.mxu3 }
 0x137   : > { %v8615_v59 = vadd.f32 %v1143_v54, %v8514_v30 }
 0x138   : > { %v8612_v58 = vpop.f32.mrf.mxu2  ;;  %v692_v4 = vpop.f32.mrf.mxu0 }
 0x13a   : > { %v781_v7 = vpop.f32.mrf.mxu1 }
 0x13b   : > { %v782_v12 = vadd.f32 %v781_v7, %v692_v4  ;;  %1194 = vmatmul.bf16.gmra.mxu3 %v5677_v55  ;;  %1605 = vmatmul.bf16.gmra.mxu0 %v5929_v3 }
 0x13d   : > { %1694 = vmatmul.bf16.gmra.mxu1 %v5933_v6 }
 0x13e   : > { %v1146_v13 = vpop.f32.mrf.mxu3 }
 0x13f   : > { %v8618_v30 = vadd.f32 %v1146_v13, %v8519_v42  ;;  %v5685_v42 = vor.u32 %v7597_v27, %v5682_v62  ;;  %v7812_v13 = vld [vmem:[%s10091_s1 + $0x218] sm:$0xff]  ;;  %v5944_v27 = vld [vmem:[%s8213_s18 + $0x2b0] sm:$0xf] }
 0x140   : > { %v1126_v47 = vpop.f32.mrf.mxu2  ;;  %v694_v21 = vpop.f32.mrf.mxu0  ;;  %v7696_v62 = vld [vmem:[%s8213_s18 + $0x2b4] sm:$0xf0]  ;;  %2638 = vmatpush.bf16.msra.mxu0 %v7812_v13 }
 0x141   : > { %v8620_v8 = vadd.f32 %v1126_v47, %v782_v12  ;;  %v7820_v47 = vld [vmem:[%s10091_s1 + $0x258] sm:$0xff] }
 0x142   : > { %v783_v22 = vpop.f32.mrf.mxu1  ;;  %2727 = vmatpush.bf16.msra.mxu1 %v7820_v47 }
 0x143   : > { %v8622_v26 = vadd.f32 %v783_v22, %v694_v21  ;;  %v7599_v21 = vld [vmem:[%s8213_s18 + $0x74] sm:$0xf]  ;;  %v5690_v22 = vld [vmem:[%s8213_s18 + $0x78] sm:$0xf0] }
 0x146   : > { %v1148_v39 = vpop.f32.mrf.mxu3 }
 0x147   : > { %v8633_v41 = vadd.f32 %v1148_v39, %v8535_v0  ;;  %v7761_v0 = vld [vmem:[%s10091_s1 + $0x180] sm:$0xff]  ;;  %v5693_v39 = vor.u32 %v7599_v21, %v5690_v22  ;;  %v7864_v21 = vld [vmem:[%s10091_s1 + $0x2b8] sm:$0xff] }
 0x148   : > { %v8630_v40 = vpop.f32.mrf.mxu2  ;;  %v697_v44 = vpop.f32.mrf.mxu0  ;;  %2110 = vmatpush.bf16.msrb.mxu2 %v7761_v0  ;;  %v7601_v22 = vld [vmem:[%s8213_s18 + $0x84] sm:$0xf] }
 0x14a   : > { %v786_v48 = vpop.f32.mrf.mxu1 }
 0x14b   : > { %v787_v36 = vadd.f32 %v786_v48, %v697_v44  ;;  %1199 = vmatmul.bf16.gmra.mxu3 %v5685_v42  ;;  %1610 = vmatmul.bf16.gmra.mxu0 %v5937_v15  ;;  %v5945_v42 = vor.u32 %v7696_v62, %v5944_v27  ;;  %v5698_v27 = vld [vmem:[%s8213_s18 + $0x88] sm:$0xf0]  ;;  %v5952_v62 = vld [vmem:[%s8213_s18 + $0x2c0] sm:$0xf] }
 0x14c   : > { %3165 = vmatpush.bf16.msra.mxu2 %v7864_v21 }
 0x14d   : > { %1699 = vmatmul.bf16.gmra.mxu1 %v5941_v46 }
 0x14e   : > { %v1151_v54 = vpop.f32.mrf.mxu3 }
 0x14f   : > { %v8642_v3 = vadd.f32 %v1151_v54, %v8543_v16  ;;  %v7695_v16 = vld [vmem:[%s8213_s18 + $0x2b4] sm:$0xf] }
 0x150   : > { %v1131_v55 = vpop.f32.mrf.mxu2  ;;  %v699_v6 = vpop.f32.mrf.mxu0  ;;  %v5949_v44 = vor.u32 %v7695_v16, %v5946_v20  ;;  %v7698_v16 = vld [vmem:[%s8213_s18 + $0x2c4] sm:$0xf0]  ;;  %v7697_v20 = vld [vmem:[%s8213_s18 + $0x2c4] sm:$0xf] }
 0x151   : > { %v8644_v4 = vadd.f32 %v1131_v55, %v787_v36  ;;  %v6112_v36 = vld [vmem:[%s8213_s18 + $0x10] sm:$0xf] }
 0x152   : > { %v788_v7 = vpop.f32.mrf.mxu1  ;;  %v6113_v0 = vor.u32 %v7730_v51, %v6112_v36  ;;  %v6120_v51 = vld [vmem:[%s8213_s18 + $0x20] sm:$0xf] }
 0x153   : > { %v8646_v12 = vadd.f32 %v788_v7, %v699_v6 }
 0x154   : > { %2111 = vmatmul.bf16.vlgmr.msrb.gmra.mxu2 %v6113_v0  ;;  %v7732_v0 = vld [vmem:[%s8213_s18 + $0x24] sm:$0xf0] }
 0x156   : > { %v1153_v17 = vpop.f32.mrf.mxu3 }
 0x157   : > { %v8663_v33 = vadd.f32 %v1153_v17, %v8562_v35 }
 0x158   : > { %v8660_v29 = vpop.f32.mrf.mxu2  ;;  %v702_v15 = vpop.f32.mrf.mxu0 }
 0x15a   : > { %v791_v46 = vpop.f32.mrf.mxu1 }
 0x15b   : > { %v792_v48 = vadd.f32 %v791_v46, %v702_v15  ;;  %1204 = vmatmul.bf16.gmra.mxu3 %v5693_v39  ;;  %1615 = vmatmul.bf16.gmra.mxu0 %v5945_v42  ;;  %v5701_v42 = vor.u32 %v7601_v22, %v5698_v27  ;;  %v5953_v15 = vor.u32 %v7698_v16, %v5952_v62  ;;  %v7811_v62 = vld [vmem:[%s10091_s1 + $0x210] sm:$0xff] }
 0x15c   : > { %v7819_v16 = vld [vmem:[%s10091_s1 + $0x250] sm:$0xff]  ;;  %2639 = vmatpush.bf16.msra.mxu0 %v7811_v62 }
 0x15d   : > { %1704 = vmatmul.bf16.gmra.mxu1 %v5949_v44 }
 0x15e   : > { %v1156_v35 = vpop.f32.mrf.mxu3  ;;  %2728 = vmatpush.bf16.msra.mxu1 %v7819_v16 }
 0x15f   : > { %v8668_v55 = vadd.f32 %v1156_v35, %v8570_v53  ;;  %v5954_v53 = vld [vmem:[%s8213_s18 + $0x2c8] sm:$0xf0]  ;;  %v6121_v35 = vor.u32 %v7732_v0, %v6120_v51 }
 0x160   : > { %v1136_v54 = vpop.f32.mrf.mxu2  ;;  %v704_v7 = vpop.f32.mrf.mxu0  ;;  %v5957_v46 = vor.u32 %v7697_v20, %v5954_v53  ;;  %v7603_v20 = vld [vmem:[%s8213_s18 + $0x94] sm:$0xf]  ;;  %v5706_v53 = vld [vmem:[%s8213_s18 + $0x98] sm:$0xf0] }
 0x161   : > { %v8670_v6 = vadd.f32 %v1136_v54, %v792_v48 }
 0x162   : > { %v793_v13 = vpop.f32.mrf.mxu1 }
 0x163   : > { %v8672_v47 = vadd.f32 %v793_v13, %v704_v7 }
 0x164   : > { %2116 = vmatmul.bf16.gmra.mxu2 %v6121_v35 }
 0x166   : > { %v1158_v17 = vpop.f32.mrf.mxu3 }
 0x167   : > { %v8684_v39 = vadd.f32 %v1158_v17, %v8583_v9  ;;  %v7771_v9 = vld [vmem:[%s10091_s1 + $0x1d0] sm:$0xff] }
 0x168   : > { %v1581_v44 = vpop.f32.mrf.mxu0  ;;  %2197 = vmatpush.bf16.msra.mxu3 %v7771_v9  ;;  %v5960_v17 = vld [vmem:[%s8213_s18 + $0x2d0] sm:$0xf] }
 0x16a   : > { %v1670_v48 = vpop.f32.mrf.mxu1 }
 0x16b   : > { %v1671_v36 = vadd.f32 %v1670_v48, %v1581_v44  ;;  %1209 = vmatmul.bf16.gmra.mxu3 %v5701_v42  ;;  %1620 = vmatmul.bf16.gmra.mxu0 %v5953_v15  ;;  %v7700_v42 = vld [vmem:[%s8213_s18 + $0x2d4] sm:$0xf0]  ;;  %v7699_v15 = vld [vmem:[%s8213_s18 + $0x2d4] sm:$0xf]  ;;  %v5962_v44 = vld [vmem:[%s8213_s18 + $0x2d8] sm:$0xf0] }
 0x16c   : > { %v5961_v51 = vor.u32 %v7700_v42, %v5960_v17  ;;  %v5965_v9 = vor.u32 %v7699_v15, %v5962_v44  ;;  %v7863_v17 = vld [vmem:[%s10091_s1 + $0x2b0] sm:$0xff]  ;;  %v7605_v42 = vld [vmem:[%s8213_s18 + $0xa4] sm:$0xf]  ;;  %v5968_v15 = vld [vmem:[%s8213_s18 + $0x2e0] sm:$0xf] }
 0x16d   : > { %1709 = vmatmul.bf16.gmra.mxu1 %v5957_v46  ;;  %v7702_v44 = vld [vmem:[%s8213_s18 + $0x2e4] sm:$0xf0]  ;;  %3166 = vmatpush.bf16.msra.mxu2 %v7863_v17 }
 0x16e   : > { %v1170_v54 = vpop.f32.mrf.mxu3 }
 0x16f   : > { %v1171_v7 = vadd.f32 %v1170_v54, %v8390_v23  ;;  %v1084_v23 = vadd.f32 %v8407_v43, %v8392_v32  ;;  %v7734_v32 = vld [vmem:[%s8213_s18 + $0x34] sm:$0xf0] }
 0x170   : > { %v1583_v13 = vpop.f32.mrf.mxu0 }
 0x171   : > { %v8692_v21 = vadd.f32 %v1671_v36, %v1171_v7  ;;  %v5709_v36 = vor.u32 %v7603_v20, %v5706_v53 }
 0x172   : > { %v1672_v22 = vpop.f32.mrf.mxu1 }
 0x173   : > { %v1673_v27 = vadd.f32 %v1672_v22, %v1583_v13  ;;  %v6128_v13 = vld [vmem:[%s8213_s18 + $0x30] sm:$0xf] }
 0x174   : > { %v6129_v43 = vor.u32 %v7734_v32, %v6128_v13 }
 0x176   : > { %v1172_v46 = vpop.f32.mrf.mxu3  ;;  %2121 = vmatmul.bf16.gmra.mxu2 %v6129_v43 }
 0x177   : > { %v1173_v48 = vadd.f32 %v1172_v46, %v1084_v23  ;;  %v5714_v23 = vld [vmem:[%s8213_s18 + $0xa8] sm:$0xf0]  ;;  %v1089_v46 = vadd.f32 %v8440_v10, %v8425_v60 }
 0x178   : > { %v1586_v0 = vpop.f32.mrf.mxu0  ;;  %v7770_v60 = vld [vmem:[%s10091_s1 + $0x1c8] sm:$0xff] }
 0x179   : > { %v8708_v35 = vadd.f32 %v1673_v27, %v1173_v48  ;;  %v5970_v48 = vld [vmem:[%s8213_s18 + $0x2e8] sm:$0xf0]  ;;  %2198 = vmatpush.bf16.msra.mxu3 %v7770_v60 }
 0x17a   : > { %v1675_v54 = vpop.f32.mrf.mxu1 }
 0x17b   : > { %v1676_v7 = vadd.f32 %v1675_v54, %v1586_v0  ;;  %1214 = vmatmul.bf16.gmra.mxu3 %v5709_v36  ;;  %1625 = vmatmul.bf16.gmra.mxu0 %v5961_v51  ;;  %v5717_v0 = vor.u32 %v7605_v42, %v5714_v23 }
 0x17d   : > { %1714 = vmatmul.bf16.gmra.mxu1 %v5965_v9  ;;  %v5969_v9 = vor.u32 %v7702_v44, %v5968_v15  ;;  %v7810_v15 = vld [vmem:[%s10091_s1 + $0x208] sm:$0xff] }
 0x17e   : > { %v1175_v22 = vpop.f32.mrf.mxu3  ;;  %v7818_v44 = vld [vmem:[%s10091_s1 + $0x248] sm:$0xff]  ;;  %2640 = vmatpush.bf16.msra.mxu0 %v7810_v15 }
 0x17f   : > { %v1176_v62 = vadd.f32 %v1175_v22, %v8423_v57  ;;  %v7701_v57 = vld [vmem:[%s8213_s18 + $0x2e4] sm:$0xf]  ;;  %v6136_v22 = vld [vmem:[%s8213_s18 + $0x40] sm:$0xf]  ;;  %2729 = vmatpush.bf16.msra.mxu1 %v7818_v44 }
 0x180   : > { %v1588_v27 = vpop.f32.mrf.mxu0 }
 0x181   : > { %v8713_v16 = vadd.f32 %v1676_v7, %v1176_v62  ;;  %v5973_v7 = vor.u32 %v7701_v57, %v5970_v48  ;;  %v7736_v62 = vld [vmem:[%s8213_s18 + $0x44] sm:$0xf0]  ;;  %v5722_v57 = vld [vmem:[%s8213_s18 + $0xb8] sm:$0xf0]  ;;  %v5976_v48 = vld [vmem:[%s8213_s18 + $0x2f0] sm:$0xf] }
 0x182   : > { %v1677_v20 = vpop.f32.mrf.mxu1  ;;  %v6137_v10 = vor.u32 %v7736_v62, %v6136_v22 }
 0x183   : > { %v1678_v53 = vadd.f32 %v1677_v20, %v1588_v27 }
 0x186   : > { %v1177_v36 = vpop.f32.mrf.mxu3  ;;  %2126 = vmatmul.bf16.gmra.mxu2 %v6137_v10 }
 0x187   : > { %v1178_v51 = vadd.f32 %v1177_v36, %v1089_v46  ;;  %v7607_v46 = vld [vmem:[%s8213_s18 + $0xb4] sm:$0xf]  ;;  %v7704_v36 = vld [vmem:[%s8213_s18 + $0x2f4] sm:$0xf0] }
 0x188   : > { %v1591_v54 = vpop.f32.mrf.mxu0 }
 0x189   : > { %v8726_v13 = vadd.f32 %v1678_v53, %v1178_v51  ;;  %v7703_v51 = vld [vmem:[%s8213_s18 + $0x2f4] sm:$0xf] }
 0x18a   : > { %v1680_v32 = vpop.f32.mrf.mxu1 }
 0x18b   : > { %v1681_v43 = vadd.f32 %v1680_v32, %v1591_v54  ;;  %1219 = vmatmul.bf16.gmra.mxu3 %v5717_v0  ;;  %1630 = vmatmul.bf16.gmra.mxu0 %v5969_v9  ;;  %v5978_v0 = vld [vmem:[%s8213_s18 + $0x2f8] sm:$0xf0]  ;;  %v5977_v32 = vor.u32 %v7704_v36, %v5976_v48  ;;  %v5730_v48 = vld [vmem:[%s8213_s18 + $0xc8] sm:$0xf0]  ;;  %v5984_v36 = vld [vmem:[%s8213_s18 + $0x300] sm:$0xf] }
 0x18c   : > { %v5981_v22 = vor.u32 %v7703_v51, %v5978_v0  ;;  %v1099_v51 = vadd.f32 %v8486_v63, %v8476_v52  ;;  %v5986_v0 = vld [vmem:[%s8213_s18 + $0x308] sm:$0xf0]  ;;  %v7769_v52 = vld [vmem:[%s10091_s1 + $0x1c0] sm:$0xff] }
 0x18d   : > { %1719 = vmatmul.bf16.gmra.mxu1 %v5973_v7  ;;  %v5725_v7 = vor.u32 %v7607_v46, %v5722_v57  ;;  %v7862_v46 = vld [vmem:[%s10091_s1 + $0x2a8] sm:$0xff]  ;;  %v7609_v57 = vld [vmem:[%s8213_s18 + $0xc4] sm:$0xf]  ;;  %2199 = vmatpush.bf16.msra.mxu3 %v7769_v52  ;;  %v6160_v52 = vld [vmem:[%s8213_s18 + $0x70] sm:$0xf] }
 0x18e   : > { %v1180_v27 = vpop.f32.mrf.mxu3  ;;  %3167 = vmatpush.bf16.msra.mxu2 %v7862_v46 }
 0x18f   : > { %v1181_v20 = vadd.f32 %v1180_v27, %v8447_v19  ;;  %v1094_v19 = vadd.f32 %v8470_v37, %v8449_v24  ;;  %v6144_v27 = vld [vmem:[%s8213_s18 + $0x50] sm:$0xf]  ;;  %v7738_v24 = vld [vmem:[%s8213_s18 + $0x54] sm:$0xf0] }
 0x190   : > { %v1593_v53 = vpop.f32.mrf.mxu0  ;;  %v6145_v37 = vor.u32 %v7738_v24, %v6144_v27  ;;  %v6152_v24 = vld [vmem:[%s8213_s18 + $0x60] sm:$0xf] }
 0x191   : > { %v8734_v17 = vadd.f32 %v1681_v43, %v1181_v20 }
 0x192   : > { %v1682_v42 = vpop.f32.mrf.mxu1 }
 0x193   : > { %v1683_v23 = vadd.f32 %v1682_v42, %v1593_v53 }
 0x196   : > { %v1182_v9 = vpop.f32.mrf.mxu3  ;;  %2131 = vmatmul.bf16.gmra.mxu2 %v6145_v37  ;;  %v7740_v37 = vld [vmem:[%s8213_s18 + $0x64] sm:$0xf0] }
 0x197   : > { %v1183_v54 = vadd.f32 %v1182_v9, %v1094_v19  ;;  %v7706_v19 = vld [vmem:[%s8213_s18 + $0x304] sm:$0xf0]  ;;  %v6153_v63 = vor.u32 %v7740_v37, %v6152_v24 }
 0x198   : > { %v1596_v43 = vpop.f32.mrf.mxu0 }
 0x199   : > { %v8750_v62 = vadd.f32 %v1683_v23, %v1183_v54 }
 0x19a   : > { %v1685_v60 = vpop.f32.mrf.mxu1 }
 0x19b   : > { %v1686_v10 = vadd.f32 %v1685_v60, %v1596_v43  ;;  %1224 = vmatmul.bf16.gmra.mxu3 %v5725_v7  ;;  %1635 = vmatmul.bf16.gmra.mxu0 %v5977_v32  ;;  %v5733_v7 = vor.u32 %v7609_v57, %v5730_v48  ;;  %v5985_v32 = vor.u32 %v7706_v19, %v5984_v36  ;;  %v7809_v57 = vld [vmem:[%s10091_s1 + $0x200] sm:$0xff]  ;;  %v7611_v36 = vld [vmem:[%s8213_s18 + $0xd4] sm:$0xf]  ;;  %v5738_v19 = vld [vmem:[%s8213_s18 + $0xd8] sm:$0xf0] }
 0x19c   : > { %v7817_v48 = vld [vmem:[%s10091_s1 + $0x240] sm:$0xff]  ;;  %2641 = vmatpush.bf16.msra.mxu0 %v7809_v57 }
 0x19d   : > { %1724 = vmatmul.bf16.gmra.mxu1 %v5981_v22  ;;  %v7861_v57 = vld [vmem:[%s10091_s1 + $0x2a0] sm:$0xff] }
 0x19e   : > { %v1185_v20 = vpop.f32.mrf.mxu3  ;;  %2730 = vmatpush.bf16.msra.mxu1 %v7817_v48  ;;  %v7613_v48 = vld [vmem:[%s8213_s18 + $0xe4] sm:$0xf]  ;;  %3168 = vmatpush.bf16.msra.mxu2 %v7861_v57  ;;  %v7920_v57 = vld [vmem:[%s10091_s1 + $0x378] sm:$0xff] }
 0x19f   : > { %v1186_v53 = vadd.f32 %v1185_v20, %v8474_v49  ;;  %v7705_v49 = vld [vmem:[%s8213_s18 + $0x304] sm:$0xf] }
 0x1a0   : > { %v1598_v42 = vpop.f32.mrf.mxu0  ;;  %v5989_v22 = vor.u32 %v7705_v49, %v5986_v0  ;;  %v7708_v49 = vld [vmem:[%s8213_s18 + $0x314] sm:$0xf0]  ;;  %v7707_v0 = vld [vmem:[%s8213_s18 + $0x314] sm:$0xf] }
 0x1a1   : > { %v8755_v23 = vadd.f32 %v1686_v10, %v1186_v53 }
 0x1a2   : > { %v1687_v15 = vpop.f32.mrf.mxu1  ;;  %3785 = vmatpush.bf16.msrb.mxu1 %v7920_v57  ;;  %v7729_v57 = vld [vmem:[%s8213_s18 + $0x14] sm:$0xf] }
 0x1a3   : > { %v1688_v44 = vadd.f32 %v1687_v15, %v1598_v42 }
 0x1a6   : > { %v1187_v9 = vpop.f32.mrf.mxu3  ;;  %2136 = vmatmul.bf16.gmra.mxu2 %v6153_v63 }
 0x1a7   : > { %v1188_v54 = vadd.f32 %v1187_v9, %v1099_v51  ;;  %v5992_v51 = vld [vmem:[%s8213_s18 + $0x310] sm:$0xf]  ;;  %v5994_v9 = vld [vmem:[%s8213_s18 + $0x318] sm:$0xf0] }
 0x1a8   : > { %v1601_v43 = vpop.f32.mrf.mxu0 }
 0x1a9   : > { %v8768_v60 = vadd.f32 %v1688_v44, %v1188_v54 }
 0x1aa   : > { %v1690_v10 = vpop.f32.mrf.mxu1 }
 0x1ab   : > { %v1691_v27 = vadd.f32 %v1690_v10, %v1601_v43  ;;  %1229 = vmatmul.bf16.gmra.mxu3 %v5733_v7  ;;  %1640 = vmatmul.bf16.gmra.mxu0 %v5985_v32  ;;  %v5741_v32 = vor.u32 %v7611_v36, %v5738_v19  ;;  %v5993_v43 = vor.u32 %v7708_v49, %v5992_v51  ;;  %v5746_v36 = vld [vmem:[%s8213_s18 + $0xe8] sm:$0xf0]  ;;  %v6000_v19 = vld [vmem:[%s8213_s18 + $0x320] sm:$0xf]  ;;  %v7710_v51 = vld [vmem:[%s8213_s18 + $0x324] sm:$0xf0] }
 0x1ac   : > { %v5997_v10 = vor.u32 %v7707_v0, %v5994_v9  ;;  %v1109_v49 = vadd.f32 %v8537_v1, %v8523_v50  ;;  %v7872_v50 = vld [vmem:[%s10091_s1 + $0x2f8] sm:$0xff] }
 0x1ad   : > { %1729 = vmatmul.bf16.gmra.mxu1 %v5989_v22  ;;  %3254 = vmatpush.bf16.msrb.mxu3 %v7872_v50 }
 0x1ae   : > { %v1190_v20 = vpop.f32.mrf.mxu3 }
 0x1af   : > { %v1191_v53 = vadd.f32 %v1190_v20, %v8497_v5  ;;  %v1104_v5 = vadd.f32 %v8516_v31, %v8499_v18  ;;  %v7742_v18 = vld [vmem:[%s8213_s18 + $0x74] sm:$0xf0] }
 0x1b0   : > { %v1603_v42 = vpop.f32.mrf.mxu0  ;;  %v6161_v31 = vor.u32 %v7742_v18, %v6160_v52  ;;  %v7744_v52 = vld [vmem:[%s8213_s18 + $0x84] sm:$0xf0] }
 0x1b1   : > { %v8776_v15 = vadd.f32 %v1691_v27, %v1191_v53 }
 0x1b2   : > { %v1692_v44 = vpop.f32.mrf.mxu1 }
 0x1b3   : > { %v1693_v46 = vadd.f32 %v1692_v44, %v1603_v42 }
 0x1b6   : > { %v1192_v54 = vpop.f32.mrf.mxu3  ;;  %2141 = vmatmul.bf16.gmra.mxu2 %v6161_v31 }
 0x1b7   : > { %v1193_v7 = vadd.f32 %v1192_v54, %v1104_v5  ;;  %v6002_v5 = vld [vmem:[%s8213_s18 + $0x328] sm:$0xf0]  ;;  %v5749_v54 = vor.u32 %v7613_v48, %v5746_v36  ;;  %v7615_v48 = vld [vmem:[%s8213_s18 + $0xf4] sm:$0xf]  ;;  %v5754_v36 = vld [vmem:[%s8213_s18 + $0xf8] sm:$0xf0] }
 0x1b8   : > { %v1606_v22 = vpop.f32.mrf.mxu0 }
 0x1b9   : > { %v8792_v27 = vadd.f32 %v1693_v46, %v1193_v7  ;;  %v6001_v7 = vor.u32 %v7710_v51, %v6000_v19  ;;  %v6008_v19 = vld [vmem:[%s8213_s18 + $0x330] sm:$0xf]  ;;  %v7712_v51 = vld [vmem:[%s8213_s18 + $0x334] sm:$0xf0] }
 0x1ba   : > { %v1695_v24 = vpop.f32.mrf.mxu1 }
 0x1bb   : > { %v1696_v37 = vadd.f32 %v1695_v24, %v1606_v22  ;;  %1234 = vmatmul.bf16.gmra.mxu3 %v5741_v32  ;;  %1645 = vmatmul.bf16.gmra.mxu0 %v5993_v43 }
 0x1bd   : > { %1734 = vmatmul.bf16.gmra.mxu1 %v5997_v10 }
 0x1be   : > { %v1195_v63 = vpop.f32.mrf.mxu3 }
 0x1bf   : > { %v1196_v20 = vadd.f32 %v1195_v63, %v8521_v45  ;;  %v7709_v45 = vld [vmem:[%s8213_s18 + $0x324] sm:$0xf] }
 0x1c0   : > { %v1608_v53 = vpop.f32.mrf.mxu0  ;;  %v6005_v43 = vor.u32 %v7709_v45, %v6002_v5  ;;  %v6010_v45 = vld [vmem:[%s8213_s18 + $0x338] sm:$0xf0] }
 0x1c1   : > { %v8797_v42 = vadd.f32 %v1696_v37, %v1196_v20  ;;  %v6168_v37 = vld [vmem:[%s8213_s18 + $0x80] sm:$0xf] }
 0x1c2   : > { %v1697_v44 = vpop.f32.mrf.mxu1  ;;  %v6169_v1 = vor.u32 %v7744_v52, %v6168_v37 }
 0x1c3   : > { %v1698_v46 = vadd.f32 %v1697_v44, %v1608_v53 }
 0x1c6   : > { %v1197_v0 = vpop.f32.mrf.mxu3  ;;  %2146 = vmatmul.bf16.gmra.mxu2 %v6169_v1 }
 0x1c7   : > { %v1198_v9 = vadd.f32 %v1197_v0, %v1109_v49  ;;  %v7711_v49 = vld [vmem:[%s8213_s18 + $0x334] sm:$0xf] }
 0x1c8   : > { %v1611_v32 = vpop.f32.mrf.mxu0 }
 0x1c9   : > { %v8810_v22 = vadd.f32 %v1698_v46, %v1198_v9  ;;  %v7912_v46 = vld [vmem:[%s10091_s1 + $0x338] sm:$0xff]  ;;  %v5757_v9 = vor.u32 %v7615_v48, %v5754_v36  ;;  %v6368_v36 = vld [vmem:[%s8213_s18 + $0x130] sm:$0xf] }
 0x1ca   : > { %v1700_v10 = vpop.f32.mrf.mxu1  ;;  %3696 = vmatpush.bf16.msrb.mxu0 %v7912_v46  ;;  %v7860_v46 = vld [vmem:[%s10091_s1 + $0x298] sm:$0xff] }
 0x1cb   : > { %v1701_v24 = vadd.f32 %v1700_v10, %v1611_v32  ;;  %1239 = vmatmul.bf16.gmra.mxu3 %v5749_v54  ;;  %1650 = vmatmul.bf16.gmra.mxu0 %v6001_v7  ;;  %v6009_v54 = vor.u32 %v7712_v51, %v6008_v19  ;;  %v6013_v32 = vor.u32 %v7711_v49, %v6010_v45  ;;  %v6114_v48 = vld [vmem:[%s8213_s18 + $0x18] sm:$0xf0]  ;;  %v7778_v19 = vld [vmem:[%s8213_s18 + $0x134] sm:$0xf0]  ;;  %v7777_v51 = vld [vmem:[%s8213_s18 + $0x134] sm:$0xf] }
 0x1cc   : > { %3169 = vmatpush.bf16.msra.mxu2 %v7860_v46 }
 0x1cd   : > { %1739 = vmatmul.bf16.gmra.mxu1 %v6005_v43  ;;  %v8834_v43 = vpop.f32.mrf.mxu2 }
 0x1ce   : > { %v1200_v18 = vpop.f32.mrf.mxu3 }
 0x1cf   : > { %v1201_v31 = vadd.f32 %v1200_v18, %v8545_v11  ;;  %v1114_v11 = vadd.f32 %v8564_v38, %v8547_v25  ;;  %v6176_v25 = vld [vmem:[%s8213_s18 + $0x90] sm:$0xf]  ;;  %v7746_v38 = vld [vmem:[%s8213_s18 + $0x94] sm:$0xf0] }
 0x1d0   : > { %v1613_v63 = vpop.f32.mrf.mxu0  ;;  %v6177_v52 = vor.u32 %v7746_v38, %v6176_v25  ;;  %v6184_v25 = vld [vmem:[%s8213_s18 + $0xa0] sm:$0xf] }
 0x1d1   : > { %v8818_v20 = vadd.f32 %v1701_v24, %v1201_v31 }
 0x1d2   : > { %v1702_v53 = vpop.f32.mrf.mxu1 }
 0x1d3   : > { %v1703_v44 = vadd.f32 %v1702_v53, %v1613_v63 }
 0x1d6   : > { %v1202_v5 = vpop.f32.mrf.mxu3  ;;  %2151 = vmatmul.bf16.gmra.mxu2 %v6177_v52 }
 0x1d7   : > { %v1203_v0 = vadd.f32 %v1202_v5, %v1114_v11  ;;  %v8843_v53 = vpop.f32.mrf.mxu2  ;;  %v6370_v11 = vld [vmem:[%s8213_s18 + $0x138] sm:$0xf0]  ;;  %v6117_v5 = vor.u32 %v7729_v57, %v6114_v48  ;;  %v7911_v57 = vld [vmem:[%s10091_s1 + $0x330] sm:$0xff] }
 0x1d8   : > { %v1616_v7 = vpop.f32.mrf.mxu0  ;;  %v7919_v48 = vld [vmem:[%s10091_s1 + $0x370] sm:$0xff]  ;;  %3697 = vmatpush.bf16.msrb.mxu0 %v7911_v57 }
 0x1d9   : > { %v8836_v10 = vadd.f32 %v1703_v44, %v1203_v0  ;;  %v6369_v0 = vor.u32 %v7778_v19, %v6368_v36  ;;  %v7731_v36 = vld [vmem:[%s8213_s18 + $0x24] sm:$0xf]  ;;  %v6122_v19 = vld [vmem:[%s8213_s18 + $0x28] sm:$0xf0]  ;;  %3786 = vmatpush.bf16.msrb.mxu1 %v7919_v48 }
 0x1da   : > { %v1705_v24 = vpop.f32.mrf.mxu1 }
 0x1db   : > { %v1706_v37 = vadd.f32 %v1705_v24, %v1616_v7  ;;  %1244 = vmatmul.bf16.gmra.mxu3 %v5757_v9  ;;  %1655 = vmatmul.bf16.gmra.mxu0 %v6009_v54  ;;  %v6373_v54 = vor.u32 %v7777_v51, %v6370_v11  ;;  %v1124_v51 = vadd.f32 %v8612_v58, %v8595_v34  ;;  %v7779_v11 = vld [vmem:[%s8213_s18 + $0x144] sm:$0xf]  ;;  %v6192_v34 = vld [vmem:[%s8213_s18 + $0xb0] sm:$0xf]  ;;  %v7750_v58 = vld [vmem:[%s8213_s18 + $0xb4] sm:$0xf0] }
 0x1dd   : > { %1744 = vmatmul.bf16.gmra.mxu1 %v6013_v32 }
 0x1de   : > { %v1205_v50 = vpop.f32.mrf.mxu3 }
 0x1df   : > { %v1206_v1 = vadd.f32 %v1205_v50, %v8572_v56  ;;  %v1119_v56 = vadd.f32 %v8585_v2, %v8574_v61  ;;  %v8858_v24 = vpop.f32.mrf.mxu2  ;;  %v7748_v61 = vld [vmem:[%s8213_s18 + $0xa4] sm:$0xf0]  ;;  %v7871_v2 = vld [vmem:[%s10091_s1 + $0x2f0] sm:$0xff] }
 0x1e0   : > { %v1618_v18 = vpop.f32.mrf.mxu0  ;;  %v6185_v38 = vor.u32 %v7748_v61, %v6184_v25  ;;  %3255 = vmatpush.bf16.msrb.mxu3 %v7871_v2 }
 0x1e1   : > { %v8841_v31 = vadd.f32 %v1706_v37, %v1206_v1 }
 0x1e2   : > { %v1707_v63 = vpop.f32.mrf.mxu1 }
 0x1e3   : > { %v1708_v44 = vadd.f32 %v1707_v63, %v1618_v18 }
 0x1e6   : > { %v1207_v49 = vpop.f32.mrf.mxu3  ;;  %2156 = vmatmul.bf16.gmra.mxu2 %v6185_v38  ;;  %v6193_v38 = vor.u32 %v7750_v58, %v6192_v34 }
 0x1e7   : > { %v1208_v45 = vadd.f32 %v1207_v49, %v1119_v56  ;;  %v6376_v56 = vld [vmem:[%s8213_s18 + $0x140] sm:$0xf]  ;;  %v6378_v49 = vld [vmem:[%s8213_s18 + $0x148] sm:$0xf0] }
 0x1e8   : > { %v1621_v9 = vpop.f32.mrf.mxu0 }
 0x1e9   : > { %v8856_v7 = vadd.f32 %v1708_v44, %v1208_v45  ;;  %v8868_v44 = vpop.f32.mrf.mxu2 }
 0x1ea   : > { %v1710_v32 = vpop.f32.mrf.mxu1 }
 0x1eb   : > { %v1711_v37 = vadd.f32 %v1710_v32, %v1621_v9  ;;  %2200 = vmatmul.bf16.vlgmr.msra.gmra.mxu3 %v6117_v5  ;;  %2642 = vmatmul.bf16.vlgmr.msra.gmra.mxu0 %v6369_v0  ;;  %v6125_v0 = vor.u32 %v7731_v36, %v6122_v19  ;;  %v6381_v32 = vor.u32 %v7779_v11, %v6378_v49  ;;  %v7859_v36 = vld [vmem:[%s10091_s1 + $0x290] sm:$0xff]  ;;  %v6386_v49 = vld [vmem:[%s8213_s18 + $0x158] sm:$0xf0] }
 0x1ec   : > { %v7733_v19 = vld [vmem:[%s8213_s18 + $0x34] sm:$0xf]  ;;  %3170 = vmatpush.bf16.msra.mxu2 %v7859_v36 }
 0x1ed   : > { %2731 = vmatmul.bf16.vlgmr.msra.gmra.mxu1 %v6373_v54  ;;  %v7781_v11 = vld [vmem:[%s8213_s18 + $0x154] sm:$0xf] }
 0x1ee   : > { %v1210_v52 = vpop.f32.mrf.mxu3 }
 0x1ef   : > { %v1211_v50 = vadd.f32 %v1210_v52, %v8593_v14  ;;  %v7780_v14 = vld [vmem:[%s8213_s18 + $0x144] sm:$0xf0] }
 0x1f0   : > { %v1623_v1 = vpop.f32.mrf.mxu0  ;;  %v6377_v9 = vor.u32 %v7780_v14, %v6376_v56  ;;  %v6130_v56 = vld [vmem:[%s8213_s18 + $0x38] sm:$0xf0]  ;;  %v6384_v14 = vld [vmem:[%s8213_s18 + $0x150] sm:$0xf] }
 0x1f1   : > { %v8866_v18 = vadd.f32 %v1711_v37, %v1211_v50  ;;  %v8886_v61 = vpop.f32.mrf.mxu2 }
 0x1f2   : > { %v1712_v63 = vpop.f32.mrf.mxu1 }
 0x1f3   : > { %v1713_v46 = vadd.f32 %v1712_v63, %v1623_v1 }
 0x1f6   : > { %v1212_v45 = vpop.f32.mrf.mxu3  ;;  %2161 = vmatmul.bf16.gmra.mxu2 %v6193_v38  ;;  %v6200_v38 = vld [vmem:[%s8213_s18 + $0xc0] sm:$0xf] }
 0x1f7   : > { %v1213_v5 = vadd.f32 %v1212_v45, %v1124_v51  ;;  %v7782_v51 = vld [vmem:[%s8213_s18 + $0x154] sm:$0xf0] }
 0x1f8   : > { %v1626_v54 = vpop.f32.mrf.mxu0 }
 0x1f9   : > { %v8884_v37 = vadd.f32 %v1713_v46, %v1213_v5  ;;  %v8893_v57 = vpop.f32.mrf.mxu2 }
 0x1fa   : > { %v1715_v25 = vpop.f32.mrf.mxu1 }
 0x1fb   : > { %v1716_v2 = vadd.f32 %v1715_v25, %v1626_v54  ;;  %2205 = vmatmul.bf16.gmra.mxu3 %v6125_v0  ;;  %2647 = vmatmul.bf16.gmra.mxu0 %v6377_v9  ;;  %v6133_v0 = vor.u32 %v7733_v19, %v6130_v56  ;;  %v6385_v9 = vor.u32 %v7782_v51, %v6384_v14  ;;  %v7910_v14 = vld [vmem:[%s10091_s1 + $0x328] sm:$0xff] }
 0x1fc   : > { %v7918_v51 = vld [vmem:[%s10091_s1 + $0x368] sm:$0xff]  ;;  %3698 = vmatpush.bf16.msrb.mxu0 %v7910_v14 }
 0x1fd   : > { %2736 = vmatmul.bf16.gmra.mxu1 %v6381_v32  ;;  %v6389_v32 = vor.u32 %v7781_v11, %v6386_v49  ;;  %v6138_v11 = vld [vmem:[%s8213_s18 + $0x48] sm:$0xf0]  ;;  %v6392_v49 = vld [vmem:[%s8213_s18 + $0x160] sm:$0xf] }
 0x1fe   : > { %v1215_v52 = vpop.f32.mrf.mxu3  ;;  %3787 = vmatpush.bf16.msrb.mxu1 %v7918_v51 }
 0x1ff   : > { %v1216_v50 = vadd.f32 %v1215_v52, %v8620_v8  ;;  %v1129_v8 = vadd.f32 %v8630_v40, %v8622_v26  ;;  %v7752_v26 = vld [vmem:[%s8213_s18 + $0xc4] sm:$0xf0] }
 0x200   : > { %v1628_v1 = vpop.f32.mrf.mxu0  ;;  %v7870_v40 = vld [vmem:[%s10091_s1 + $0x2e8] sm:$0xff]  ;;  %v6201_v52 = vor.u32 %v7752_v26, %v6200_v38 }
 0x201   : > { %v8891_v63 = vadd.f32 %v1716_v2, %v1216_v50  ;;  %v8908_v34 = vpop.f32.mrf.mxu2  ;;  %3256 = vmatpush.bf16.msrb.mxu3 %v7870_v40 }
 0x202   : > { %v1717_v46 = vpop.f32.mrf.mxu1 }
 0x203   : > { %v1718_v48 = vadd.f32 %v1717_v46, %v1628_v1 }
 0x206   : > { %v1217_v45 = vpop.f32.mrf.mxu3  ;;  %2166 = vmatmul.bf16.gmra.mxu2 %v6201_v52 }
 0x207   : > { %v1218_v5 = vadd.f32 %v1217_v45, %v1129_v8  ;;  %v7735_v8 = vld [vmem:[%s8213_s18 + $0x44] sm:$0xf]  ;;  %v1134_v45 = vadd.f32 %v8660_v29, %v8646_v12  ;;  %v6208_v12 = vld [vmem:[%s8213_s18 + $0xd0] sm:$0xf]  ;;  %v7754_v29 = vld [vmem:[%s8213_s18 + $0xd4] sm:$0xf0] }
 0x208   : > { %v1631_v54 = vpop.f32.mrf.mxu0 }
 0x209   : > { %v8906_v25 = vadd.f32 %v1718_v48, %v1218_v5  ;;  %v8918_v19 = vpop.f32.mrf.mxu2  ;;  %v7783_v5 = vld [vmem:[%s8213_s18 + $0x164] sm:$0xf] }
 0x20a   : > { %v1720_v2 = vpop.f32.mrf.mxu1 }
 0x20b   : > { %v1721_v58 = vadd.f32 %v1720_v2, %v1631_v54  ;;  %2210 = vmatmul.bf16.gmra.mxu3 %v6133_v0  ;;  %2652 = vmatmul.bf16.gmra.mxu0 %v6385_v9  ;;  %v6394_v0 = vld [vmem:[%s8213_s18 + $0x168] sm:$0xf0] }
 0x20c   : > { %v6397_v38 = vor.u32 %v7783_v5, %v6394_v0  ;;  %v6400_v5 = vld [vmem:[%s8213_s18 + $0x170] sm:$0xf]  ;;  %v7786_v0 = vld [vmem:[%s8213_s18 + $0x174] sm:$0xf0] }
 0x20d   : > { %2741 = vmatmul.bf16.gmra.mxu1 %v6389_v32  ;;  %v6141_v32 = vor.u32 %v7735_v8, %v6138_v11 }
 0x20e   : > { %v1220_v50 = vpop.f32.mrf.mxu3 }
 0x20f   : > { %v1221_v1 = vadd.f32 %v1220_v50, %v8644_v4  ;;  %v7784_v4 = vld [vmem:[%s8213_s18 + $0x164] sm:$0xf0] }
 0x210   : > { %v1633_v46 = vpop.f32.mrf.mxu0  ;;  %v6393_v2 = vor.u32 %v7784_v4, %v6392_v49  ;;  %v7858_v49 = vld [vmem:[%s10091_s1 + $0x288] sm:$0xff]  ;;  %v7737_v4 = vld [vmem:[%s8213_s18 + $0x54] sm:$0xf] }
 0x211   : > { %v8916_v48 = vadd.f32 %v1721_v58, %v1221_v1  ;;  %v8936_v52 = vpop.f32.mrf.mxu2  ;;  %v6209_v1 = vor.u32 %v7754_v29, %v6208_v12  ;;  %3171 = vmatpush.bf16.msra.mxu2 %v7858_v49 }
 0x212   : > { %v1722_v36 = vpop.f32.mrf.mxu1 }
 0x213   : > { %v1723_v56 = vadd.f32 %v1722_v36, %v1633_v46 }
 0x216   : > { %v1222_v9 = vpop.f32.mrf.mxu3  ;;  %2171 = vmatmul.bf16.gmra.mxu2 %v6209_v1 }
 0x217   : > { %v1223_v54 = vadd.f32 %v1222_v9, %v1134_v45  ;;  %v6146_v45 = vld [vmem:[%s8213_s18 + $0x58] sm:$0xf0]  ;;  %v7785_v9 = vld [vmem:[%s8213_s18 + $0x174] sm:$0xf] }
 0x218   : > { %v1636_v58 = vpop.f32.mrf.mxu0 }
 0x219   : > { %v8934_v26 = vadd.f32 %v1723_v56, %v1223_v54  ;;  %v8943_v8 = vpop.f32.mrf.mxu2  ;;  %v6402_v54 = vld [vmem:[%s8213_s18 + $0x178] sm:$0xf0] }
 0x21a   : > { %v1725_v40 = vpop.f32.mrf.mxu1 }
 0x21b   : > { %v1726_v50 = vadd.f32 %v1725_v40, %v1636_v58  ;;  %2215 = vmatmul.bf16.gmra.mxu3 %v6141_v32  ;;  %2657 = vmatmul.bf16.gmra.mxu0 %v6393_v2  ;;  %v6149_v58 = vor.u32 %v7737_v4, %v6146_v45 }
 0x21d   : > { %2746 = vmatmul.bf16.gmra.mxu1 %v6397_v38  ;;  %v6401_v38 = vor.u32 %v7786_v0, %v6400_v5 }
 0x21e   : > { %v1225_v46 = vpop.f32.mrf.mxu3 }
 0x21f   : > { %v1226_v36 = vadd.f32 %v1225_v46, %v8670_v6  ;;  %v1139_v6 = vadd.f32 %v8834_v43, %v8672_v47  ;;  %v7756_v47 = vld [vmem:[%s8213_s18 + $0xe4] sm:$0xf0]  ;;  %v7869_v43 = vld [vmem:[%s10091_s1 + $0x2e0] sm:$0xff] }
 0x220   : > { %v1638_v56 = vpop.f32.mrf.mxu0  ;;  %3257 = vmatpush.bf16.msrb.mxu3 %v7869_v43 }
 0x221   : > { %v8941_v14 = vadd.f32 %v1726_v50, %v1226_v36  ;;  %v6405_v50 = vor.u32 %v7785_v9, %v6402_v54  ;;  %v8958_v1 = vpop.f32.mrf.mxu2  ;;  %v6216_v36 = vld [vmem:[%s8213_s18 + $0xe0] sm:$0xf]  ;;  %v7739_v54 = vld [vmem:[%s8213_s18 + $0x64] sm:$0xf] }
 0x222   : > { %v1727_v51 = vpop.f32.mrf.mxu1  ;;  %v7917_v9 = vld [vmem:[%s10091_s1 + $0x360] sm:$0xff] }
 0x223   : > { %v1728_v11 = vadd.f32 %v1727_v51, %v1638_v56  ;;  %v6217_v56 = vor.u32 %v7756_v47, %v6216_v36  ;;  %3788 = vmatpush.bf16.msrb.mxu1 %v7917_v9 }
 0x226   : > { %v1227_v32 = vpop.f32.mrf.mxu3  ;;  %2176 = vmatmul.bf16.gmra.mxu2 %v6217_v56 }
 0x227   : > { %v1228_v2 = vadd.f32 %v1227_v32, %v1139_v6  ;;  %v7909_v6 = vld [vmem:[%s10091_s1 + $0x320] sm:$0xff]  ;;  %v6154_v32 = vld [vmem:[%s8213_s18 + $0x68] sm:$0xf0] }
 0x228   : > { %v1641_v40 = vpop.f32.mrf.mxu0  ;;  %3699 = vmatpush.bf16.msrb.mxu0 %v7909_v6 }
 0x229   : > { %v8956_v12 = vadd.f32 %v1728_v11, %v1228_v2  ;;  %v8968_v5 = vpop.f32.mrf.mxu2  ;;  %v6408_v2 = vld [vmem:[%s8213_s18 + $0x180] sm:$0xf] }
 0x22a   : > { %v1730_v29 = vpop.f32.mrf.mxu1 }
 0x22b   : > { %v1731_v46 = vadd.f32 %v1730_v29, %v1641_v40  ;;  %2220 = vmatmul.bf16.gmra.mxu3 %v6149_v58  ;;  %2662 = vmatmul.bf16.gmra.mxu0 %v6401_v38  ;;  %v7788_v58 = vld [vmem:[%s8213_s18 + $0x184] sm:$0xf0]  ;;  %v6410_v38 = vld [vmem:[%s8213_s18 + $0x188] sm:$0xf0]  ;;  %v6157_v29 = vor.u32 %v7739_v54, %v6154_v32 }
 0x22d   : > { %2751 = vmatmul.bf16.gmra.mxu1 %v6405_v50 }
 0x22e   : > { %v1230_v51 = vpop.f32.mrf.mxu3 }
 0x22f   : > { %v1231_v11 = vadd.f32 %v1230_v51, %v8591_v28  ;;  %v7787_v28 = vld [vmem:[%s8213_s18 + $0x184] sm:$0xf] }
 0x230   : > { %v1643_v49 = vpop.f32.mrf.mxu0  ;;  %v6413_v47 = vor.u32 %v7787_v28, %v6410_v38  ;;  %v7857_v28 = vld [vmem:[%s10091_s1 + $0x280] sm:$0xff]  ;;  %v7741_v38 = vld [vmem:[%s8213_s18 + $0x74] sm:$0xf] }
 0x231   : > { %v8966_v4 = vadd.f32 %v1731_v46, %v1231_v11  ;;  %v6409_v46 = vor.u32 %v7788_v58, %v6408_v2  ;;  %v8985_v51 = vpop.f32.mrf.mxu2  ;;  %3172 = vmatpush.bf16.msra.mxu2 %v7857_v28  ;;  %v7760_v28 = vld [vmem:[%s8213_s18 + $0x104] sm:$0xf0] }
 0x232   : > { %v1732_v45 = vpop.f32.mrf.mxu1 }
 0x233   : > { %v1733_v0 = vadd.f32 %v1732_v45, %v1643_v49  ;;  %v6224_v49 = vld [vmem:[%s8213_s18 + $0xf0] sm:$0xf]  ;;  %v7758_v45 = vld [vmem:[%s8213_s18 + $0xf4] sm:$0xf0] }
 0x236   : > { %v1232_v40 = vpop.f32.mrf.mxu3 }
 0x237   : > { %v1233_v50 = vadd.f32 %v1232_v40, %v8615_v59  ;;  %v6225_v59 = vor.u32 %v7758_v45, %v6224_v49  ;;  %v6162_v40 = vld [vmem:[%s8213_s18 + $0x78] sm:$0xf0] }
 0x238   : > { %v1646_v36 = vpop.f32.mrf.mxu0 }
 0x239   : > { %v8983_v43 = vadd.f32 %v1733_v0, %v1233_v50  ;;  %2181 = vmatmul.bf16.gmra.mxu2 %v6225_v59  ;;  %v8992_v2 = vpop.f32.mrf.mxu2  ;;  %v6416_v50 = vld [vmem:[%s8213_s18 + $0x190] sm:$0xf] }
 0x23a   : > { %v1735_v56 = vpop.f32.mrf.mxu1 }
 0x23b   : > { %v1736_v11 = vadd.f32 %v1735_v56, %v1646_v36  ;;  %2225 = vmatmul.bf16.gmra.mxu3 %v6157_v29  ;;  %2667 = vmatmul.bf16.gmra.mxu0 %v6409_v46  ;;  %v7790_v29 = vld [vmem:[%s8213_s18 + $0x194] sm:$0xf0]  ;;  %v7789_v46 = vld [vmem:[%s8213_s18 + $0x194] sm:$0xf]  ;;  %v6165_v56 = vor.u32 %v7741_v38, %v6162_v40 }
 0x23d   : > { %2756 = vmatmul.bf16.gmra.mxu1 %v6413_v47 }
 0x23e   : > { %v1235_v6 = vpop.f32.mrf.mxu3 }
 0x23f   : > { %v1236_v0 = vadd.f32 %v1235_v6, %v8618_v30  ;;  %v6418_v30 = vld [vmem:[%s8213_s18 + $0x198] sm:$0xf0] }
 0x240   : > { %v1648_v9 = vpop.f32.mrf.mxu0  ;;  %v6421_v45 = vor.u32 %v7789_v46, %v6418_v30 }
 0x241   : > { %v8990_v54 = vadd.f32 %v1736_v11, %v1236_v0  ;;  %v6417_v11 = vor.u32 %v7790_v29, %v6416_v50  ;;  %v9006_v0 = vpop.f32.mrf.mxu2 }
 0x242   : > { %v1737_v32 = vpop.f32.mrf.mxu1 }
 0x243   : > { %v1738_v58 = vadd.f32 %v1737_v32, %v1648_v9  ;;  %v6232_v32 = vld [vmem:[%s8213_s18 + $0x100] sm:$0xf] }
 0x244   : > { %v6233_v38 = vor.u32 %v7760_v28, %v6232_v32 }
 0x246   : > { %v1237_v36 = vpop.f32.mrf.mxu3 }
 0x247   : > { %v1238_v47 = vadd.f32 %v1237_v36, %v8633_v41  ;;  %v7868_v41 = vld [vmem:[%s10091_s1 + $0x2d8] sm:$0xff] }
 0x248   : > { %v1651_v49 = vpop.f32.mrf.mxu0  ;;  %3258 = vmatpush.bf16.msrb.mxu3 %v7868_v41 }
 0x249   : > { %v9004_v59 = vadd.f32 %v1738_v58, %v1238_v47  ;;  %2186 = vmatmul.bf16.gmra.mxu2 %v6233_v38  ;;  %v9016_v30 = vpop.f32.mrf.mxu2  ;;  %v7908_v47 = vld [vmem:[%s10091_s1 + $0x318] sm:$0xff] }
 0x24a   : > { %v1740_v6 = vpop.f32.mrf.mxu1  ;;  %3700 = vmatpush.bf16.msrb.mxu0 %v7908_v47  ;;  %v6624_v47 = vld [vmem:[%s8213_s18 + $0x250] sm:$0xf] }
 0x24b   : > { %10097 = vst [vmem:[#allocation2_spill] sm:$0xff] %v9004_v59  ;;  %v1741_v9 = vadd.f32 %v1740_v6, %v1651_v49  ;;  %2230 = vmatmul.bf16.gmra.mxu3 %v6165_v56  ;;  %2672 = vmatmul.bf16.gmra.mxu0 %v6417_v11  ;;  %v7916_v56 = vld [vmem:[%s10091_s1 + $0x358] sm:$0xff]  ;;  %v7743_v11 = vld [vmem:[%s8213_s18 + $0x84] sm:$0xf]  ;;  %v6170_v49 = vld [vmem:[%s8213_s18 + $0x88] sm:$0xf0] }
 0x24c   : > { %v7792_v6 = vld [vmem:[%s8213_s18 + $0x1a4] sm:$0xf0]  ;;  %3789 = vmatpush.bf16.msrb.mxu1 %v7916_v56  ;;  %v6173_v41 = vor.u32 %v7743_v11, %v6170_v49  ;;  %v7826_v56 = vld [vmem:[%s8213_s18 + $0x254] sm:$0xf0] }
 0x24d   : > { %2761 = vmatmul.bf16.gmra.mxu1 %v6421_v45  ;;  %v6424_v45 = vld [vmem:[%s8213_s18 + $0x1a0] sm:$0xf] }
 0x24e   : > { %v1240_v58 = vpop.f32.mrf.mxu3  ;;  %v6425_v38 = vor.u32 %v7792_v6, %v6424_v45 }
 0x24f   : > { %v1241_v40 = vadd.f32 %v1240_v58, %v8642_v3  ;;  %v7791_v3 = vld [vmem:[%s8213_s18 + $0x1a4] sm:$0xf] }
 0x250   : > { %v1653_v50 = vpop.f32.mrf.mxu0 }
 0x251   : > { %v9014_v29 = vadd.f32 %v1741_v9, %v1241_v40  ;;  %v6426_v9 = vld [vmem:[%s8213_s18 + $0x1a8] sm:$0xf0] }
 0x252   : > { %v1742_v46 = vpop.f32.mrf.mxu1  ;;  %v6429_v40 = vor.u32 %v7791_v3, %v6426_v9 }
 0x253   : > { %10098 = vst [vmem:[#allocation3_spill] sm:$0xff] %v9014_v29  ;;  %v1743_v36 = vadd.f32 %v1742_v46, %v1653_v50  ;;  %v9033_v29 = vpop.f32.mrf.mxu2 }
 0x256   : > { %v1242_v32 = vpop.f32.mrf.mxu3 }
 0x257   : > { %v1243_v28 = vadd.f32 %v1242_v32, %v8663_v33  ;;  %v6625_v33 = vor.u32 %v7826_v56, %v6624_v47  ;;  %v7960_v32 = vld [vmem:[%s10091_s1 + $0x3b8] sm:$0xff] }
 0x258   : > { %v1656_v58 = vpop.f32.mrf.mxu0  ;;  %4227 = vmatpush.bf16.msrb.mxu2 %v7960_v32  ;;  %v7828_v32 = vld [vmem:[%s8213_s18 + $0x264] sm:$0xf0] }
 0x259   : > { %v9031_v50 = vadd.f32 %v1743_v36, %v1243_v28  ;;  %3173 = vmatmul.bf16.vlgmr.msra.gmra.mxu2 %v6625_v33  ;;  %v7745_v28 = vld [vmem:[%s8213_s18 + $0x94] sm:$0xf] }
 0x25a   : > { %v1745_v46 = vpop.f32.mrf.mxu1 }
 0x25b   : > { %10099 = vst [vmem:[#allocation4_spill] sm:$0xff] %v9031_v50  ;;  %v1746_v59 = vadd.f32 %v1745_v46, %v1656_v58  ;;  %2235 = vmatmul.bf16.gmra.mxu3 %v6173_v41  ;;  %2677 = vmatmul.bf16.gmra.mxu0 %v6425_v38  ;;  %v9040_v3 = vpop.f32.mrf.mxu2  ;;  %v6178_v41 = vld [vmem:[%s8213_s18 + $0x98] sm:$0xf0]  ;;  %v6432_v38 = vld [vmem:[%s8213_s18 + $0x1b0] sm:$0xf] }
 0x25c   : > { %v7794_v58 = vld [vmem:[%s8213_s18 + $0x1b4] sm:$0xf0]  ;;  %v6181_v47 = vor.u32 %v7745_v28, %v6178_v41  ;;  %v6632_v50 = vld [vmem:[%s8213_s18 + $0x260] sm:$0xf] }
 0x25d   : > { %2766 = vmatmul.bf16.gmra.mxu1 %v6429_v40  ;;  %v7793_v40 = vld [vmem:[%s8213_s18 + $0x1b4] sm:$0xf]  ;;  %v6433_v56 = vor.u32 %v7794_v58, %v6432_v38  ;;  %v6633_v28 = vor.u32 %v7828_v32, %v6632_v50 }
 0x25e   : > { %v1245_v11 = vpop.f32.mrf.mxu3  ;;  %v7915_v50 = vld [vmem:[%s10091_s1 + $0x350] sm:$0xff] }
 0x25f   : > { %v1246_v36 = vadd.f32 %v1245_v11, %v8668_v55  ;;  %v6434_v55 = vld [vmem:[%s8213_s18 + $0x1b8] sm:$0xf0]  ;;  %3790 = vmatpush.bf16.msrb.mxu1 %v7915_v50  ;;  %v7830_v50 = vld [vmem:[%s8213_s18 + $0x274] sm:$0xf0] }
 0x260   : > { %v1658_v49 = vpop.f32.mrf.mxu0  ;;  %v6437_v11 = vor.u32 %v7793_v40, %v6434_v55 }
 0x261   : > { %v9038_v45 = vadd.f32 %v1746_v59, %v1246_v36 }
 0x262   : > { %v1747_v6 = vpop.f32.mrf.mxu1 }
 0x263   : > { %10100 = vst [vmem:[#allocation5_spill] sm:$0xff] %v9038_v45  ;;  %v1748_v9 = vadd.f32 %v1747_v6, %v1658_v49  ;;  %v9054_v6 = vpop.f32.mrf.mxu2 }
 0x266   : > { %v1247_v46 = vpop.f32.mrf.mxu3 }
 0x267   : > { %v1248_v59 = vadd.f32 %v1247_v46, %v8684_v39  ;;  %v7867_v39 = vld [vmem:[%s10091_s1 + $0x2d0] sm:$0xff] }
 0x268   : > { %v2643_v33 = vpop.f32.mrf.mxu0  ;;  %3259 = vmatpush.bf16.msrb.mxu3 %v7867_v39 }
 0x269   : > { %v9052_v36 = vadd.f32 %v1748_v9, %v1248_v59  ;;  %3178 = vmatmul.bf16.gmra.mxu2 %v6633_v28  ;;  %v7907_v59 = vld [vmem:[%s10091_s1 + $0x310] sm:$0xff] }
 0x26a   : > { %v2732_v49 = vpop.f32.mrf.mxu1  ;;  %3701 = vmatpush.bf16.msrb.mxu0 %v7907_v59  ;;  %v6640_v59 = vld [vmem:[%s8213_s18 + $0x270] sm:$0xf] }
 0x26b   : > { %10101 = vst [vmem:[#allocation6_spill] sm:$0xff] %v9052_v36  ;;  %v2733_v45 = vadd.f32 %v2732_v49, %v2643_v33  ;;  %2240 = vmatmul.bf16.gmra.mxu3 %v6181_v47  ;;  %2682 = vmatmul.bf16.gmra.mxu0 %v6433_v56  ;;  %v9063_v55 = vpop.f32.mrf.mxu2  ;;  %v7747_v47 = vld [vmem:[%s8213_s18 + $0xa4] sm:$0xf]  ;;  %v6440_v33 = vld [vmem:[%s8213_s18 + $0x1c0] sm:$0xf] }
 0x26c   : > { %v6442_v49 = vld [vmem:[%s8213_s18 + $0x1c8] sm:$0xf0] }
 0x26d   : > { %2771 = vmatmul.bf16.gmra.mxu1 %v6437_v11  ;;  %v7796_v11 = vld [vmem:[%s8213_s18 + $0x1c4] sm:$0xf0] }
 0x26e   : > { %v2201_v9 = vpop.f32.mrf.mxu3 }
 0x26f   : > { %v2202_v41 = vadd.f32 %v2201_v9, %v8843_v53  ;;  %v6186_v53 = vld [vmem:[%s8213_s18 + $0xa8] sm:$0xf0]  ;;  %v6441_v9 = vor.u32 %v7796_v11, %v6440_v33 }
 0x270   : > { %v2645_v38 = vpop.f32.mrf.mxu0  ;;  %v6189_v28 = vor.u32 %v7747_v47, %v6186_v53 }
 0x271   : > { %v2281_v58 = vadd.f32 %v2202_v41, %v8692_v21  ;;  %v7795_v21 = vld [vmem:[%s8213_s18 + $0x1c4] sm:$0xf] }
 0x272   : > { %v2734_v40 = vpop.f32.mrf.mxu1 }
 0x273   : > { %v2735_v46 = vadd.f32 %v2734_v40, %v2645_v38  ;;  %v9072_v56 = vadd.f32 %v2733_v45, %v2281_v58  ;;  %v6445_v38 = vor.u32 %v7795_v21, %v6442_v49  ;;  %v9081_v58 = vpop.f32.mrf.mxu2 }
 0x275   : > { %10102 = vst [vmem:[#allocation7_spill] sm:$0xff] %v9072_v56 }
 0x276   : > { %v2203_v32 = vpop.f32.mrf.mxu3 }
 0x277   : > { %v2204_v39 = vadd.f32 %v2203_v32, %v8858_v24  ;;  %v6641_v24 = vor.u32 %v7830_v50, %v6640_v59  ;;  %v7749_v32 = vld [vmem:[%s8213_s18 + $0xb4] sm:$0xf] }
 0x278   : > { %v2648_v41 = vpop.f32.mrf.mxu0 }
 0x279   : > { %v2282_v40 = vadd.f32 %v2204_v39, %v8708_v35  ;;  %3183 = vmatmul.bf16.gmra.mxu2 %v6641_v24 }
 0x27a   : > { %v2737_v45 = vpop.f32.mrf.mxu1 }
 0x27b   : > { %v2738_v56 = vadd.f32 %v2737_v45, %v2648_v41  ;;  %2245 = vmatmul.bf16.gmra.mxu3 %v6189_v28  ;;  %2687 = vmatmul.bf16.gmra.mxu0 %v6441_v9  ;;  %v9085_v36 = vadd.f32 %v2735_v46, %v2282_v40  ;;  %v9089_v21 = vpop.f32.mrf.mxu2  ;;  %v7959_v46 = vld [vmem:[%s10091_s1 + $0x3b0] sm:$0xff]  ;;  %v6194_v28 = vld [vmem:[%s8213_s18 + $0xb8] sm:$0xf0]  ;;  %v7798_v41 = vld [vmem:[%s8213_s18 + $0x1d4] sm:$0xf0] }
 0x27c   : > { %v6448_v9 = vld [vmem:[%s8213_s18 + $0x1d0] sm:$0xf]  ;;  %4228 = vmatpush.bf16.msrb.mxu2 %v7959_v46  ;;  %v6197_v45 = vor.u32 %v7749_v32, %v6194_v28 }
 0x27d   : > { %2776 = vmatmul.bf16.gmra.mxu1 %v6445_v38  ;;  %v6450_v38 = vld [vmem:[%s8213_s18 + $0x1d8] sm:$0xf0]  ;;  %v6449_v59 = vor.u32 %v7798_v41, %v6448_v9 }
 0x27e   : > { %v2206_v47 = vpop.f32.mrf.mxu3 }
 0x27f   : > { %v2207_v35 = vadd.f32 %v2206_v47, %v8868_v44  ;;  %v7797_v44 = vld [vmem:[%s8213_s18 + $0x1d4] sm:$0xf] }
 0x280   : > { %v2650_v53 = vpop.f32.mrf.mxu0  ;;  %v6453_v24 = vor.u32 %v7797_v44, %v6450_v38 }
 0x281   : > { %v2283_v33 = vadd.f32 %v2207_v35, %v8713_v16 }
 0x282   : > { %v2739_v11 = vpop.f32.mrf.mxu1 }
 0x283   : > { %v2740_v49 = vadd.f32 %v2739_v11, %v2650_v53  ;;  %v9095_v39 = vadd.f32 %v2738_v56, %v2283_v33  ;;  %v9104_v56 = vpop.f32.mrf.mxu2  ;;  %v6648_v33 = vld [vmem:[%s8213_s18 + $0x280] sm:$0xf]  ;;  %v7832_v11 = vld [vmem:[%s8213_s18 + $0x284] sm:$0xf0] }
 0x284   : > { %v6649_v32 = vor.u32 %v7832_v11, %v6648_v33 }
 0x286   : > { %v2208_v16 = vpop.f32.mrf.mxu3 }
 0x287   : > { %v2209_v40 = vadd.f32 %v2208_v16, %v8886_v61  ;;  %v7866_v61 = vld [vmem:[%s10091_s1 + $0x2c8] sm:$0xff] }
 0x288   : > { %v2653_v50 = vpop.f32.mrf.mxu0  ;;  %3260 = vmatpush.bf16.msrb.mxu3 %v7866_v61  ;;  %v7906_v16 = vld [vmem:[%s10091_s1 + $0x308] sm:$0xff] }
 0x289   : > { %v2284_v47 = vadd.f32 %v2209_v40, %v8726_v13  ;;  %3188 = vmatmul.bf16.gmra.mxu2 %v6649_v32  ;;  %v7914_v40 = vld [vmem:[%s10091_s1 + $0x348] sm:$0xff]  ;;  %3702 = vmatpush.bf16.msrb.mxu0 %v7906_v16  ;;  %v7834_v16 = vld [vmem:[%s8213_s18 + $0x294] sm:$0xf0] }
 0x28a   : > { %v2742_v35 = vpop.f32.mrf.mxu1  ;;  %3791 = vmatpush.bf16.msrb.mxu1 %v7914_v40 }
 0x28b   : > { %v2743_v53 = vadd.f32 %v2742_v35, %v2653_v50  ;;  %2250 = vmatmul.bf16.gmra.mxu3 %v6197_v45  ;;  %2692 = vmatmul.bf16.gmra.mxu0 %v6449_v59  ;;  %v9108_v46 = vadd.f32 %v2740_v49, %v2284_v47  ;;  %v9115_v44 = vpop.f32.mrf.mxu2  ;;  %v7751_v45 = vld [vmem:[%s8213_s18 + $0xc4] sm:$0xf]  ;;  %v6456_v50 = vld [vmem:[%s8213_s18 + $0x1e0] sm:$0xf]  ;;  %v6458_v47 = vld [vmem:[%s8213_s18 + $0x1e8] sm:$0xf0] }
 0x28d   : > { %2781 = vmatmul.bf16.gmra.mxu1 %v6453_v24  ;;  %v7800_v24 = vld [vmem:[%s8213_s18 + $0x1e4] sm:$0xf0] }
 0x28e   : > { %v2211_v13 = vpop.f32.mrf.mxu3  ;;  %v6457_v61 = vor.u32 %v7800_v24, %v6456_v50 }
 0x28f   : > { %v2212_v28 = vadd.f32 %v2211_v13, %v8893_v57  ;;  %v6202_v57 = vld [vmem:[%s8213_s18 + $0xc8] sm:$0xf0] }
 0x290   : > { %v2655_v9 = vpop.f32.mrf.mxu0  ;;  %v6205_v11 = vor.u32 %v7751_v45, %v6202_v57 }
 0x291   : > { %v2285_v49 = vadd.f32 %v2212_v28, %v8734_v17  ;;  %v7799_v17 = vld [vmem:[%s8213_s18 + $0x1e4] sm:$0xf] }
 0x292   : > { %v2744_v41 = vpop.f32.mrf.mxu1  ;;  %v6461_v13 = vor.u32 %v7799_v17, %v6458_v47 }
 0x293   : > { %v2745_v38 = vadd.f32 %v2744_v41, %v2655_v9  ;;  %v9124_v59 = vadd.f32 %v2743_v53, %v2285_v49  ;;  %v9133_v9 = vpop.f32.mrf.mxu2  ;;  %v6656_v41 = vld [vmem:[%s8213_s18 + $0x290] sm:$0xf] }
 0x296   : > { %v2213_v35 = vpop.f32.mrf.mxu3 }
 0x297   : > { %v2214_v33 = vadd.f32 %v2213_v35, %v8908_v34  ;;  %v6657_v34 = vor.u32 %v7834_v16, %v6656_v41  ;;  %v7753_v35 = vld [vmem:[%s8213_s18 + $0xd4] sm:$0xf] }
 0x298   : > { %v2658_v32 = vpop.f32.mrf.mxu0 }
 0x299   : > { %v2286_v28 = vadd.f32 %v2214_v33, %v8750_v62  ;;  %3193 = vmatmul.bf16.gmra.mxu2 %v6657_v34 }
 0x29a   : > { %v2747_v53 = vpop.f32.mrf.mxu1 }
 0x29b   : > { %v2748_v49 = vadd.f32 %v2747_v53, %v2658_v32  ;;  %2255 = vmatmul.bf16.gmra.mxu3 %v6205_v11  ;;  %2697 = vmatmul.bf16.gmra.mxu0 %v6457_v61  ;;  %v9137_v40 = vadd.f32 %v2745_v38, %v2286_v28  ;;  %v9141_v17 = vpop.f32.mrf.mxu2  ;;  %v7958_v38 = vld [vmem:[%s10091_s1 + $0x3a8] sm:$0xff]  ;;  %v6210_v11 = vld [vmem:[%s8213_s18 + $0xd8] sm:$0xf0]  ;;  %v6464_v61 = vld [vmem:[%s8213_s18 + $0x1f0] sm:$0xf] }
 0x29c   : > { %v7802_v32 = vld [vmem:[%s8213_s18 + $0x1f4] sm:$0xf0]  ;;  %4229 = vmatpush.bf16.msrb.mxu2 %v7958_v38  ;;  %v6213_v53 = vor.u32 %v7753_v35, %v6210_v11 }
 0x29d   : > { %2786 = vmatmul.bf16.gmra.mxu1 %v6461_v13  ;;  %v6466_v13 = vld [vmem:[%s8213_s18 + $0x1f8] sm:$0xf0]  ;;  %v6465_v41 = vor.u32 %v7802_v32, %v6464_v61 }
 0x29e   : > { %v2216_v45 = vpop.f32.mrf.mxu3 }
 0x29f   : > { %v2217_v62 = vadd.f32 %v2216_v45, %v8918_v19  ;;  %v7801_v19 = vld [vmem:[%s8213_s18 + $0x1f4] sm:$0xf] }
 0x2a0   : > { %v2660_v57 = vpop.f32.mrf.mxu0  ;;  %v6469_v34 = vor.u32 %v7801_v19, %v6466_v13 }
 0x2a1   : > { %v2287_v50 = vadd.f32 %v2217_v62, %v8755_v23 }
 0x2a2   : > { %v2749_v24 = vpop.f32.mrf.mxu1 }
 0x2a3   : > { %v2750_v47 = vadd.f32 %v2749_v24, %v2660_v57  ;;  %v9147_v33 = vadd.f32 %v2748_v49, %v2287_v50  ;;  %v9156_v49 = vpop.f32.mrf.mxu2  ;;  %v6664_v50 = vld [vmem:[%s8213_s18 + $0x2a0] sm:$0xf]  ;;  %v7836_v24 = vld [vmem:[%s8213_s18 + $0x2a4] sm:$0xf0] }
 0x2a4   : > { %v6665_v35 = vor.u32 %v7836_v24, %v6664_v50 }
 0x2a6   : > { %v2218_v23 = vpop.f32.mrf.mxu3 }
 0x2a7   : > { %v2219_v28 = vadd.f32 %v2218_v23, %v8936_v52  ;;  %v7865_v52 = vld [vmem:[%s10091_s1 + $0x2c0] sm:$0xff] }
 0x2a8   : > { %v2663_v16 = vpop.f32.mrf.mxu0  ;;  %3261 = vmatpush.bf16.msrb.mxu3 %v7865_v52  ;;  %v7905_v23 = vld [vmem:[%s10091_s1 + $0x300] sm:$0xff] }
 0x2a9   : > { %v2288_v45 = vadd.f32 %v2219_v28, %v8768_v60  ;;  %3198 = vmatmul.bf16.gmra.mxu2 %v6665_v35  ;;  %v7913_v28 = vld [vmem:[%s10091_s1 + $0x340] sm:$0xff]  ;;  %3703 = vmatpush.bf16.msrb.mxu0 %v7905_v23  ;;  %v7838_v23 = vld [vmem:[%s8213_s18 + $0x2b4] sm:$0xf0] }
 0x2aa   : > { %v2752_v62 = vpop.f32.mrf.mxu1  ;;  %3792 = vmatpush.bf16.msrb.mxu1 %v7913_v28 }
 0x2ab   : > { %v2753_v57 = vadd.f32 %v2752_v62, %v2663_v16  ;;  %2260 = vmatmul.bf16.gmra.mxu3 %v6213_v53  ;;  %2702 = vmatmul.bf16.gmra.mxu0 %v6465_v41  ;;  %v9160_v38 = vadd.f32 %v2750_v47, %v2288_v45  ;;  %v9167_v19 = vpop.f32.mrf.mxu2  ;;  %v7755_v53 = vld [vmem:[%s8213_s18 + $0xe4] sm:$0xf]  ;;  %v6472_v16 = vld [vmem:[%s8213_s18 + $0x200] sm:$0xf]  ;;  %v6474_v45 = vld [vmem:[%s8213_s18 + $0x208] sm:$0xf0] }
 0x2ad   : > { %2791 = vmatmul.bf16.gmra.mxu1 %v6469_v34  ;;  %v7804_v34 = vld [vmem:[%s8213_s18 + $0x204] sm:$0xf0] }
 0x2ae   : > { %v2221_v60 = vpop.f32.mrf.mxu3  ;;  %v6473_v52 = vor.u32 %v7804_v34, %v6472_v16 }
 0x2af   : > { %v2222_v11 = vadd.f32 %v2221_v60, %v8943_v8  ;;  %v6218_v8 = vld [vmem:[%s8213_s18 + $0xe8] sm:$0xf0] }
 0x2b0   : > { %v2665_v61 = vpop.f32.mrf.mxu0  ;;  %v6221_v24 = vor.u32 %v7755_v53, %v6218_v8 }
 0x2b1   : > { %v2289_v47 = vadd.f32 %v2222_v11, %v8776_v15  ;;  %v7803_v15 = vld [vmem:[%s8213_s18 + $0x204] sm:$0xf] }
 0x2b2   : > { %v2754_v32 = vpop.f32.mrf.mxu1  ;;  %v6477_v60 = vor.u32 %v7803_v15, %v6474_v45 }
 0x2b3   : > { %v2755_v13 = vadd.f32 %v2754_v32, %v2665_v61  ;;  %v9176_v41 = vadd.f32 %v2753_v57, %v2289_v47  ;;  %v9185_v61 = vpop.f32.mrf.mxu2  ;;  %v6672_v32 = vld [vmem:[%s8213_s18 + $0x2b0] sm:$0xf] }
 0x2b6   : > { %v2223_v62 = vpop.f32.mrf.mxu3 }
 0x2b7   : > { %v2224_v50 = vadd.f32 %v2223_v62, %v8958_v1  ;;  %v6673_v1 = vor.u32 %v7838_v23, %v6672_v32  ;;  %v7757_v62 = vld [vmem:[%s8213_s18 + $0xf4] sm:$0xf] }
 0x2b8   : > { %v2668_v35 = vpop.f32.mrf.mxu0 }
 0x2b9   : > { %v2290_v11 = vadd.f32 %v2224_v50, %v8792_v27  ;;  %3203 = vmatmul.bf16.gmra.mxu2 %v6673_v1 }
 0x2ba   : > { %v2757_v57 = vpop.f32.mrf.mxu1 }
 0x2bb   : > { %v2758_v47 = vadd.f32 %v2757_v57, %v2668_v35  ;;  %2265 = vmatmul.bf16.gmra.mxu3 %v6221_v24  ;;  %2707 = vmatmul.bf16.gmra.mxu0 %v6473_v52  ;;  %v9189_v28 = vadd.f32 %v2755_v13, %v2290_v11  ;;  %v7957_v13 = vld [vmem:[%s10091_s1 + $0x3a0] sm:$0xff]  ;;  %v6226_v24 = vld [vmem:[%s8213_s18 + $0xf8] sm:$0xf0]  ;;  %v6480_v52 = vld [vmem:[%s8213_s18 + $0x210] sm:$0xf] }
 0x2bc   : > { %v9193_v15 = vpop.f32.mrf.mxu2  ;;  %v7806_v35 = vld [vmem:[%s8213_s18 + $0x214] sm:$0xf0]  ;;  %4230 = vmatpush.bf16.msrb.mxu2 %v7957_v13  ;;  %v6229_v57 = vor.u32 %v7757_v62, %v6226_v24 }
 0x2bd   : > { %2796 = vmatmul.bf16.gmra.mxu1 %v6477_v60  ;;  %v6482_v60 = vld [vmem:[%s8213_s18 + $0x218] sm:$0xf0]  ;;  %v6481_v32 = vor.u32 %v7806_v35, %v6480_v52 }
 0x2be   : > { %v2226_v53 = vpop.f32.mrf.mxu3 }
 0x2bf   : > { %v2227_v27 = vadd.f32 %v2226_v53, %v8968_v5  ;;  %v7805_v5 = vld [vmem:[%s8213_s18 + $0x214] sm:$0xf] }
 0x2c0   : > { %v2670_v8 = vpop.f32.mrf.mxu0  ;;  %v6485_v1 = vor.u32 %v7805_v5, %v6482_v60 }
 0x2c1   : > { %v2291_v16 = vadd.f32 %v2227_v27, %v8797_v42 }
 0x2c2   : > { %v2759_v34 = vpop.f32.mrf.mxu1 }
 0x2c3   : > { %v2760_v45 = vadd.f32 %v2759_v34, %v2670_v8  ;;  %v9199_v50 = vadd.f32 %v2758_v47, %v2291_v16  ;;  %v6680_v16 = vld [vmem:[%s8213_s18 + $0x2c0] sm:$0xf]  ;;  %v7840_v34 = vld [vmem:[%s8213_s18 + $0x2c4] sm:$0xf0] }
 0x2c4   : > { %v9208_v47 = vpop.f32.mrf.mxu2  ;;  %v6681_v62 = vor.u32 %v7840_v34, %v6680_v16 }
 0x2c6   : > { %v2228_v42 = vpop.f32.mrf.mxu3 }
 0x2c7   : > { %v2229_v11 = vadd.f32 %v2228_v42, %v8985_v51  ;;  %v7968_v51 = vld [vmem:[%s10091_s1 + $0x3f8] sm:$0xff] }
 0x2c8   : > { %v2673_v23 = vpop.f32.mrf.mxu0  ;;  %4316 = vmatpush.bf16.msra.mxu3 %v7968_v51  ;;  %v8008_v42 = vld [vmem:[%s10091_s1 + $0x438] sm:$0xff] }
 0x2c9   : > { %v2292_v53 = vadd.f32 %v2229_v11, %v8810_v22  ;;  %3208 = vmatmul.bf16.gmra.mxu2 %v6681_v62  ;;  %v8016_v11 = vld [vmem:[%s10091_s1 + $0x478] sm:$0xff]  ;;  %4758 = vmatpush.bf16.msra.mxu0 %v8008_v42 }
 0x2ca   : > { %v2762_v27 = vpop.f32.mrf.mxu1  ;;  %4847 = vmatpush.bf16.msra.mxu1 %v8016_v11  ;;  %v7842_v42 = vld [vmem:[%s8213_s18 + $0x2d4] sm:$0xf0] }
 0x2cb   : > { %v2763_v8 = vadd.f32 %v2762_v27, %v2673_v23  ;;  %2270 = vmatmul.bf16.gmra.mxu3 %v6229_v57  ;;  %2712 = vmatmul.bf16.gmra.mxu0 %v6481_v32  ;;  %v9212_v13 = vadd.f32 %v2760_v45, %v2292_v53  ;;  %v7759_v57 = vld [vmem:[%s8213_s18 + $0x104] sm:$0xf]  ;;  %v6488_v23 = vld [vmem:[%s8213_s18 + $0x220] sm:$0xf]  ;;  %v6490_v53 = vld [vmem:[%s8213_s18 + $0x228] sm:$0xf0] }
 0x2cc   : > { %v9219_v5 = vpop.f32.mrf.mxu2 }
 0x2cd   : > { %2801 = vmatmul.bf16.gmra.mxu1 %v6485_v1  ;;  %v7808_v1 = vld [vmem:[%s8213_s18 + $0x224] sm:$0xf0] }
 0x2ce   : > { %v2231_v22 = vpop.f32.mrf.mxu3  ;;  %v6489_v51 = vor.u32 %v7808_v1, %v6488_v23 }
 0x2cf   : > { %v2232_v24 = vadd.f32 %v2231_v22, %v8992_v2  ;;  %v6234_v2 = vld [vmem:[%s8213_s18 + $0x108] sm:$0xf0] }
 0x2d0   : > { %v2675_v52 = vpop.f32.mrf.mxu0  ;;  %v6237_v34 = vor.u32 %v7759_v57, %v6234_v2 }
 0x2d1   : > { %v2293_v45 = vadd.f32 %v2232_v24, %v8818_v20  ;;  %v7807_v20 = vld [vmem:[%s8213_s18 + $0x224] sm:$0xf] }
 0x2d2   : > { %v2764_v35 = vpop.f32.mrf.mxu1  ;;  %v6493_v22 = vor.u32 %v7807_v20, %v6490_v53 }
 0x2d3   : > { %v2765_v60 = vadd.f32 %v2764_v35, %v2675_v52  ;;  %v9228_v32 = vadd.f32 %v2763_v8, %v2293_v45  ;;  %v6688_v35 = vld [vmem:[%s8213_s18 + $0x2d0] sm:$0xf] }
 0x2d4   : > { %v9237_v52 = vpop.f32.mrf.mxu2 }
 0x2d6   : > { %v2233_v27 = vpop.f32.mrf.mxu3 }
 0x2d7   : > { %v2234_v16 = vadd.f32 %v2233_v27, %v9006_v0  ;;  %v6689_v0 = vor.u32 %v7842_v42, %v6688_v35  ;;  %v7825_v27 = vld [vmem:[%s8213_s18 + $0x254] sm:$0xf] }
 0x2d8   : > { %v2678_v62 = vpop.f32.mrf.mxu0 }
 0x2d9   : > { %v2294_v24 = vadd.f32 %v2234_v16, %v8836_v10  ;;  %3213 = vmatmul.bf16.gmra.mxu2 %v6689_v0 }
 0x2da   : > { %v2767_v8 = vpop.f32.mrf.mxu1 }
 0x2db   : > { %v2768_v45 = vadd.f32 %v2767_v8, %v2678_v62  ;;  %2275 = vmatmul.bf16.gmra.mxu3 %v6237_v34  ;;  %2717 = vmatmul.bf16.gmra.mxu0 %v6489_v51  ;;  %v9241_v11 = vadd.f32 %v2765_v60, %v2294_v24  ;;  %v7956_v60 = vld [vmem:[%s10091_s1 + $0x398] sm:$0xff]  ;;  %v6848_v51 = vld [vmem:[%s8213_s18 + $0x20] sm:$0xf]  ;;  %v7874_v62 = vld [vmem:[%s8213_s18 + $0x24] sm:$0xf0] }
 0x2dc   : > { %v9245_v20 = vpop.f32.mrf.mxu2  ;;  %v6626_v34 = vld [vmem:[%s8213_s18 + $0x258] sm:$0xf0]  ;;  %4231 = vmatpush.bf16.msrb.mxu2 %v7956_v60  ;;  %v6849_v35 = vor.u32 %v7874_v62, %v6848_v51 }
 0x2dd   : > { %2806 = vmatmul.bf16.gmra.mxu1 %v6493_v22  ;;  %v6850_v22 = vld [vmem:[%s8213_s18 + $0x28] sm:$0xf0]  ;;  %v6629_v8 = vor.u32 %v7825_v27, %v6626_v34 }
 0x2de   : > { %v2236_v57 = vpop.f32.mrf.mxu3 }
 0x2df   : > { %v2237_v10 = vadd.f32 %v2236_v57, %v9016_v30  ;;  %v7873_v30 = vld [vmem:[%s8213_s18 + $0x24] sm:$0xf] }
 0x2e0   : > { %v2680_v2 = vpop.f32.mrf.mxu0  ;;  %v6853_v0 = vor.u32 %v7873_v30, %v6850_v22 }
 0x2e1   : > { %v2295_v23 = vadd.f32 %v2237_v10, %v8841_v31 }
 0x2e2   : > { %v2769_v1 = vpop.f32.mrf.mxu1 }
 0x2e3   : > { %v2770_v53 = vadd.f32 %v2769_v1, %v2680_v2  ;;  %v9251_v16 = vadd.f32 %v2768_v45, %v2295_v23  ;;  %v6696_v23 = vld [vmem:[%s8213_s18 + $0x2e0] sm:$0xf]  ;;  %v7844_v1 = vld [vmem:[%s8213_s18 + $0x2e4] sm:$0xf0] }
 0x2e4   : > { %v9260_v45 = vpop.f32.mrf.mxu2  ;;  %v6697_v27 = vor.u32 %v7844_v1, %v6696_v23 }
 0x2e6   : > { %v2238_v31 = vpop.f32.mrf.mxu3 }
 0x2e7   : > { %v2239_v24 = vadd.f32 %v2238_v31, %v9033_v29  ;;  %v7967_v29 = vld [vmem:[%s10091_s1 + $0x3f0] sm:$0xff] }
 0x2e8   : > { %v2683_v42 = vpop.f32.mrf.mxu0  ;;  %4317 = vmatpush.bf16.msra.mxu3 %v7967_v29  ;;  %v8007_v31 = vld [vmem:[%s10091_s1 + $0x430] sm:$0xff] }
 0x2e9   : > { %v2296_v57 = vadd.f32 %v2239_v24, %v8856_v7  ;;  %3218 = vmatmul.bf16.gmra.mxu2 %v6697_v27  ;;  %v8015_v24 = vld [vmem:[%s10091_s1 + $0x470] sm:$0xff]  ;;  %4759 = vmatpush.bf16.msra.mxu0 %v8007_v31  ;;  %v7846_v31 = vld [vmem:[%s8213_s18 + $0x2f4] sm:$0xf0] }
 0x2ea   : > { %v2772_v10 = vpop.f32.mrf.mxu1  ;;  %4848 = vmatpush.bf16.msra.mxu1 %v8015_v24 }
 0x2eb   : > { %v2773_v2 = vadd.f32 %v2772_v10, %v2683_v42  ;;  %3262 = vmatmul.bf16.vlgmr.msrb.gmra.mxu3 %v6629_v8  ;;  %3704 = vmatmul.bf16.vlgmr.msrb.gmra.mxu0 %v6849_v35  ;;  %v9264_v60 = vadd.f32 %v2770_v53, %v2296_v57  ;;  %v7827_v8 = vld [vmem:[%s8213_s18 + $0x264] sm:$0xf]  ;;  %v6856_v42 = vld [vmem:[%s8213_s18 + $0x30] sm:$0xf]  ;;  %v6858_v57 = vld [vmem:[%s8213_s18 + $0x38] sm:$0xf0] }
 0x2ec   : > { %v9271_v30 = vpop.f32.mrf.mxu2 }
 0x2ed   : > { %3793 = vmatmul.bf16.vlgmr.msrb.gmra.mxu1 %v6853_v0  ;;  %v7876_v0 = vld [vmem:[%s8213_s18 + $0x34] sm:$0xf0] }
 0x2ee   : > { %v2241_v7 = vpop.f32.mrf.mxu3  ;;  %v6857_v29 = vor.u32 %v7876_v0, %v6856_v42 }
 0x2ef   : > { %v2242_v34 = vadd.f32 %v2241_v7, %v9040_v3  ;;  %v6634_v3 = vld [vmem:[%s8213_s18 + $0x268] sm:$0xf0] }
 0x2f0   : > { %v2685_v51 = vpop.f32.mrf.mxu0  ;;  %v6637_v1 = vor.u32 %v7827_v8, %v6634_v3 }
 0x2f1   : > { %v2297_v53 = vadd.f32 %v2242_v34, %v8866_v18  ;;  %v7875_v18 = vld [vmem:[%s8213_s18 + $0x34] sm:$0xf] }
 0x2f2   : > { %v2774_v62 = vpop.f32.mrf.mxu1  ;;  %v6861_v7 = vor.u32 %v7875_v18, %v6858_v57 }
 0x2f3   : > { %v2775_v22 = vadd.f32 %v2774_v62, %v2685_v51  ;;  %v9280_v35 = vadd.f32 %v2773_v2, %v2297_v53  ;;  %v6704_v62 = vld [vmem:[%s8213_s18 + $0x2f0] sm:$0xf] }
 0x2f4   : > { %v9289_v51 = vpop.f32.mrf.mxu2 }
 0x2f6   : > { %v2243_v10 = vpop.f32.mrf.mxu3 }
 0x2f7   : > { %v2244_v23 = vadd.f32 %v2243_v10, %v9054_v6  ;;  %v6705_v6 = vor.u32 %v7846_v31, %v6704_v62  ;;  %v7829_v10 = vld [vmem:[%s8213_s18 + $0x274] sm:$0xf] }
 0x2f8   : > { %v2688_v27 = vpop.f32.mrf.mxu0 }
 0x2f9   : > { %v2298_v34 = vadd.f32 %v2244_v23, %v8884_v37  ;;  %3223 = vmatmul.bf16.gmra.mxu2 %v6705_v6 }
 0x2fa   : > { %v2777_v2 = vpop.f32.mrf.mxu1 }
 0x2fb   : > { %v2778_v53 = vadd.f32 %v2777_v2, %v2688_v27  ;;  %3267 = vmatmul.bf16.gmra.mxu3 %v6637_v1  ;;  %3709 = vmatmul.bf16.gmra.mxu0 %v6857_v29  ;;  %v9293_v24 = vadd.f32 %v2775_v22, %v2298_v34  ;;  %v7955_v22 = vld [vmem:[%s10091_s1 + $0x390] sm:$0xff]  ;;  %v6642_v1 = vld [vmem:[%s8213_s18 + $0x278] sm:$0xf0]  ;;  %v6864_v29 = vld [vmem:[%s8213_s18 + $0x40] sm:$0xf] }
 0x2fc   : > { %v9297_v18 = vpop.f32.mrf.mxu2  ;;  %v7878_v27 = vld [vmem:[%s8213_s18 + $0x44] sm:$0xf0]  ;;  %4232 = vmatpush.bf16.msrb.mxu2 %v7955_v22  ;;  %v6645_v2 = vor.u32 %v7829_v10, %v6642_v1 }
 0x2fd   : > { %3798 = vmatmul.bf16.gmra.mxu1 %v6861_v7  ;;  %v6866_v7 = vld [vmem:[%s8213_s18 + $0x48] sm:$0xf0]  ;;  %v6865_v62 = vor.u32 %v7878_v27, %v6864_v29 }
 0x2fe   : > { %v2246_v8 = vpop.f32.mrf.mxu3 }
 0x2ff   : > { %v2247_v37 = vadd.f32 %v2246_v8, %v9063_v55  ;;  %v7877_v55 = vld [vmem:[%s8213_s18 + $0x44] sm:$0xf] }
 0x300   : > { %v2690_v3 = vpop.f32.mrf.mxu0  ;;  %v6869_v6 = vor.u32 %v7877_v55, %v6866_v7 }
 0x301   : > { %v2299_v42 = vadd.f32 %v2247_v37, %v8891_v63 }
 0x302   : > { %v2779_v0 = vpop.f32.mrf.mxu1 }
 0x303   : > { %v2780_v57 = vadd.f32 %v2779_v0, %v2690_v3  ;;  %v9303_v23 = vadd.f32 %v2778_v53, %v2299_v42  ;;  %v6712_v42 = vld [vmem:[%s8213_s18 + $0x300] sm:$0xf]  ;;  %v7848_v0 = vld [vmem:[%s8213_s18 + $0x304] sm:$0xf0] }
 0x304   : > { %v9312_v53 = vpop.f32.mrf.mxu2  ;;  %v6713_v10 = vor.u32 %v7848_v0, %v6712_v42 }
 0x306   : > { %v2248_v63 = vpop.f32.mrf.mxu3 }
 0x307   : > { %v2249_v34 = vadd.f32 %v2248_v63, %v9081_v58  ;;  %v7966_v58 = vld [vmem:[%s10091_s1 + $0x3e8] sm:$0xff] }
 0x308   : > { %v2693_v31 = vpop.f32.mrf.mxu0  ;;  %4318 = vmatpush.bf16.msra.mxu3 %v7966_v58  ;;  %v8006_v63 = vld [vmem:[%s10091_s1 + $0x428] sm:$0xff] }
 0x309   : > { %v2300_v8 = vadd.f32 %v2249_v34, %v8906_v25  ;;  %3228 = vmatmul.bf16.gmra.mxu2 %v6713_v10  ;;  %v8014_v34 = vld [vmem:[%s10091_s1 + $0x468] sm:$0xff]  ;;  %4760 = vmatpush.bf16.msra.mxu0 %v8006_v63  ;;  %v7850_v63 = vld [vmem:[%s8213_s18 + $0x314] sm:$0xf0] }
 0x30a   : > { %v2782_v37 = vpop.f32.mrf.mxu1  ;;  %4849 = vmatpush.bf16.msra.mxu1 %v8014_v34 }
 0x30b   : > { %v2783_v3 = vadd.f32 %v2782_v37, %v2693_v31  ;;  %3272 = vmatmul.bf16.gmra.mxu3 %v6645_v2  ;;  %3714 = vmatmul.bf16.gmra.mxu0 %v6865_v62  ;;  %v9316_v22 = vadd.f32 %v2780_v57, %v2300_v8  ;;  %v7831_v2 = vld [vmem:[%s8213_s18 + $0x284] sm:$0xf]  ;;  %v6872_v31 = vld [vmem:[%s8213_s18 + $0x50] sm:$0xf]  ;;  %v6874_v8 = vld [vmem:[%s8213_s18 + $0x58] sm:$0xf0] }
 0x30c   : > { %v9323_v55 = vpop.f32.mrf.mxu2 }
 0x30d   : > { %3803 = vmatmul.bf16.gmra.mxu1 %v6869_v6  ;;  %v7880_v6 = vld [vmem:[%s8213_s18 + $0x54] sm:$0xf0] }
 0x30e   : > { %v2251_v25 = vpop.f32.mrf.mxu3  ;;  %v6873_v58 = vor.u32 %v7880_v6, %v6872_v31 }
 0x30f   : > { %v2252_v1 = vadd.f32 %v2251_v25, %v9089_v21  ;;  %v6650_v21 = vld [vmem:[%s8213_s18 + $0x288] sm:$0xf0] }
 0x310   : > { %v2695_v29 = vpop.f32.mrf.mxu0  ;;  %v6653_v0 = vor.u32 %v7831_v2, %v6650_v21 }
 0x311   : > { %v2301_v57 = vadd.f32 %v2252_v1, %v8916_v48  ;;  %v7879_v48 = vld [vmem:[%s8213_s18 + $0x54] sm:$0xf] }
 0x312   : > { %v2784_v27 = vpop.f32.mrf.mxu1  ;;  %v6877_v25 = vor.u32 %v7879_v48, %v6874_v8 }
 0x313   : > { %v2785_v7 = vadd.f32 %v2784_v27, %v2695_v29  ;;  %v9332_v62 = vadd.f32 %v2783_v3, %v2301_v57  ;;  %v6720_v27 = vld [vmem:[%s8213_s18 + $0x310] sm:$0xf] }
 0x314   : > { %v9341_v29 = vpop.f32.mrf.mxu2 }
 0x316   : > { %v2253_v37 = vpop.f32.mrf.mxu3 }
 0x317   : > { %v2254_v42 = vadd.f32 %v2253_v37, %v9104_v56  ;;  %v6721_v56 = vor.u32 %v7850_v63, %v6720_v27  ;;  %v7833_v37 = vld [vmem:[%s8213_s18 + $0x294] sm:$0xf] }
 0x318   : > { %v2698_v10 = vpop.f32.mrf.mxu0 }
 0x319   : > { %v2302_v1 = vadd.f32 %v2254_v42, %v8934_v26  ;;  %3233 = vmatmul.bf16.gmra.mxu2 %v6721_v56 }
 0x31a   : > { %v2787_v3 = vpop.f32.mrf.mxu1 }
 0x31b   : > { %v2788_v57 = vadd.f32 %v2787_v3, %v2698_v10  ;;  %3277 = vmatmul.bf16.gmra.mxu3 %v6653_v0  ;;  %3719 = vmatmul.bf16.gmra.mxu0 %v6873_v58  ;;  %v9345_v34 = vadd.f32 %v2785_v7, %v2302_v1  ;;  %v7954_v7 = vld [vmem:[%s10091_s1 + $0x388] sm:$0xff]  ;;  %v6658_v0 = vld [vmem:[%s8213_s18 + $0x298] sm:$0xf0]  ;;  %v6880_v58 = vld [vmem:[%s8213_s18 + $0x60] sm:$0xf] }
 0x31c   : > { %v9349_v48 = vpop.f32.mrf.mxu2  ;;  %v7882_v10 = vld [vmem:[%s8213_s18 + $0x64] sm:$0xf0]  ;;  %4233 = vmatpush.bf16.msrb.mxu2 %v7954_v7  ;;  %v6661_v3 = vor.u32 %v7833_v37, %v6658_v0 }
 0x31d   : > { %3808 = vmatmul.bf16.gmra.mxu1 %v6877_v25  ;;  %v6882_v25 = vld [vmem:[%s8213_s18 + $0x68] sm:$0xf0]  ;;  %v6881_v27 = vor.u32 %v7882_v10, %v6880_v58 }
 0x31e   : > { %v2256_v2 = vpop.f32.mrf.mxu3 }
 0x31f   : > { %v2257_v26 = vadd.f32 %v2256_v2, %v9115_v44  ;;  %v7881_v44 = vld [vmem:[%s8213_s18 + $0x64] sm:$0xf] }
 0x320   : > { %v2700_v21 = vpop.f32.mrf.mxu0  ;;  %v6885_v56 = vor.u32 %v7881_v44, %v6882_v25 }
 0x321   : > { %v2303_v31 = vadd.f32 %v2257_v26, %v8941_v14 }
 0x322   : > { %v2789_v6 = vpop.f32.mrf.mxu1 }
 0x323   : > { %v2790_v8 = vadd.f32 %v2789_v6, %v2700_v21  ;;  %v9355_v42 = vadd.f32 %v2788_v57, %v2303_v31  ;;  %v6728_v31 = vld [vmem:[%s8213_s18 + $0x320] sm:$0xf]  ;;  %v7852_v6 = vld [vmem:[%s8213_s18 + $0x324] sm:$0xf0] }
 0x324   : > { %v9364_v57 = vpop.f32.mrf.mxu2  ;;  %v6729_v37 = vor.u32 %v7852_v6, %v6728_v31 }
 0x326   : > { %v2258_v14 = vpop.f32.mrf.mxu3 }
 0x327   : > { %v2259_v1 = vadd.f32 %v2258_v14, %v9133_v9  ;;  %v7965_v9 = vld [vmem:[%s10091_s1 + $0x3e0] sm:$0xff] }
 0x328   : > { %v2703_v63 = vpop.f32.mrf.mxu0  ;;  %4319 = vmatpush.bf16.msra.mxu3 %v7965_v9  ;;  %v8005_v14 = vld [vmem:[%s10091_s1 + $0x420] sm:$0xff] }
 0x329   : > { %v2304_v2 = vadd.f32 %v2259_v1, %v8956_v12  ;;  %3238 = vmatmul.bf16.gmra.mxu2 %v6729_v37  ;;  %v8013_v1 = vld [vmem:[%s10091_s1 + $0x460] sm:$0xff]  ;;  %4761 = vmatpush.bf16.msra.mxu0 %v8005_v14  ;;  %v7854_v14 = vld [vmem:[%s8213_s18 + $0x334] sm:$0xf0] }
 0x32a   : > { %v2792_v26 = vpop.f32.mrf.mxu1  ;;  %4850 = vmatpush.bf16.msra.mxu1 %v8013_v1 }
 0x32b   : > { %v2793_v21 = vadd.f32 %v2792_v26, %v2703_v63  ;;  %3282 = vmatmul.bf16.gmra.mxu3 %v6661_v3  ;;  %3724 = vmatmul.bf16.gmra.mxu0 %v6881_v27  ;;  %v9368_v7 = vadd.f32 %v2790_v8, %v2304_v2  ;;  %v7835_v3 = vld [vmem:[%s8213_s18 + $0x2a4] sm:$0xf]  ;;  %v6888_v63 = vld [vmem:[%s8213_s18 + $0x70] sm:$0xf]  ;;  %v6890_v2 = vld [vmem:[%s8213_s18 + $0x78] sm:$0xf0] }
 0x32c   : > { %v9375_v44 = vpop.f32.mrf.mxu2 }
 0x32d   : > { %3813 = vmatmul.bf16.gmra.mxu1 %v6885_v56  ;;  %v7884_v56 = vld [vmem:[%s8213_s18 + $0x74] sm:$0xf0] }
 0x32e   : > { %v2261_v12 = vpop.f32.mrf.mxu3  ;;  %v6889_v9 = vor.u32 %v7884_v56, %v6888_v63 }
 0x32f   : > { %v2262_v0 = vadd.f32 %v2261_v12, %v9141_v17  ;;  %v6666_v17 = vld [vmem:[%s8213_s18 + $0x2a8] sm:$0xf0] }
 0x330   : > { %v2705_v58 = vpop.f32.mrf.mxu0  ;;  %v6669_v6 = vor.u32 %v7835_v3, %v6666_v17 }
 0x331   : > { %v2305_v8 = vadd.f32 %v2262_v0, %v8966_v4  ;;  %v7883_v4 = vld [vmem:[%s8213_s18 + $0x74] sm:$0xf] }
 0x332   : > { %v2794_v10 = vpop.f32.mrf.mxu1  ;;  %v6893_v12 = vor.u32 %v7883_v4, %v6890_v2 }
 0x333   : > { %v2795_v25 = vadd.f32 %v2794_v10, %v2705_v58  ;;  %v9384_v27 = vadd.f32 %v2793_v21, %v2305_v8  ;;  %v6736_v10 = vld [vmem:[%s8213_s18 + $0x330] sm:$0xf] }
 0x334   : > { %v9393_v58 = vpop.f32.mrf.mxu2 }
 0x336   : > { %v2263_v26 = vpop.f32.mrf.mxu3 }
 0x337   : > { %v2264_v31 = vadd.f32 %v2263_v26, %v9156_v49  ;;  %v6737_v49 = vor.u32 %v7854_v14, %v6736_v10  ;;  %v7837_v26 = vld [vmem:[%s8213_s18 + $0x2b4] sm:$0xf] }
 0x338   : > { %v2708_v37 = vpop.f32.mrf.mxu0 }
 0x339   : > { %v2306_v0 = vadd.f32 %v2264_v31, %v8983_v43  ;;  %3243 = vmatmul.bf16.gmra.mxu2 %v6737_v49 }
 0x33a   : > { %v2797_v21 = vpop.f32.mrf.mxu1 }
 0x33b   : > { %v2798_v8 = vadd.f32 %v2797_v21, %v2708_v37  ;;  %3287 = vmatmul.bf16.gmra.mxu3 %v6669_v6  ;;  %3729 = vmatmul.bf16.gmra.mxu0 %v6889_v9  ;;  %v9397_v1 = vadd.f32 %v2795_v25, %v2306_v0  ;;  %v7953_v25 = vld [vmem:[%s10091_s1 + $0x380] sm:$0xff]  ;;  %v6674_v6 = vld [vmem:[%s8213_s18 + $0x2b8] sm:$0xf0]  ;;  %v7886_v37 = vld [vmem:[%s8213_s18 + $0x84] sm:$0xf0] }
 0x33c   : > { %v9401_v4 = vpop.f32.mrf.mxu2  ;;  %v6896_v9 = vld [vmem:[%s8213_s18 + $0x80] sm:$0xf]  ;;  %4234 = vmatpush.bf16.msrb.mxu2 %v7953_v25  ;;  %v6677_v21 = vor.u32 %v7837_v26, %v6674_v6  ;;  %v7856_v25 = vld [vmem:[%s8213_s18 + $0x344] sm:$0xf0] }
 0x33d   : > { %3818 = vmatmul.bf16.gmra.mxu1 %v6893_v12  ;;  %v6898_v12 = vld [vmem:[%s8213_s18 + $0x88] sm:$0xf0]  ;;  %v6897_v10 = vor.u32 %v7886_v37, %v6896_v9 }
 0x33e   : > { %v2266_v3 = vpop.f32.mrf.mxu3 }
 0x33f   : > { %v2267_v43 = vadd.f32 %v2266_v3, %v9167_v19  ;;  %v7885_v19 = vld [vmem:[%s8213_s18 + $0x84] sm:$0xf] }
 0x340   : > { %v2710_v17 = vpop.f32.mrf.mxu0  ;;  %v6901_v49 = vor.u32 %v7885_v19, %v6898_v12  ;;  %v10104_v3 = vld [vmem:[#allocation2_spill] sm:$0xff]  ;;  %v10106_v19 = vld [vmem:[#allocation3_spill] sm:$0xff] }
 0x341   : > { %v2307_v63 = vadd.f32 %v2267_v43, %v8990_v54 }
 0x342   : > { %v2799_v56 = vpop.f32.mrf.mxu1 }
 0x343   : > { %v2800_v2 = vadd.f32 %v2799_v56, %v2710_v17  ;;  %v9407_v31 = vadd.f32 %v2798_v8, %v2307_v63  ;;  %v6744_v56 = vld [vmem:[%s8213_s18 + $0x340] sm:$0xf] }
 0x344   : > { %v9416_v8 = vpop.f32.mrf.mxu2  ;;  %v6745_v26 = vor.u32 %v7856_v25, %v6744_v56  ;;  %v6906_v56 = vld [vmem:[%s8213_s18 + $0x98] sm:$0xf0] }
 0x345   : > { %10103 = vst [vmem:[#allocation8_spill] sm:$0xff] %v9407_v31 }
 0x346   : > { %v2268_v54 = vpop.f32.mrf.mxu3 }
 0x347   : > { %v2269_v0 = vadd.f32 %v2268_v54, %v9185_v61  ;;  %v7964_v61 = vld [vmem:[%s10091_s1 + $0x3d8] sm:$0xff] }
 0x348   : > { %v2713_v14 = vpop.f32.mrf.mxu0  ;;  %4320 = vmatpush.bf16.msra.mxu3 %v7964_v61 }
 0x349   : > { %v2308_v43 = vadd.f32 %v2269_v0, %v10104_v3  ;;  %3248 = vmatmul.bf16.gmra.mxu2 %v6745_v26  ;;  %v6904_v3 = vld [vmem:[%s8213_s18 + $0x90] sm:$0xf] }
 0x34a   : > { %v2802_v17 = vpop.f32.mrf.mxu1 }
 0x34b   : > { %v2803_v63 = vadd.f32 %v2802_v17, %v2713_v14  ;;  %3292 = vmatmul.bf16.gmra.mxu3 %v6677_v21  ;;  %3734 = vmatmul.bf16.gmra.mxu0 %v6897_v10  ;;  %v9420_v31 = vadd.f32 %v2800_v2, %v2308_v43  ;;  %v8004_v21 = vld [vmem:[%s10091_s1 + $0x418] sm:$0xff]  ;;  %v7839_v14 = vld [vmem:[%s8213_s18 + $0x2c4] sm:$0xf]  ;;  %v7887_v17 = vld [vmem:[%s8213_s18 + $0x94] sm:$0xf] }
 0x34c   : > { %v9427_v54 = vpop.f32.mrf.mxu2  ;;  %v8012_v10 = vld [vmem:[%s10091_s1 + $0x458] sm:$0xff]  ;;  %4762 = vmatpush.bf16.msra.mxu0 %v8004_v21  ;;  %v7104_v21 = vld [vmem:[%s8213_s18 + $0x140] sm:$0xf] }
 0x34d   : > { %10105 = vst [vmem:[#allocation2_spill] sm:$0xff] %v9420_v31  ;;  %3823 = vmatmul.bf16.gmra.mxu1 %v6901_v49  ;;  %v7888_v43 = vld [vmem:[%s8213_s18 + $0x94] sm:$0xf0] }
 0x34e   : > { %v2271_v6 = vpop.f32.mrf.mxu3  ;;  %4851 = vmatpush.bf16.msra.mxu1 %v8012_v10  ;;  %v7922_v10 = vld [vmem:[%s8213_s18 + $0x144] sm:$0xf0] }
 0x34f   : > { %v2272_v9 = vadd.f32 %v2271_v6, %v9193_v15  ;;  %v6682_v15 = vld [vmem:[%s8213_s18 + $0x2c8] sm:$0xf0]  ;;  %v6905_v6 = vor.u32 %v7888_v43, %v6904_v3  ;;  %v10110_v43 = vld [vmem:[#allocation5_spill] sm:$0xff] }
 0x350   : > { %v2715_v37 = vpop.f32.mrf.mxu0  ;;  %v6685_v26 = vor.u32 %v7839_v14, %v6682_v15 }
 0x351   : > { %v2309_v2 = vadd.f32 %v2272_v9, %v10106_v19  ;;  %v10108_v19 = vld [vmem:[#allocation4_spill] sm:$0xff] }
 0x352   : > { %v2804_v12 = vpop.f32.mrf.mxu1 }
 0x353   : > { %v2805_v0 = vadd.f32 %v2804_v12, %v2715_v37  ;;  %v9436_v49 = vadd.f32 %v2803_v63, %v2309_v2  ;;  %v6909_v37 = vor.u32 %v7887_v17, %v6906_v56 }
 0x354   : > { %v9445_v2 = vpop.f32.mrf.mxu2 }
 0x355   : > { %10107 = vst [vmem:[#allocation3_spill] sm:$0xff] %v9436_v49 }
 0x356   : > { %v2273_v25 = vpop.f32.mrf.mxu3 }
 0x357   : > { %v2274_v61 = vadd.f32 %v2273_v25, %v9208_v47  ;;  %v7105_v47 = vor.u32 %v7922_v10, %v7104_v21 }
 0x358   : > { %v2718_v9 = vpop.f32.mrf.mxu0 }
 0x359   : > { %v2310_v12 = vadd.f32 %v2274_v61, %v10108_v19  ;;  %4235 = vmatmul.bf16.vlgmr.msrb.gmra.mxu2 %v7105_v47  ;;  %v7890_v19 = vld [vmem:[%s8213_s18 + $0xa4] sm:$0xf0] }
 0x35a   : > { %v2807_v63 = vpop.f32.mrf.mxu1 }
 0x35b   : > { %v2808_v49 = vadd.f32 %v2807_v63, %v2718_v9  ;;  %3297 = vmatmul.bf16.gmra.mxu3 %v6685_v26  ;;  %3739 = vmatmul.bf16.gmra.mxu0 %v6905_v6  ;;  %v9449_v31 = vadd.f32 %v2805_v0, %v2310_v12  ;;  %v8024_v0 = vld [vmem:[%s10094_s4 + $0x38] sm:$0xff]  ;;  %v7841_v26 = vld [vmem:[%s8213_s18 + $0x2d4] sm:$0xf]  ;;  %v6914_v12 = vld [vmem:[%s8213_s18 + $0xa8] sm:$0xf0] }
 0x35c   : > { %v9453_v25 = vpop.f32.mrf.mxu2  ;;  %v6690_v9 = vld [vmem:[%s8213_s18 + $0x2d8] sm:$0xf0]  ;;  %5156 = vmatpush.bf16.msra.mxu2 %v8024_v0  ;;  %v7924_v0 = vld [vmem:[%s8213_s18 + $0x154] sm:$0xf0] }
 0x35d   : > { %10109 = vst [vmem:[#allocation4_spill] sm:$0xff] %v9449_v31  ;;  %3828 = vmatmul.bf16.gmra.mxu1 %v6909_v37  ;;  %v6912_v37 = vld [vmem:[%s8213_s18 + $0xa0] sm:$0xf]  ;;  %v6693_v10 = vor.u32 %v7841_v26, %v6690_v9 }
 0x35e   : > { %v2276_v14 = vpop.f32.mrf.mxu3  ;;  %v6913_v47 = vor.u32 %v7890_v19, %v6912_v37 }
 0x35f   : > { %v2277_v15 = vadd.f32 %v2276_v14, %v9219_v5  ;;  %v7889_v5 = vld [vmem:[%s8213_s18 + $0xa4] sm:$0xf] }
 0x360   : > { %v2720_v3 = vpop.f32.mrf.mxu0 }
 0x361   : > { %v2311_v17 = vadd.f32 %v2277_v15, %v10110_v43  ;;  %v6917_v15 = vor.u32 %v7889_v5, %v6914_v12  ;;  %v10113_v5 = vld [vmem:[#allocation7_spill] sm:$0xff] }
 0x362   : > { %v2809_v56 = vpop.f32.mrf.mxu1 }
 0x363   : > { %v2810_v61 = vadd.f32 %v2809_v56, %v2720_v3  ;;  %v9459_v6 = vadd.f32 %v2808_v49, %v2311_v17  ;;  %v10112_v3 = vld [vmem:[#allocation6_spill] sm:$0xff] }
 0x364   : > { %v9468_v49 = vpop.f32.mrf.mxu2 }
 0x365   : > { %10111 = vst [vmem:[#allocation5_spill] sm:$0xff] %v9459_v6  ;;  %v7112_v6 = vld [vmem:[%s8213_s18 + $0x150] sm:$0xf] }
 0x366   : > { %v2278_v63 = vpop.f32.mrf.mxu3  ;;  %v7113_v26 = vor.u32 %v7924_v0, %v7112_v6  ;;  %v8011_v6 = vld [vmem:[%s10091_s1 + $0x450] sm:$0xff] }
 0x367   : > { %v2279_v21 = vadd.f32 %v2278_v63, %v9237_v52  ;;  %v7963_v52 = vld [vmem:[%s10091_s1 + $0x3d0] sm:$0xff]  ;;  %4852 = vmatpush.bf16.msra.mxu1 %v8011_v6  ;;  %v7926_v6 = vld [vmem:[%s8213_s18 + $0x164] sm:$0xf0] }
 0x368   : > { %v3705_v14 = vpop.f32.mrf.mxu0  ;;  %4321 = vmatpush.bf16.msra.mxu3 %v7963_v52 }
 0x369   : > { %v2312_v43 = vadd.f32 %v2279_v21, %v10112_v3  ;;  %4240 = vmatmul.bf16.gmra.mxu2 %v7113_v26  ;;  %v7892_v3 = vld [vmem:[%s8213_s18 + $0xb4] sm:$0xf0] }
 0x36a   : > { %v3794_v56 = vpop.f32.mrf.mxu1 }
 0x36b   : > { %v3795_v17 = vadd.f32 %v3794_v56, %v3705_v14  ;;  %3302 = vmatmul.bf16.gmra.mxu3 %v6693_v10  ;;  %3744 = vmatmul.bf16.gmra.mxu0 %v6913_v47  ;;  %v9472_v31 = vadd.f32 %v2810_v61, %v2312_v43  ;;  %v8003_v10 = vld [vmem:[%s10091_s1 + $0x410] sm:$0xff]  ;;  %v7843_v47 = vld [vmem:[%s8213_s18 + $0x2e4] sm:$0xf]  ;;  %v6922_v56 = vld [vmem:[%s8213_s18 + $0xb8] sm:$0xf0] }
 0x36c   : > { %v9479_v63 = vpop.f32.mrf.mxu2  ;;  %4763 = vmatpush.bf16.msra.mxu0 %v8003_v10  ;;  %v7891_v43 = vld [vmem:[%s8213_s18 + $0xb4] sm:$0xf]  ;;  %v7120_v10 = vld [vmem:[%s8213_s18 + $0x160] sm:$0xf] }
 0x36d   : > { %3833 = vmatmul.bf16.gmra.mxu1 %v6917_v15  ;;  %v6920_v15 = vld [vmem:[%s8213_s18 + $0xb0] sm:$0xf] }
 0x36e   : > { %v3263_v9 = vpop.f32.mrf.mxu3 }
 0x36f   : > { %v3264_v37 = vadd.f32 %v3263_v9, %v9245_v20  ;;  %v6698_v20 = vld [vmem:[%s8213_s18 + $0x2e8] sm:$0xf0]  ;;  %v6921_v9 = vor.u32 %v7892_v3, %v6920_v15 }
 0x370   : > { %v3707_v19 = vpop.f32.mrf.mxu0  ;;  %v6701_v26 = vor.u32 %v7843_v47, %v6698_v20 }
 0x371   : > { %v3343_v61 = vadd.f32 %v3264_v37, %v10113_v5 }
 0x372   : > { %v3796_v12 = vpop.f32.mrf.mxu1 }
 0x373   : > { %v3797_v21 = vadd.f32 %v3796_v12, %v3707_v19  ;;  %v9488_v14 = vadd.f32 %v3795_v17, %v3343_v61  ;;  %v6925_v19 = vor.u32 %v7891_v43, %v6922_v56 }
 0x374   : > { %v9497_v61 = vpop.f32.mrf.mxu2 }
 0x375   : > { %10114 = vst [vmem:[#allocation6_spill] sm:$0xff] %v9488_v14 }
 0x376   : > { %v3265_v0 = vpop.f32.mrf.mxu3 }
 0x377   : > { %v3266_v52 = vadd.f32 %v3265_v0, %v9260_v45  ;;  %v7121_v45 = vor.u32 %v7926_v6, %v7120_v10  ;;  %v7845_v0 = vld [vmem:[%s8213_s18 + $0x2f4] sm:$0xf] }
 0x378   : > { %v3710_v37 = vpop.f32.mrf.mxu0 }
 0x379   : > { %v3344_v5 = vadd.f32 %v3266_v52, %v9085_v36  ;;  %4245 = vmatmul.bf16.gmra.mxu2 %v7121_v45 }
 0x37a   : > { %v3799_v17 = vpop.f32.mrf.mxu1 }
 0x37b   : > { %v3800_v12 = vadd.f32 %v3799_v17, %v3710_v37  ;;  %3307 = vmatmul.bf16.gmra.mxu3 %v6701_v26  ;;  %3749 = vmatmul.bf16.gmra.mxu0 %v6921_v9  ;;  %v9501_v14 = vadd.f32 %v3797_v21, %v3344_v5  ;;  %v8023_v21 = vld [vmem:[%s10094_s4 + $0x30] sm:$0xff]  ;;  %v6706_v26 = vld [vmem:[%s8213_s18 + $0x2f8] sm:$0xf0]  ;;  %v6928_v9 = vld [vmem:[%s8213_s18 + $0xc0] sm:$0xf] }
 0x37c   : > { %v9505_v43 = vpop.f32.mrf.mxu2  ;;  %v7894_v37 = vld [vmem:[%s8213_s18 + $0xc4] sm:$0xf0]  ;;  %5157 = vmatpush.bf16.msra.mxu2 %v8023_v21  ;;  %v6709_v17 = vor.u32 %v7845_v0, %v6706_v26 }
 0x37d   : > { %3838 = vmatmul.bf16.gmra.mxu1 %v6925_v19  ;;  %v6930_v19 = vld [vmem:[%s8213_s18 + $0xc8] sm:$0xf0]  ;;  %v6929_v10 = vor.u32 %v7894_v37, %v6928_v9 }
 0x37e   : > { %v3268_v47 = vpop.f32.mrf.mxu3 }
 0x37f   : > { %v3269_v36 = vadd.f32 %v3268_v47, %v9271_v30  ;;  %v7893_v30 = vld [vmem:[%s8213_s18 + $0xc4] sm:$0xf] }
 0x380   : > { %v3712_v20 = vpop.f32.mrf.mxu0  ;;  %v6933_v45 = vor.u32 %v7893_v30, %v6930_v19 }
 0x381   : > { %v3345_v15 = vadd.f32 %v3269_v36, %v9095_v39 }
 0x382   : > { %v3801_v3 = vpop.f32.mrf.mxu1 }
 0x383   : > { %v3802_v56 = vadd.f32 %v3801_v3, %v3712_v20  ;;  %v9511_v52 = vadd.f32 %v3800_v12, %v3345_v15  ;;  %v7128_v15 = vld [vmem:[%s8213_s18 + $0x170] sm:$0xf]  ;;  %v7928_v3 = vld [vmem:[%s8213_s18 + $0x174] sm:$0xf0] }
 0x384   : > { %v9520_v12 = vpop.f32.mrf.mxu2  ;;  %v7129_v0 = vor.u32 %v7928_v3, %v7128_v15 }
 0x386   : > { %v3270_v39 = vpop.f32.mrf.mxu3 }
 0x387   : > { %v3271_v5 = vadd.f32 %v3270_v39, %v9289_v51  ;;  %v7962_v51 = vld [vmem:[%s10091_s1 + $0x3c8] sm:$0xff] }
 0x388   : > { %v3715_v6 = vpop.f32.mrf.mxu0  ;;  %4322 = vmatpush.bf16.msra.mxu3 %v7962_v51  ;;  %v8002_v39 = vld [vmem:[%s10091_s1 + $0x408] sm:$0xff] }
 0x389   : > { %v3346_v47 = vadd.f32 %v3271_v5, %v9108_v46  ;;  %4250 = vmatmul.bf16.gmra.mxu2 %v7129_v0  ;;  %v8010_v5 = vld [vmem:[%s10091_s1 + $0x448] sm:$0xff]  ;;  %4764 = vmatpush.bf16.msra.mxu0 %v8002_v39 }
 0x38a   : > { %v3804_v36 = vpop.f32.mrf.mxu1  ;;  %4853 = vmatpush.bf16.msra.mxu1 %v8010_v5  ;;  %v7930_v39 = vld [vmem:[%s8213_s18 + $0x184] sm:$0xf0] }
 0x38b   : > { %v3805_v20 = vadd.f32 %v3804_v36, %v3715_v6  ;;  %3312 = vmatmul.bf16.gmra.mxu3 %v6709_v17  ;;  %3754 = vmatmul.bf16.gmra.mxu0 %v6929_v10  ;;  %v9524_v21 = vadd.f32 %v3802_v56, %v3346_v47  ;;  %v7847_v17 = vld [vmem:[%s8213_s18 + $0x304] sm:$0xf]  ;;  %v6936_v6 = vld [vmem:[%s8213_s18 + $0xd0] sm:$0xf]  ;;  %v6938_v47 = vld [vmem:[%s8213_s18 + $0xd8] sm:$0xf0] }
 0x38c   : > { %v9531_v30 = vpop.f32.mrf.mxu2 }
 0x38d   : > { %3843 = vmatmul.bf16.gmra.mxu1 %v6933_v45  ;;  %v7896_v45 = vld [vmem:[%s8213_s18 + $0xd4] sm:$0xf0] }
 0x38e   : > { %v3273_v46 = vpop.f32.mrf.mxu3  ;;  %v6937_v51 = vor.u32 %v7896_v45, %v6936_v6 }
 0x38f   : > { %v3274_v26 = vadd.f32 %v3273_v46, %v9297_v18  ;;  %v6714_v18 = vld [vmem:[%s8213_s18 + $0x308] sm:$0xf0] }
 0x390   : > { %v3717_v9 = vpop.f32.mrf.mxu0  ;;  %v6717_v3 = vor.u32 %v7847_v17, %v6714_v18 }
 0x391   : > { %v3347_v56 = vadd.f32 %v3274_v26, %v9124_v59  ;;  %v7895_v59 = vld [vmem:[%s8213_s18 + $0xd4] sm:$0xf] }
 0x392   : > { %v3806_v37 = vpop.f32.mrf.mxu1  ;;  %v6941_v46 = vor.u32 %v7895_v59, %v6938_v47 }
 0x393   : > { %v3807_v19 = vadd.f32 %v3806_v37, %v3717_v9  ;;  %v9540_v10 = vadd.f32 %v3805_v20, %v3347_v56  ;;  %v7136_v37 = vld [vmem:[%s8213_s18 + $0x180] sm:$0xf] }
 0x394   : > { %v9549_v9 = vpop.f32.mrf.mxu2 }
 0x396   : > { %v3275_v36 = vpop.f32.mrf.mxu3 }
 0x397   : > { %v3276_v15 = vadd.f32 %v3275_v36, %v9312_v53  ;;  %v7137_v53 = vor.u32 %v7930_v39, %v7136_v37  ;;  %v7849_v36 = vld [vmem:[%s8213_s18 + $0x314] sm:$0xf] }
 0x398   : > { %v3720_v0 = vpop.f32.mrf.mxu0 }
 0x399   : > { %v3348_v26 = vadd.f32 %v3276_v15, %v9137_v40  ;;  %4255 = vmatmul.bf16.gmra.mxu2 %v7137_v53 }
 0x39a   : > { %v3809_v20 = vpop.f32.mrf.mxu1 }
 0x39b   : > { %v3810_v56 = vadd.f32 %v3809_v20, %v3720_v0  ;;  %3317 = vmatmul.bf16.gmra.mxu3 %v6717_v3  ;;  %3759 = vmatmul.bf16.gmra.mxu0 %v6937_v51  ;;  %v9553_v5 = vadd.f32 %v3807_v19, %v3348_v26  ;;  %v8022_v19 = vld [vmem:[%s10094_s4 + $0x28] sm:$0xff]  ;;  %v6722_v3 = vld [vmem:[%s8213_s18 + $0x318] sm:$0xf0]  ;;  %v6944_v51 = vld [vmem:[%s8213_s18 + $0xe0] sm:$0xf] }
 0x39c   : > { %v9557_v59 = vpop.f32.mrf.mxu2  ;;  %v7898_v0 = vld [vmem:[%s8213_s18 + $0xe4] sm:$0xf0]  ;;  %5158 = vmatpush.bf16.msra.mxu2 %v8022_v19  ;;  %v6725_v20 = vor.u32 %v7849_v36, %v6722_v3 }
 0x39d   : > { %3848 = vmatmul.bf16.gmra.mxu1 %v6941_v46  ;;  %v6946_v46 = vld [vmem:[%s8213_s18 + $0xe8] sm:$0xf0]  ;;  %v6945_v37 = vor.u32 %v7898_v0, %v6944_v51 }
 0x39e   : > { %v3278_v17 = vpop.f32.mrf.mxu3 }
 0x39f   : > { %v3279_v40 = vadd.f32 %v3278_v17, %v9323_v55  ;;  %v7897_v55 = vld [vmem:[%s8213_s18 + $0xe4] sm:$0xf] }
 0x3a0   : > { %v3722_v18 = vpop.f32.mrf.mxu0  ;;  %v6949_v53 = vor.u32 %v7897_v55, %v6946_v46 }
 0x3a1   : > { %v3349_v6 = vadd.f32 %v3279_v40, %v9147_v33 }
 0x3a2   : > { %v3811_v45 = vpop.f32.mrf.mxu1 }
 0x3a3   : > { %v3812_v47 = vadd.f32 %v3811_v45, %v3722_v18  ;;  %v9563_v15 = vadd.f32 %v3810_v56, %v3349_v6  ;;  %v7144_v6 = vld [vmem:[%s8213_s18 + $0x190] sm:$0xf]  ;;  %v7932_v45 = vld [vmem:[%s8213_s18 + $0x194] sm:$0xf0] }
 0x3a4   : > { %v9572_v56 = vpop.f32.mrf.mxu2  ;;  %v7145_v36 = vor.u32 %v7932_v45, %v7144_v6 }
 0x3a6   : > { %v3280_v33 = vpop.f32.mrf.mxu3 }
 0x3a7   : > { %v3281_v26 = vadd.f32 %v3280_v33, %v9341_v29  ;;  %v7961_v29 = vld [vmem:[%s10091_s1 + $0x3c0] sm:$0xff] }
 0x3a8   : > { %v3725_v39 = vpop.f32.mrf.mxu0  ;;  %4323 = vmatpush.bf16.msra.mxu3 %v7961_v29  ;;  %v8001_v33 = vld [vmem:[%s10091_s1 + $0x400] sm:$0xff] }
 0x3a9   : > { %v3350_v17 = vadd.f32 %v3281_v26, %v9160_v38  ;;  %4260 = vmatmul.bf16.gmra.mxu2 %v7145_v36  ;;  %v8009_v26 = vld [vmem:[%s10091_s1 + $0x440] sm:$0xff]  ;;  %4765 = vmatpush.bf16.msra.mxu0 %v8001_v33  ;;  %v7934_v33 = vld [vmem:[%s8213_s18 + $0x1a4] sm:$0xf0] }
 0x3aa   : > { %v3814_v40 = vpop.f32.mrf.mxu1  ;;  %4854 = vmatpush.bf16.msra.mxu1 %v8009_v26 }
 0x3ab   : > { %v3815_v18 = vadd.f32 %v3814_v40, %v3725_v39  ;;  %3322 = vmatmul.bf16.gmra.mxu3 %v6725_v20  ;;  %3764 = vmatmul.bf16.gmra.mxu0 %v6945_v37  ;;  %v9576_v19 = vadd.f32 %v3812_v47, %v3350_v17  ;;  %v7851_v20 = vld [vmem:[%s8213_s18 + $0x324] sm:$0xf]  ;;  %v6952_v39 = vld [vmem:[%s8213_s18 + $0xf0] sm:$0xf]  ;;  %v6954_v17 = vld [vmem:[%s8213_s18 + $0xf8] sm:$0xf0] }
 0x3ac   : > { %v9583_v55 = vpop.f32.mrf.mxu2 }
 0x3ad   : > { %3853 = vmatmul.bf16.gmra.mxu1 %v6949_v53  ;;  %v7900_v53 = vld [vmem:[%s8213_s18 + $0xf4] sm:$0xf0] }
 0x3ae   : > { %v3283_v38 = vpop.f32.mrf.mxu3  ;;  %v6953_v29 = vor.u32 %v7900_v53, %v6952_v39 }
 0x3af   : > { %v3284_v3 = vadd.f32 %v3283_v38, %v9349_v48  ;;  %v6730_v48 = vld [vmem:[%s8213_s18 + $0x328] sm:$0xf0] }
 0x3b0   : > { %v3727_v51 = vpop.f32.mrf.mxu0  ;;  %v6733_v45 = vor.u32 %v7851_v20, %v6730_v48 }
 0x3b1   : > { %v3351_v47 = vadd.f32 %v3284_v3, %v9176_v41  ;;  %v7899_v41 = vld [vmem:[%s8213_s18 + $0xf4] sm:$0xf] }
 0x3b2   : > { %v3816_v0 = vpop.f32.mrf.mxu1  ;;  %v6957_v38 = vor.u32 %v7899_v41, %v6954_v17 }
 0x3b3   : > { %v3817_v46 = vadd.f32 %v3816_v0, %v3727_v51  ;;  %v9592_v37 = vadd.f32 %v3815_v18, %v3351_v47  ;;  %v7152_v0 = vld [vmem:[%s8213_s18 + $0x1a0] sm:$0xf] }
 0x3b4   : > { %v9601_v51 = vpop.f32.mrf.mxu2 }
 0x3b6   : > { %v3285_v40 = vpop.f32.mrf.mxu3 }
 0x3b7   : > { %v3286_v6 = vadd.f32 %v3285_v40, %v9364_v57  ;;  %v7153_v57 = vor.u32 %v7934_v33, %v7152_v0  ;;  %v7853_v40 = vld [vmem:[%s8213_s18 + $0x334] sm:$0xf] }
 0x3b8   : > { %v3730_v36 = vpop.f32.mrf.mxu0 }
 0x3b9   : > { %v3352_v3 = vadd.f32 %v3286_v6, %v9189_v28  ;;  %4265 = vmatmul.bf16.gmra.mxu2 %v7153_v57 }
 0x3ba   : > { %v3819_v18 = vpop.f32.mrf.mxu1 }
 0x3bb   : > { %v3820_v47 = vadd.f32 %v3819_v18, %v3730_v36  ;;  %3327 = vmatmul.bf16.gmra.mxu3 %v6733_v45  ;;  %3769 = vmatmul.bf16.gmra.mxu0 %v6953_v29  ;;  %v9605_v26 = vadd.f32 %v3817_v46, %v3352_v3  ;;  %v8021_v46 = vld [vmem:[%s10094_s4 + $0x20] sm:$0xff]  ;;  %v6738_v45 = vld [vmem:[%s8213_s18 + $0x338] sm:$0xf0]  ;;  %v7902_v36 = vld [vmem:[%s8213_s18 + $0x104] sm:$0xf0] }
 0x3bc   : > { %v9609_v41 = vpop.f32.mrf.mxu2  ;;  %v6960_v29 = vld [vmem:[%s8213_s18 + $0x100] sm:$0xf]  ;;  %5159 = vmatpush.bf16.msra.mxu2 %v8021_v46  ;;  %v6741_v18 = vor.u32 %v7853_v40, %v6738_v45 }
 0x3bd   : > { %3858 = vmatmul.bf16.gmra.mxu1 %v6957_v38  ;;  %v6962_v38 = vld [vmem:[%s8213_s18 + $0x108] sm:$0xf0]  ;;  %v6961_v0 = vor.u32 %v7902_v36, %v6960_v29 }
 0x3be   : > { %v3288_v20 = vpop.f32.mrf.mxu3 }
 0x3bf   : > { %v3289_v28 = vadd.f32 %v3288_v20, %v9375_v44  ;;  %v7901_v44 = vld [vmem:[%s8213_s18 + $0x104] sm:$0xf] }
 0x3c0   : > { %v3732_v48 = vpop.f32.mrf.mxu0  ;;  %v6965_v57 = vor.u32 %v7901_v44, %v6962_v38 }
 0x3c1   : > { %v3353_v39 = vadd.f32 %v3289_v28, %v9199_v50 }
 0x3c2   : > { %v3821_v53 = vpop.f32.mrf.mxu1 }
 0x3c3   : > { %v3822_v17 = vadd.f32 %v3821_v53, %v3732_v48  ;;  %v9615_v6 = vadd.f32 %v3820_v47, %v3353_v39  ;;  %v7160_v39 = vld [vmem:[%s8213_s18 + $0x1b0] sm:$0xf]  ;;  %v7936_v53 = vld [vmem:[%s8213_s18 + $0x1b4] sm:$0xf0] }
 0x3c4   : > { %v9624_v47 = vpop.f32.mrf.mxu2 }
 0x3c6   : > { %v3290_v50 = vpop.f32.mrf.mxu3 }
 0x3c7   : > { %v3291_v3 = vadd.f32 %v3290_v50, %v9393_v58  ;;  %v7161_v58 = vor.u32 %v7936_v53, %v7160_v39  ;;  %v7855_v50 = vld [vmem:[%s8213_s18 + $0x344] sm:$0xf] }
 0x3c8   : > { %v3735_v33 = vpop.f32.mrf.mxu0 }
 0x3c9   : > { %v3354_v20 = vadd.f32 %v3291_v3, %v9212_v13  ;;  %4270 = vmatmul.bf16.gmra.mxu2 %v7161_v58 }
 0x3ca   : > { %v3824_v28 = vpop.f32.mrf.mxu1 }
 0x3cb   : > { %v3825_v48 = vadd.f32 %v3824_v28, %v3735_v33  ;;  %3332 = vmatmul.bf16.gmra.mxu3 %v6741_v18  ;;  %3774 = vmatmul.bf16.gmra.mxu0 %v6961_v0  ;;  %v9628_v46 = vadd.f32 %v3822_v17, %v3354_v20  ;;  %v6746_v17 = vld [vmem:[%s8213_s18 + $0x348] sm:$0xf0]  ;;  %v6968_v18 = vld [vmem:[%s8213_s18 + $0x110] sm:$0xf]  ;;  %v7904_v0 = vld [vmem:[%s8213_s18 + $0x114] sm:$0xf0] }
 0x3cc   : > { %v9632_v44 = vpop.f32.mrf.mxu2  ;;  %v7903_v33 = vld [vmem:[%s8213_s18 + $0x114] sm:$0xf]  ;;  %v6749_v28 = vor.u32 %v7855_v50, %v6746_v17  ;;  %v6969_v39 = vor.u32 %v7904_v0, %v6968_v18 }
 0x3cd   : > { %3863 = vmatmul.bf16.gmra.mxu1 %v6965_v57  ;;  %v6970_v57 = vld [vmem:[%s8213_s18 + $0x118] sm:$0xf0] }
 0x3ce   : > { %v3293_v40 = vpop.f32.mrf.mxu3  ;;  %v6973_v53 = vor.u32 %v7903_v33, %v6970_v57 }
 0x3cf   : > { %v3294_v13 = vadd.f32 %v3293_v40, %v9401_v4 }
 0x3d0   : > { %v3737_v45 = vpop.f32.mrf.mxu0 }
 0x3d1   : > { %v3355_v29 = vadd.f32 %v3294_v13, %v9228_v32 }
 0x3d2   : > { %v3826_v36 = vpop.f32.mrf.mxu1 }
 0x3d3   : > { %v3827_v38 = vadd.f32 %v3826_v36, %v3737_v45  ;;  %v9635_v3 = vadd.f32 %v3825_v48, %v3355_v29  ;;  %v7168_v45 = vld [vmem:[%s8213_s18 + $0x1c0] sm:$0xf]  ;;  %v7938_v29 = vld [vmem:[%s8213_s18 + $0x1c4] sm:$0xf0] }
 0x3d4   : > { %v9644_v13 = vpop.f32.mrf.mxu2 }
 0x3d6   : > { %v3295_v20 = vpop.f32.mrf.mxu3 }
 0x3d7   : > { %v3296_v4 = vadd.f32 %v3295_v20, %v9416_v8  ;;  %v7169_v8 = vor.u32 %v7938_v29, %v7168_v45  ;;  %v7921_v20 = vld [vmem:[%s8213_s18 + $0x144] sm:$0xf] }
 0x3d8   : > { %v3740_v32 = vpop.f32.mrf.mxu0 }
 0x3d9   : > { %v3356_v58 = vadd.f32 %v3296_v4, %v9241_v11  ;;  %4275 = vmatmul.bf16.gmra.mxu2 %v7169_v8 }
 0x3da   : > { %v3829_v40 = vpop.f32.mrf.mxu1 }
 0x3db   : > { %v3830_v48 = vadd.f32 %v3829_v40, %v3740_v32  ;;  %3337 = vmatmul.bf16.gmra.mxu3 %v6749_v28  ;;  %3779 = vmatmul.bf16.gmra.mxu0 %v6969_v39  ;;  %v9648_v36 = vadd.f32 %v3827_v38, %v3356_v58  ;;  %v8020_v38 = vld [vmem:[%s10094_s4 + $0x18] sm:$0xff]  ;;  %v7106_v28 = vld [vmem:[%s8213_s18 + $0x148] sm:$0xf0]  ;;  %v7360_v39 = vld [vmem:[%s8213_s18 + $0x260] sm:$0xf] }
 0x3dc   : > { %v9652_v33 = vpop.f32.mrf.mxu2  ;;  %v7970_v32 = vld [vmem:[%s8213_s18 + $0x264] sm:$0xf0]  ;;  %5160 = vmatpush.bf16.msra.mxu2 %v8020_v38  ;;  %v7109_v40 = vor.u32 %v7921_v20, %v7106_v28 }
 0x3dd   : > { %3868 = vmatmul.bf16.gmra.mxu1 %v6973_v53  ;;  %v7362_v53 = vld [vmem:[%s8213_s18 + $0x268] sm:$0xf0]  ;;  %v7361_v45 = vor.u32 %v7970_v32, %v7360_v39 }
 0x3de   : > { %v3298_v50 = vpop.f32.mrf.mxu3 }
 0x3df   : > { %v3299_v11 = vadd.f32 %v3298_v50, %v9427_v54  ;;  %v7969_v54 = vld [vmem:[%s8213_s18 + $0x264] sm:$0xf] }
 0x3e0   : > { %v3742_v17 = vpop.f32.mrf.mxu0  ;;  %v7365_v8 = vor.u32 %v7969_v54, %v7362_v53 }
 0x3e1   : > { %v3357_v18 = vadd.f32 %v3299_v11, %v9251_v16 }
 0x3e2   : > { %v3831_v0 = vpop.f32.mrf.mxu1 }
 0x3e3   : > { %v3832_v57 = vadd.f32 %v3831_v0, %v3742_v17  ;;  %v9658_v4 = vadd.f32 %v3830_v48, %v3357_v18  ;;  %v7176_v18 = vld [vmem:[%s8213_s18 + $0x1d0] sm:$0xf]  ;;  %v7940_v0 = vld [vmem:[%s8213_s18 + $0x1d4] sm:$0xf0] }
 0x3e4   : > { %v9667_v48 = vpop.f32.mrf.mxu2 }
 0x3e6   : > { %v3300_v16 = vpop.f32.mrf.mxu3 }
 0x3e7   : > { %v3301_v58 = vadd.f32 %v3300_v16, %v9445_v2  ;;  %v7177_v2 = vor.u32 %v7940_v0, %v7176_v18  ;;  %v7923_v16 = vld [vmem:[%s8213_s18 + $0x154] sm:$0xf] }
 0x3e8   : > { %v3745_v29 = vpop.f32.mrf.mxu0 }
 0x3e9   : > { %v3358_v50 = vadd.f32 %v3301_v58, %v9264_v60  ;;  %4280 = vmatmul.bf16.gmra.mxu2 %v7177_v2 }
 0x3ea   : > { %v3834_v11 = vpop.f32.mrf.mxu1 }
 0x3eb   : > { %v3835_v17 = vadd.f32 %v3834_v11, %v3745_v29  ;;  %4324 = vmatmul.bf16.vlgmr.msra.gmra.mxu3 %v7109_v40  ;;  %4766 = vmatmul.bf16.vlgmr.msra.gmra.mxu0 %v7361_v45  ;;  %v9671_v38 = vadd.f32 %v3832_v57, %v3358_v50  ;;  %v7114_v57 = vld [vmem:[%s8213_s18 + $0x158] sm:$0xf0]  ;;  %v7368_v40 = vld [vmem:[%s8213_s18 + $0x270] sm:$0xf]  ;;  %v7972_v45 = vld [vmem:[%s8213_s18 + $0x274] sm:$0xf0] }
 0x3ec   : > { %v9675_v54 = vpop.f32.mrf.mxu2  ;;  %v7971_v29 = vld [vmem:[%s8213_s18 + $0x274] sm:$0xf]  ;;  %v7117_v11 = vor.u32 %v7923_v16, %v7114_v57  ;;  %v7369_v18 = vor.u32 %v7972_v45, %v7368_v40 }
 0x3ed   : > { %4855 = vmatmul.bf16.vlgmr.msra.gmra.mxu1 %v7365_v8  ;;  %v7370_v8 = vld [vmem:[%s8213_s18 + $0x278] sm:$0xf0] }
 0x3ee   : > { %v3303_v20 = vpop.f32.mrf.mxu3  ;;  %v7373_v0 = vor.u32 %v7971_v29, %v7370_v8 }
 0x3ef   : > { %v3304_v60 = vadd.f32 %v3303_v20, %v9453_v25 }
 0x3f0   : > { %v3747_v28 = vpop.f32.mrf.mxu0 }
 0x3f1   : > { %v3359_v39 = vadd.f32 %v3304_v60, %v9280_v35 }
 0x3f2   : > { %v3836_v32 = vpop.f32.mrf.mxu1 }
 0x3f3   : > { %v3837_v53 = vadd.f32 %v3836_v32, %v3747_v28  ;;  %v9678_v58 = vadd.f32 %v3835_v17, %v3359_v39  ;;  %v7184_v28 = vld [vmem:[%s8213_s18 + $0x1e0] sm:$0xf]  ;;  %v7942_v39 = vld [vmem:[%s8213_s18 + $0x1e4] sm:$0xf0] }
 0x3f4   : > { %v9687_v60 = vpop.f32.mrf.mxu2 }
 0x3f6   : > { %v3305_v50 = vpop.f32.mrf.mxu3 }
 0x3f7   : > { %v3306_v25 = vadd.f32 %v3305_v50, %v9468_v49  ;;  %v7185_v49 = vor.u32 %v7942_v39, %v7184_v28  ;;  %v7925_v50 = vld [vmem:[%s8213_s18 + $0x164] sm:$0xf] }
 0x3f8   : > { %v3750_v35 = vpop.f32.mrf.mxu0 }
 0x3f9   : > { %v3360_v2 = vadd.f32 %v3306_v25, %v9293_v24  ;;  %4285 = vmatmul.bf16.gmra.mxu2 %v7185_v49 }
 0x3fa   : > { %v3839_v20 = vpop.f32.mrf.mxu1 }
 0x3fb   : > { %v3840_v17 = vadd.f32 %v3839_v20, %v3750_v35  ;;  %4329 = vmatmul.bf16.gmra.mxu3 %v7117_v11  ;;  %4771 = vmatmul.bf16.gmra.mxu0 %v7369_v18  ;;  %v9691_v32 = vadd.f32 %v3837_v53, %v3360_v2  ;;  %v8019_v53 = vld [vmem:[%s10094_s4 + $0x10] sm:$0xff]  ;;  %v7122_v11 = vld [vmem:[%s8213_s18 + $0x168] sm:$0xf0]  ;;  %v7376_v18 = vld [vmem:[%s8213_s18 + $0x280] sm:$0xf] }
 0x3fc   : > { %v9695_v29 = vpop.f32.mrf.mxu2  ;;  %v7974_v35 = vld [vmem:[%s8213_s18 + $0x284] sm:$0xf0]  ;;  %5161 = vmatpush.bf16.msra.mxu2 %v8019_v53  ;;  %v7125_v20 = vor.u32 %v7925_v50, %v7122_v11 }
 0x3fd   : > { %4860 = vmatmul.bf16.gmra.mxu1 %v7373_v0  ;;  %v7378_v0 = vld [vmem:[%s8213_s18 + $0x288] sm:$0xf0]  ;;  %v7377_v28 = vor.u32 %v7974_v35, %v7376_v18 }
 0x3fe   : > { %v3308_v16 = vpop.f32.mrf.mxu3 }
 0x3ff   : > { %v3309_v24 = vadd.f32 %v3308_v16, %v9479_v63  ;;  %v7973_v63 = vld [vmem:[%s8213_s18 + $0x284] sm:$0xf] }
 0x400   : > { %v3752_v57 = vpop.f32.mrf.mxu0  ;;  %v7381_v49 = vor.u32 %v7973_v63, %v7378_v0 }
 0x401   : > { %v3361_v40 = vadd.f32 %v3309_v24, %v9303_v23 }
 0x402   : > { %v3841_v45 = vpop.f32.mrf.mxu1 }
 0x403   : > { %v3842_v8 = vadd.f32 %v3841_v45, %v3752_v57  ;;  %v9701_v25 = vadd.f32 %v3840_v17, %v3361_v40  ;;  %v7192_v40 = vld [vmem:[%s8213_s18 + $0x1f0] sm:$0xf]  ;;  %v7944_v45 = vld [vmem:[%s8213_s18 + $0x1f4] sm:$0xf0] }
 0x404   : > { %v9710_v17 = vpop.f32.mrf.mxu2 }
 0x406   : > { %v3310_v23 = vpop.f32.mrf.mxu3 }
 0x407   : > { %v3311_v2 = vadd.f32 %v3310_v23, %v9497_v61  ;;  %v7193_v61 = vor.u32 %v7944_v45, %v7192_v40  ;;  %v7927_v23 = vld [vmem:[%s8213_s18 + $0x174] sm:$0xf] }
 0x408   : > { %v3755_v39 = vpop.f32.mrf.mxu0 }
 0x409   : > { %v3362_v16 = vadd.f32 %v3311_v2, %v9316_v22  ;;  %4290 = vmatmul.bf16.gmra.mxu2 %v7193_v61 }
 0x40a   : > { %v3844_v24 = vpop.f32.mrf.mxu1 }
 0x40b   : > { %v3845_v57 = vadd.f32 %v3844_v24, %v3755_v39  ;;  %4334 = vmatmul.bf16.gmra.mxu3 %v7125_v20  ;;  %4776 = vmatmul.bf16.gmra.mxu0 %v7377_v28  ;;  %v9714_v53 = vadd.f32 %v3842_v8, %v3362_v16  ;;  %v7130_v8 = vld [vmem:[%s8213_s18 + $0x178] sm:$0xf0]  ;;  %v7384_v20 = vld [vmem:[%s8213_s18 + $0x290] sm:$0xf]  ;;  %v7976_v28 = vld [vmem:[%s8213_s18 + $0x294] sm:$0xf0] }
 0x40c   : > { %v9718_v63 = vpop.f32.mrf.mxu2  ;;  %v7975_v39 = vld [vmem:[%s8213_s18 + $0x294] sm:$0xf]  ;;  %v7133_v24 = vor.u32 %v7927_v23, %v7130_v8  ;;  %v7385_v40 = vor.u32 %v7976_v28, %v7384_v20 }
 0x40d   : > { %4865 = vmatmul.bf16.gmra.mxu1 %v7381_v49  ;;  %v7386_v49 = vld [vmem:[%s8213_s18 + $0x298] sm:$0xf0] }
 0x40e   : > { %v3313_v50 = vpop.f32.mrf.mxu3  ;;  %v7389_v45 = vor.u32 %v7975_v39, %v7386_v49 }
 0x40f   : > { %v3314_v22 = vadd.f32 %v3313_v50, %v9505_v43 }
 0x410   : > { %v3757_v11 = vpop.f32.mrf.mxu0 }
 0x411   : > { %v3363_v18 = vadd.f32 %v3314_v22, %v9332_v62 }
 0x412   : > { %v3846_v35 = vpop.f32.mrf.mxu1 }
 0x413   : > { %v3847_v0 = vadd.f32 %v3846_v35, %v3757_v11  ;;  %v9721_v2 = vadd.f32 %v3845_v57, %v3363_v18  ;;  %v7200_v11 = vld [vmem:[%s8213_s18 + $0x200] sm:$0xf]  ;;  %v7946_v18 = vld [vmem:[%s8213_s18 + $0x204] sm:$0xf0] }
 0x414   : > { %v9730_v22 = vpop.f32.mrf.mxu2 }
 0x416   : > { %v3315_v16 = vpop.f32.mrf.mxu3 }
 0x417   : > { %v3316_v43 = vadd.f32 %v3315_v16, %v9520_v12  ;;  %v7201_v12 = vor.u32 %v7946_v18, %v7200_v11  ;;  %v7929_v16 = vld [vmem:[%s8213_s18 + $0x184] sm:$0xf] }
 0x418   : > { %v3760_v62 = vpop.f32.mrf.mxu0 }
 0x419   : > { %v3364_v61 = vadd.f32 %v3316_v43, %v9345_v34  ;;  %4295 = vmatmul.bf16.gmra.mxu2 %v7201_v12 }
 0x41a   : > { %v3849_v50 = vpop.f32.mrf.mxu1 }
 0x41b   : > { %v3850_v57 = vadd.f32 %v3849_v50, %v3760_v62  ;;  %4339 = vmatmul.bf16.gmra.mxu3 %v7133_v24  ;;  %4781 = vmatmul.bf16.gmra.mxu0 %v7385_v40  ;;  %v9734_v35 = vadd.f32 %v3847_v0, %v3364_v61  ;;  %v8018_v0 = vld [vmem:[%s10094_s4 + $0x8] sm:$0xff]  ;;  %v7392_v40 = vld [vmem:[%s8213_s18 + $0x2a0] sm:$0xf] }
 0x41c   : > { %v9738_v39 = vpop.f32.mrf.mxu2  ;;  %v7138_v24 = vld [vmem:[%s8213_s18 + $0x188] sm:$0xf0]  ;;  %v7978_v62 = vld [vmem:[%s8213_s18 + $0x2a4] sm:$0xf0]  ;;  %5162 = vmatpush.bf16.msra.mxu2 %v8018_v0 }
 0x41d   : > { %4870 = vmatmul.bf16.gmra.mxu1 %v7389_v45  ;;  %v7394_v45 = vld [vmem:[%s8213_s18 + $0x2a8] sm:$0xf0]  ;;  %v7141_v50 = vor.u32 %v7929_v16, %v7138_v24  ;;  %v7393_v11 = vor.u32 %v7978_v62, %v7392_v40 }
 0x41e   : > { %v3318_v23 = vpop.f32.mrf.mxu3 }
 0x41f   : > { %v3319_v34 = vadd.f32 %v3318_v23, %v9531_v30  ;;  %v7977_v30 = vld [vmem:[%s8213_s18 + $0x2a4] sm:$0xf] }
 0x420   : > { %v3762_v8 = vpop.f32.mrf.mxu0  ;;  %v7397_v12 = vor.u32 %v7977_v30, %v7394_v45 }
 0x421   : > { %v3365_v20 = vadd.f32 %v3319_v34, %v9355_v42 }
 0x422   : > { %v3851_v28 = vpop.f32.mrf.mxu1 }
 0x423   : > { %v3852_v49 = vadd.f32 %v3851_v28, %v3762_v8  ;;  %v9744_v43 = vadd.f32 %v3850_v57, %v3365_v20  ;;  %v7208_v20 = vld [vmem:[%s8213_s18 + $0x210] sm:$0xf]  ;;  %v7948_v28 = vld [vmem:[%s8213_s18 + $0x214] sm:$0xf0] }
 0x424   : > { %v9753_v57 = vpop.f32.mrf.mxu2 }
 0x426   : > { %v3320_v42 = vpop.f32.mrf.mxu3 }
 0x427   : > { %v3321_v61 = vadd.f32 %v3320_v42, %v9549_v9  ;;  %v7209_v9 = vor.u32 %v7948_v28, %v7208_v20  ;;  %v7931_v42 = vld [vmem:[%s8213_s18 + $0x194] sm:$0xf] }
 0x428   : > { %v3765_v18 = vpop.f32.mrf.mxu0 }
 0x429   : > { %v3366_v23 = vadd.f32 %v3321_v61, %v9368_v7  ;;  %4300 = vmatmul.bf16.gmra.mxu2 %v7209_v9 }
 0x42a   : > { %v3854_v34 = vpop.f32.mrf.mxu1 }
 0x42b   : > { %v3855_v8 = vadd.f32 %v3854_v34, %v3765_v18  ;;  %4344 = vmatmul.bf16.gmra.mxu3 %v7141_v50  ;;  %4786 = vmatmul.bf16.gmra.mxu0 %v7393_v11  ;;  %v9757_v0 = vadd.f32 %v3852_v49, %v3366_v23  ;;  %v7146_v49 = vld [vmem:[%s8213_s18 + $0x198] sm:$0xf0]  ;;  %v7400_v50 = vld [vmem:[%s8213_s18 + $0x2b0] sm:$0xf]  ;;  %v7980_v11 = vld [vmem:[%s8213_s18 + $0x2b4] sm:$0xf0] }
 0x42c   : > { %v9761_v30 = vpop.f32.mrf.mxu2  ;;  %v7979_v18 = vld [vmem:[%s8213_s18 + $0x2b4] sm:$0xf]  ;;  %v7149_v34 = vor.u32 %v7931_v42, %v7146_v49  ;;  %v7401_v20 = vor.u32 %v7980_v11, %v7400_v50 }
 0x42d   : > { %4875 = vmatmul.bf16.gmra.mxu1 %v7397_v12  ;;  %v7402_v12 = vld [vmem:[%s8213_s18 + $0x2b8] sm:$0xf0]  ;;  %v10116_v50 = vld [vmem:[#allocation8_spill] sm:$0xff] }
 0x42e   : > { %v3323_v16 = vpop.f32.mrf.mxu3  ;;  %v7405_v28 = vor.u32 %v7979_v18, %v7402_v12 }
 0x42f   : > { %v3324_v7 = vadd.f32 %v3323_v16, %v9557_v59 }
 0x430   : > { %v3767_v24 = vpop.f32.mrf.mxu0 }
 0x431   : > { %v3367_v40 = vadd.f32 %v3324_v7, %v9384_v27 }
 0x432   : > { %v3856_v62 = vpop.f32.mrf.mxu1 }
 0x433   : > { %v3857_v45 = vadd.f32 %v3856_v62, %v3767_v24  ;;  %v9764_v61 = vadd.f32 %v3855_v8, %v3367_v40  ;;  %v7216_v24 = vld [vmem:[%s8213_s18 + $0x220] sm:$0xf]  ;;  %v7950_v40 = vld [vmem:[%s8213_s18 + $0x224] sm:$0xf0] }
 0x434   : > { %v9773_v7 = vpop.f32.mrf.mxu2 }
 0x436   : > { %v3325_v23 = vpop.f32.mrf.mxu3 }
 0x437   : > { %v3326_v59 = vadd.f32 %v3325_v23, %v9572_v56  ;;  %v7217_v56 = vor.u32 %v7950_v40, %v7216_v24 }
 0x438   : > { %v3770_v27 = vpop.f32.mrf.mxu0 }
 0x439   : > { %v3368_v9 = vadd.f32 %v3326_v59, %v9397_v1  ;;  %4305 = vmatmul.bf16.gmra.mxu2 %v7217_v56  ;;  %v7933_v59 = vld [vmem:[%s8213_s18 + $0x1a4] sm:$0xf] }
 0x43a   : > { %v3859_v16 = vpop.f32.mrf.mxu1 }
 0x43b   : > { %v3860_v8 = vadd.f32 %v3859_v16, %v3770_v27  ;;  %4349 = vmatmul.bf16.gmra.mxu3 %v7149_v34  ;;  %4791 = vmatmul.bf16.gmra.mxu0 %v7401_v20  ;;  %v9777_v62 = vadd.f32 %v3857_v45, %v3368_v9  ;;  %v8017_v45 = vld [vmem:[%s10094_s4] sm:$0xff]  ;;  %v7154_v20 = vld [vmem:[%s8213_s18 + $0x1a8] sm:$0xf0] }
 0x43c   : > { %v9781_v23 = vpop.f32.mrf.mxu2  ;;  %v7408_v27 = vld [vmem:[%s8213_s18 + $0x2c0] sm:$0xf]  ;;  %5163 = vmatpush.bf16.msra.mxu2 %v8017_v45  ;;  %v7410_v9 = vld [vmem:[%s8213_s18 + $0x2c8] sm:$0xf0]  ;;  %v7157_v40 = vor.u32 %v7933_v59, %v7154_v20  ;;  %v7952_v45 = vld [vmem:[%s8213_s18 + $0x234] sm:$0xf0] }
 0x43d   : > { %10115 = vst [vmem:[#allocation7_spill] sm:$0xff] %v9777_v62  ;;  %4880 = vmatmul.bf16.gmra.mxu1 %v7405_v28  ;;  %v7982_v28 = vld [vmem:[%s8213_s18 + $0x2c4] sm:$0xf0] }
 0x43e   : > { %v3328_v42 = vpop.f32.mrf.mxu3  ;;  %v7409_v56 = vor.u32 %v7982_v28, %v7408_v27 }
 0x43f   : > { %v3329_v1 = vadd.f32 %v3328_v42, %v9583_v55  ;;  %v7981_v55 = vld [vmem:[%s8213_s18 + $0x2c4] sm:$0xf] }
 0x440   : > { %v3772_v49 = vpop.f32.mrf.mxu0 }
 0x441   : > { %v3369_v11 = vadd.f32 %v3329_v1, %v10116_v50  ;;  %v7413_v1 = vor.u32 %v7981_v55, %v7410_v9  ;;  %v10120_v55 = vld [vmem:[#allocation3_spill] sm:$0xff] }
 0x442   : > { %v3861_v18 = vpop.f32.mrf.mxu1 }
 0x443   : > { %v3862_v12 = vadd.f32 %v3861_v18, %v3772_v49  ;;  %v9787_v34 = vadd.f32 %v3860_v8, %v3369_v11  ;;  %v10118_v49 = vld [vmem:[#allocation2_spill] sm:$0xff]  ;;  %v7224_v11 = vld [vmem:[%s8213_s18 + $0x230] sm:$0xf] }
 0x444   : > { %v7225_v59 = vor.u32 %v7952_v45, %v7224_v11 }
 0x445   : > { %10117 = vst [vmem:[#allocation8_spill] sm:$0xff] %v9787_v34 }
 0x446   : > { %v3330_v16 = vpop.f32.mrf.mxu3 }
 0x447   : > { %v3331_v24 = vadd.f32 %v3330_v16, %v9601_v51  ;;  %v9800_v51 = vpop.f32.mrf.mxu2 }
 0x448   : > { %v3775_v42 = vpop.f32.mrf.mxu0 }
 0x449   : > { %v3370_v50 = vadd.f32 %v3331_v24, %v10118_v49  ;;  %4310 = vmatmul.bf16.gmra.mxu2 %v7225_v59  ;;  %v7984_v49 = vld [vmem:[%s8213_s18 + $0x2d4] sm:$0xf0] }
 0x44a   : > { %v3864_v18 = vpop.f32.mrf.mxu1 }
 0x44b   : > { %v3865_v8 = vadd.f32 %v3864_v18, %v3775_v42  ;;  %4354 = vmatmul.bf16.gmra.mxu3 %v7157_v40  ;;  %4796 = vmatmul.bf16.gmra.mxu0 %v7409_v56  ;;  %v9798_v34 = vadd.f32 %v3862_v12, %v3370_v50  ;;  %v7935_v40 = vld [vmem:[%s8213_s18 + $0x1b4] sm:$0xf]  ;;  %v7162_v12 = vld [vmem:[%s8213_s18 + $0x1b8] sm:$0xf0]  ;;  %v7416_v42 = vld [vmem:[%s8213_s18 + $0x2d0] sm:$0xf] }
 0x44c   : > { %v7418_v50 = vld [vmem:[%s8213_s18 + $0x2d8] sm:$0xf0]  ;;  %v7165_v45 = vor.u32 %v7935_v40, %v7162_v12 }
 0x44d   : > { %10119 = vst [vmem:[#allocation2_spill] sm:$0xff] %v9798_v34  ;;  %4885 = vmatmul.bf16.gmra.mxu1 %v7413_v1  ;;  %v7983_v1 = vld [vmem:[%s8213_s18 + $0x2d4] sm:$0xf] }
 0x44e   : > { %v3333_v20 = vpop.f32.mrf.mxu3 }
 0x44f   : > { %v3334_v27 = vadd.f32 %v3333_v20, %v9609_v41  ;;  %v9812_v34 = vpop.f32.mrf.mxu2  ;;  %v7417_v41 = vor.u32 %v7984_v49, %v7416_v42  ;;  %v7421_v20 = vor.u32 %v7983_v1, %v7418_v50  ;;  %v10124_v42 = vld [vmem:[#allocation5_spill] sm:$0xff] }
 0x450   : > { %v3777_v28 = vpop.f32.mrf.mxu0 }
 0x451   : > { %v3371_v9 = vadd.f32 %v3334_v27, %v10120_v55  ;;  %v10122_v27 = vld [vmem:[#allocation4_spill] sm:$0xff] }
 0x452   : > { %v3866_v16 = vpop.f32.mrf.mxu1 }
 0x453   : > { %v3867_v24 = vadd.f32 %v3866_v16, %v3777_v28  ;;  %v9805_v56 = vadd.f32 %v3865_v8, %v3371_v9 }
 0x455   : > { %10121 = vst [vmem:[#allocation3_spill] sm:$0xff] %v9805_v56 }
 0x456   : > { %v3335_v18 = vpop.f32.mrf.mxu3 }
 0x457   : > { %v3336_v11 = vadd.f32 %v3335_v18, %v9624_v47  ;;  %v9819_v12 = vpop.f32.mrf.mxu2  ;;  %v7937_v18 = vld [vmem:[%s8213_s18 + $0x1c4] sm:$0xf] }
 0x458   : > { %v3780_v59 = vpop.f32.mrf.mxu0 }
 0x459   : > { %v3372_v28 = vadd.f32 %v3336_v11, %v10122_v27  ;;  %v7985_v27 = vld [vmem:[%s8213_s18 + $0x2e4] sm:$0xf] }
 0x45a   : > { %v3869_v8 = vpop.f32.mrf.mxu1 }
 0x45b   : > { %v3870_v55 = vadd.f32 %v3869_v8, %v3780_v59  ;;  %4359 = vmatmul.bf16.gmra.mxu3 %v7165_v45  ;;  %4801 = vmatmul.bf16.gmra.mxu0 %v7417_v41  ;;  %v9816_v9 = vadd.f32 %v3867_v24, %v3372_v28  ;;  %v7170_v45 = vld [vmem:[%s8213_s18 + $0x1c8] sm:$0xf0]  ;;  %v7424_v59 = vld [vmem:[%s8213_s18 + $0x2e0] sm:$0xf]  ;;  %v7986_v41 = vld [vmem:[%s8213_s18 + $0x2e4] sm:$0xf0] }
 0x45c   : > { %v7426_v24 = vld [vmem:[%s8213_s18 + $0x2e8] sm:$0xf0]  ;;  %v7173_v8 = vor.u32 %v7937_v18, %v7170_v45  ;;  %v10127_v45 = vld [vmem:[#allocation6_spill] sm:$0xff] }
 0x45d   : > { %10123 = vst [vmem:[#allocation4_spill] sm:$0xff] %v9816_v9  ;;  %4890 = vmatmul.bf16.gmra.mxu1 %v7421_v20  ;;  %v7429_v9 = vor.u32 %v7985_v27, %v7426_v24  ;;  %v7178_v27 = vld [vmem:[%s8213_s18 + $0x1d8] sm:$0xf0]  ;;  %v7432_v24 = vld [vmem:[%s8213_s18 + $0x2f0] sm:$0xf] }
 0x45e   : > { %v3338_v47 = vpop.f32.mrf.mxu3 }
 0x45f   : > { %v3339_v16 = vadd.f32 %v3338_v47, %v9632_v44  ;;  %v7425_v44 = vor.u32 %v7986_v41, %v7424_v59 }
 0x460   : > { %v3782_v40 = vpop.f32.mrf.mxu0 }
 0x461   : > { %v3373_v49 = vadd.f32 %v3339_v16, %v10124_v42 }
 0x462   : > { %v3871_v1 = vpop.f32.mrf.mxu1 }
 0x463   : > { %v3872_v50 = vadd.f32 %v3871_v1, %v3782_v40  ;;  %v9823_v11 = vadd.f32 %v3870_v55, %v3373_v49  ;;  %v9832_v40 = vpop.f32.mrf.mxu2 }
 0x465   : > { %10125 = vst [vmem:[#allocation5_spill] sm:$0xff] %v9823_v11 }
 0x466   : > { %v3340_v28 = vpop.f32.mrf.mxu3 }
 0x467   : > { %v3341_v20 = vadd.f32 %v3340_v28, %v9644_v13  ;;  %v7988_v28 = vld [vmem:[%s8213_s18 + $0x2f4] sm:$0xf0] }
 0x468   : > { %v4767_v47 = vpop.f32.mrf.mxu0 }
 0x469   : > { %v3374_v16 = vadd.f32 %v3341_v20, %v9472_v31  ;;  %v7939_v31 = vld [vmem:[%s8213_s18 + $0x1d4] sm:$0xf] }
 0x46a   : > { %v4856_v55 = vpop.f32.mrf.mxu1 }
 0x46b   : > { %4364 = vmatmul.bf16.gmra.mxu3 %v7173_v8  ;;  %4806 = vmatmul.bf16.gmra.mxu0 %v7425_v44  ;;  %v9834_v42 = vadd.f32 %v3872_v50, %v3374_v16  ;;  %v4857_v18 = vadd.f32 %v4856_v55, %v4767_v47  ;;  %v9842_v20 = vpop.f32.mrf.mxu2  ;;  %v9847_v50 = vld [vmem:[%s10092_s2] ss:$0 sm:$0xff]  ;;  %v7434_v44 = vld [vmem:[%s8213_s18 + $0x2f8] sm:$0xf0]  ;;  %v7181_v16 = vor.u32 %v7939_v31, %v7178_v27 }
 0x46c   : > { %v7433_v55 = vor.u32 %v7988_v28, %v7432_v24 }
 0x46d   : > { %10126 = vst [vmem:[#allocation9_spill] sm:$0xff] %v9834_v42  ;;  %4895 = vmatmul.bf16.gmra.mxu1 %v7429_v9  ;;  %v7987_v9 = vld [vmem:[%s8213_s18 + $0x2f4] sm:$0xf] }
 0x46e   : > { %v4325_v13 = vpop.f32.mrf.mxu3 }
 0x46f   : > { %v4326_v49 = vadd.f32 %v4325_v13, %v9652_v33 }
 0x470   : > { %v4769_v1 = vpop.f32.mrf.mxu0 }
 0x471   : > { %v4405_v59 = vadd.f32 %v4326_v49, %v10127_v45  ;;  %v7437_v49 = vor.u32 %v7987_v9, %v7434_v44 }
 0x472   : > { %v4858_v41 = vpop.f32.mrf.mxu1 }
 0x473   : > { %v4936_v8 = vadd.f32 %v4857_v18, %v4405_v59  ;;  %v9856_v18 = vld [vmem:[%s10093_s3] ss:$0 sm:$0xff]  ;;  %v4859_v59 = vadd.f32 %v4858_v41, %v4769_v1  ;;  %v9861_v24 = vpop.f32.mrf.mxu2 }
 0x475   : > { %v4972_v45 = vmul.f32 %v9847_v50, %v4936_v8 }
 0x476   : > { %v4327_v33 = vpop.f32.mrf.mxu3 }
 0x477   : > { %v4328_v47 = vadd.f32 %v4327_v33, %v9667_v48  ;;  %v5008_v48 = vadd.f32 %v9856_v18, %v4972_v45  ;;  %v7989_v45 = vld [vmem:[%s8213_s18 + $0x304] sm:$0xf] }
 0x478   : > { %v4772_v13 = vpop.f32.mrf.mxu0 }
 0x479   : > { %v4406_v42 = vadd.f32 %v4328_v47, %v9501_v14  ;;  %v5040_v41 = vmax.f32 %v5008_v48, 0.0  ;;  %v7941_v47 = vld [vmem:[%s8213_s18 + $0x1e4] sm:$0xf] }
 0x47a   : > { %v4861_v11 = vpop.f32.mrf.mxu1 }
 0x47b   : > { %v4937_v56 = vadd.f32 %v4859_v59, %v4406_v42  ;;  %4369 = vmatmul.bf16.gmra.mxu3 %v7181_v16  ;;  %4811 = vmatmul.bf16.gmra.mxu0 %v7433_v55  ;;  %v4862_v8 = vadd.f32 %v4861_v11, %v4772_v13  ;;  %v7186_v16 = vld [vmem:[%s8213_s18 + $0x1e8] sm:$0xf0]  ;;  %v7990_v55 = vld [vmem:[%s8213_s18 + $0x304] sm:$0xf0]  ;;  %v9873_v11 = vpop.f32.mrf.mxu2 }
 0x47c   : > { %v7442_v59 = vld [vmem:[%s8213_s18 + $0x308] sm:$0xf0] }
 0x47d   : > { %4900 = vmatmul.bf16.gmra.mxu1 %v7437_v49  ;;  %v4973_v31 = vmul.f32 %v9847_v50, %v4937_v56  ;;  %v7440_v56 = vld [vmem:[%s8213_s18 + $0x300] sm:$0xf] }
 0x47e   : > { %v4330_v27 = vpop.f32.mrf.mxu3 }
 0x47f   : > { %v5009_v1 = vadd.f32 %v9856_v18, %v4973_v31  ;;  %v4331_v14 = vadd.f32 %v4330_v27, %v9675_v54  ;;  %v7189_v54 = vor.u32 %v7941_v47, %v7186_v16  ;;  %v7441_v27 = vor.u32 %v7990_v55, %v7440_v56 }
 0x480   : > { %v4774_v42 = vpop.f32.mrf.mxu0 }
 0x481   : > { %v5041_v28 = vmax.f32 %v5009_v1, 0.0  ;;  %v4407_v9 = vadd.f32 %v4331_v14, %v9511_v52  ;;  %v7445_v1 = vor.u32 %v7989_v45, %v7442_v59  ;;  %v7943_v45 = vld [vmem:[%s8213_s18 + $0x1f4] sm:$0xf]  ;;  %v7194_v59 = vld [vmem:[%s8213_s18 + $0x1f8] sm:$0xf0] }
 0x482   : > { %v4863_v44 = vpop.f32.mrf.mxu1 }
 0x483   : > { %v5072_v33 = vpack.c.bf16 %v5041_v28, %v5040_v41  ;;  %v4938_v49 = vadd.f32 %v4862_v8, %v4407_v9  ;;  %v4864_v13 = vadd.f32 %v4863_v44, %v4774_v42  ;;  %v9882_v55 = vpop.f32.mrf.mxu2 }
 0x485   : > { %5164 = vmatmul.bf16.vlgmr.msra.gmra.mxu2 %v5072_v33  ;;  %v4974_v52 = vmul.f32 %v9847_v50, %v4938_v49 }
 0x486   : > { %v4332_v31 = vpop.f32.mrf.mxu3 }
 0x487   : > { %v4333_v62 = vadd.f32 %v4332_v31, %v9687_v60  ;;  %v5010_v8 = vadd.f32 %v9856_v18, %v4974_v52  ;;  %v7448_v31 = vld [vmem:[%s8213_s18 + $0x310] sm:$0xf] }
 0x488   : > { %v4777_v48 = vpop.f32.mrf.mxu0 }
 0x489   : > { %v4408_v14 = vadd.f32 %v4333_v62, %v9524_v21  ;;  %v5042_v16 = vmax.f32 %v5010_v8, 0.0 }
 0x48a   : > { %v4866_v41 = vpop.f32.mrf.mxu1 }
 0x48b   : > { %v4939_v28 = vadd.f32 %v4864_v13, %v4408_v14  ;;  %4374 = vmatmul.bf16.gmra.mxu3 %v7189_v54  ;;  %4816 = vmatmul.bf16.gmra.mxu0 %v7441_v27  ;;  %v4867_v62 = vadd.f32 %v4866_v41, %v4777_v48  ;;  %v7992_v54 = vld [vmem:[%s8213_s18 + $0x314] sm:$0xf0]  ;;  %v7197_v48 = vor.u32 %v7943_v45, %v7194_v59 }
 0x48c   : > { %v7449_v14 = vor.u32 %v7992_v54, %v7448_v31  ;;  %v7945_v54 = vld [vmem:[%s8213_s18 + $0x204] sm:$0xf] }
 0x48d   : > { %4905 = vmatmul.bf16.gmra.mxu1 %v7445_v1  ;;  %v4975_v60 = vmul.f32 %v9847_v50, %v4939_v28  ;;  %v7450_v1 = vld [vmem:[%s8213_s18 + $0x318] sm:$0xf0] }
 0x48e   : > { %v4335_v9 = vpop.f32.mrf.mxu3 }
 0x48f   : > { %v4336_v33 = vadd.f32 %v4335_v9, %v9695_v29  ;;  %v5011_v42 = vadd.f32 %v9856_v18, %v4975_v60  ;;  %v7991_v29 = vld [vmem:[%s8213_s18 + $0x314] sm:$0xf] }
 0x490   : > { %v4779_v21 = vpop.f32.mrf.mxu0  ;;  %v7453_v41 = vor.u32 %v7991_v29, %v7450_v1  ;;  %v7456_v29 = vld [vmem:[%s8213_s18 + $0x320] sm:$0xf]  ;;  %v7994_v1 = vld [vmem:[%s8213_s18 + $0x324] sm:$0xf0] }
 0x491   : > { %v4409_v44 = vadd.f32 %v4336_v33, %v9540_v10  ;;  %v5043_v56 = vmax.f32 %v5011_v42, 0.0  ;;  %v9893_v42 = vpop.f32.mrf.mxu2 }
 0x492   : > { %v4868_v47 = vpop.f32.mrf.mxu1 }
 0x493   : > { %v5073_v49 = vpack.c.bf16 %v5043_v56, %v5042_v16  ;;  %v4940_v27 = vadd.f32 %v4867_v62, %v4409_v44  ;;  %v4869_v60 = vadd.f32 %v4868_v47, %v4779_v21 }
 0x495   : > { %5169 = vmatmul.bf16.gmra.mxu2 %v5073_v49  ;;  %v4976_v28 = vmul.f32 %v9847_v50, %v4940_v27  ;;  %v7202_v27 = vld [vmem:[%s8213_s18 + $0x208] sm:$0xf0] }
 0x496   : > { %v4337_v52 = vpop.f32.mrf.mxu3 }
 0x497   : > { %v4338_v13 = vadd.f32 %v4337_v52, %v9710_v17  ;;  %v5012_v62 = vadd.f32 %v9856_v18, %v4976_v28  ;;  %v7457_v28 = vor.u32 %v7994_v1, %v7456_v29  ;;  %v7210_v29 = vld [vmem:[%s8213_s18 + $0x218] sm:$0xf0]  ;;  %v7464_v1 = vld [vmem:[%s8213_s18 + $0x330] sm:$0xf] }
 0x498   : > { %v4782_v10 = vpop.f32.mrf.mxu0 }
 0x499   : > { %v4410_v8 = vadd.f32 %v4338_v13, %v9553_v5  ;;  %v5044_v45 = vmax.f32 %v5012_v62, 0.0  ;;  %v7993_v13 = vld [vmem:[%s8213_s18 + $0x324] sm:$0xf] }
 0x49a   : > { %v4871_v9 = vpop.f32.mrf.mxu1 }
 0x49b   : > { %v4941_v33 = vadd.f32 %v4869_v60, %v4410_v8  ;;  %4379 = vmatmul.bf16.gmra.mxu3 %v7197_v48  ;;  %4821 = vmatmul.bf16.gmra.mxu0 %v7449_v14  ;;  %v4872_v16 = vadd.f32 %v4871_v9, %v4782_v10  ;;  %v7458_v48 = vld [vmem:[%s8213_s18 + $0x328] sm:$0xf0]  ;;  %v9906_v14 = vpop.f32.mrf.mxu2  ;;  %v7205_v10 = vor.u32 %v7945_v54, %v7202_v27  ;;  %v7947_v27 = vld [vmem:[%s8213_s18 + $0x214] sm:$0xf] }
 0x49c   : > { %v7461_v60 = vor.u32 %v7993_v13, %v7458_v48  ;;  %v7466_v48 = vld [vmem:[%s8213_s18 + $0x338] sm:$0xf0] }
 0x49d   : > { %4910 = vmatmul.bf16.gmra.mxu1 %v7453_v41  ;;  %v4977_v17 = vmul.f32 %v9847_v50, %v4941_v33 }
 0x49e   : > { %v4340_v44 = vpop.f32.mrf.mxu3 }
 0x49f   : > { %v4341_v21 = vadd.f32 %v4340_v44, %v9718_v63  ;;  %v5013_v5 = vadd.f32 %v9856_v18, %v4977_v17 }
 0x4a0   : > { %v4784_v47 = vpop.f32.mrf.mxu0 }
 0x4a1   : > { %v4411_v56 = vadd.f32 %v4341_v21, %v9563_v15  ;;  %v5045_v59 = vmax.f32 %v5013_v5, 0.0 }
 0x4a2   : > { %v4873_v49 = vpop.f32.mrf.mxu1 }
 0x4a3   : > { %v5074_v31 = vpack.c.bf16 %v5045_v59, %v5044_v45  ;;  %v4942_v52 = vadd.f32 %v4872_v16, %v4411_v56  ;;  %v4874_v9 = vadd.f32 %v4873_v49, %v4784_v47  ;;  %v9915_v16 = vpop.f32.mrf.mxu2 }
 0x4a5   : > { %5174 = vmatmul.bf16.gmra.mxu2 %v5074_v31  ;;  %v4978_v8 = vmul.f32 %v9847_v50, %v4942_v52  ;;  %v7996_v52 = vld [vmem:[%s8213_s18 + $0x334] sm:$0xf0] }
 0x4a6   : > { %v4342_v63 = vpop.f32.mrf.mxu3 }
 0x4a7   : > { %v4343_v41 = vadd.f32 %v4342_v63, %v9730_v22  ;;  %v5014_v22 = vadd.f32 %v9856_v18, %v4978_v8 }
 0x4a8   : > { %v4787_v15 = vpop.f32.mrf.mxu0 }
 0x4a9   : > { %v4412_v33 = vadd.f32 %v4343_v41, %v9576_v19  ;;  %v5046_v59 = vmax.f32 %v5014_v22, 0.0 }
 0x4aa   : > { %v4876_v17 = vpop.f32.mrf.mxu1 }
 0x4ab   : > { %v4943_v62 = vadd.f32 %v4874_v9, %v4412_v33  ;;  %4384 = vmatmul.bf16.gmra.mxu3 %v7205_v10  ;;  %4826 = vmatmul.bf16.gmra.mxu0 %v7457_v28  ;;  %v4877_v56 = vadd.f32 %v4876_v17, %v4787_v15  ;;  %v7213_v10 = vor.u32 %v7947_v27, %v7210_v29  ;;  %v9927_v17 = vpop.f32.mrf.mxu2  ;;  %v7218_v27 = vld [vmem:[%s8213_s18 + $0x228] sm:$0xf0]  ;;  %v7472_v29 = vld [vmem:[%s8213_s18 + $0x340] sm:$0xf] }
 0x4ac   : > { %v7465_v28 = vor.u32 %v7996_v52, %v7464_v1  ;;  %v7998_v1 = vld [vmem:[%s8213_s18 + $0x344] sm:$0xf0] }
 0x4ad   : > { %4915 = vmatmul.bf16.gmra.mxu1 %v7461_v60  ;;  %v4979_v44 = vmul.f32 %v9847_v50, %v4943_v62 }
 0x4ae   : > { %v4345_v21 = vpop.f32.mrf.mxu3 }
 0x4af   : > { %v4346_v5 = vadd.f32 %v4345_v21, %v9738_v39  ;;  %v5015_v47 = vadd.f32 %v9856_v18, %v4979_v44  ;;  %v7995_v39 = vld [vmem:[%s8213_s18 + $0x334] sm:$0xf] }
 0x4b0   : > { %v4789_v19 = vpop.f32.mrf.mxu0  ;;  %v7469_v60 = vor.u32 %v7995_v39, %v7466_v48 }
 0x4b1   : > { %v4413_v49 = vadd.f32 %v4346_v5, %v9592_v37  ;;  %v5047_v31 = vmax.f32 %v5015_v47, 0.0 }
 0x4b2   : > { %v4878_v45 = vpop.f32.mrf.mxu1 }
 0x4b3   : > { %v5075_v54 = vpack.c.bf16 %v5047_v31, %v5046_v59  ;;  %v4944_v13 = vadd.f32 %v4877_v56, %v4413_v49  ;;  %v4879_v8 = vadd.f32 %v4878_v45, %v4789_v19  ;;  %v7949_v31 = vld [vmem:[%s8213_s18 + $0x224] sm:$0xf] }
 0x4b5   : > { %5179 = vmatmul.bf16.gmra.mxu2 %v5075_v54  ;;  %v4980_v37 = vmul.f32 %v9847_v50, %v4944_v13  ;;  %v9935_v54 = vpop.f32.mrf.mxu2  ;;  %v7474_v13 = vld [vmem:[%s8213_s18 + $0x348] sm:$0xf0] }
 0x4b6   : > { %v4347_v63 = vpop.f32.mrf.mxu3 }
 0x4b7   : > { %v4348_v41 = vadd.f32 %v4347_v63, %v9753_v57  ;;  %v5016_v44 = vadd.f32 %v9856_v18, %v4980_v37  ;;  %v7221_v63 = vor.u32 %v7949_v31, %v7218_v27  ;;  %v7999_v27 = vld [vmem:[%s8213_s18 + $0x354] sm:$0xf] }
 0x4b8   : > { %v4792_v15 = vpop.f32.mrf.mxu0 }
 0x4b9   : > { %v4414_v9 = vadd.f32 %v4348_v41, %v9605_v26  ;;  %v5048_v49 = vmax.f32 %v5016_v44, 0.0  ;;  %v7473_v41 = vor.u32 %v7998_v1, %v7472_v29  ;;  %v7482_v29 = vld [vmem:[%s8213_s18 + $0x358] sm:$0xf0] }
 0x4ba   : > { %v4881_v33 = vpop.f32.mrf.mxu1 }
 0x4bb   : > { %v4945_v62 = vadd.f32 %v4879_v8, %v4414_v9  ;;  %4389 = vmatmul.bf16.gmra.mxu3 %v7213_v10  ;;  %4831 = vmatmul.bf16.gmra.mxu0 %v7465_v28  ;;  %v4882_v47 = vadd.f32 %v4881_v33, %v4792_v15 }
 0x4bd   : > { %4920 = vmatmul.bf16.gmra.mxu1 %v7469_v60  ;;  %v4981_v57 = vmul.f32 %v9847_v50, %v4945_v62  ;;  %v9947_v62 = vpop.f32.mrf.mxu2 }
 0x4be   : > { %v4350_v22 = vpop.f32.mrf.mxu3 }
 0x4bf   : > { %v4351_v21 = vadd.f32 %v4350_v22, %v9761_v30  ;;  %v5017_v26 = vadd.f32 %v9856_v18, %v4981_v57  ;;  %v7997_v30 = vld [vmem:[%s8213_s18 + $0x344] sm:$0xf] }
 0x4c0   : > { %v4794_v5 = vpop.f32.mrf.mxu0  ;;  %v7477_v10 = vor.u32 %v7997_v30, %v7474_v13 }
 0x4c1   : > { %v4415_v19 = vadd.f32 %v4351_v21, %v9615_v6  ;;  %v5049_v45 = vmax.f32 %v5017_v26, 0.0 }
 0x4c2   : > { %v4883_v56 = vpop.f32.mrf.mxu1 }
 0x4c3   : > { %v5076_v59 = vpack.c.bf16 %v5049_v45, %v5048_v49  ;;  %v4946_v52 = vadd.f32 %v4882_v47, %v4415_v19  ;;  %v4884_v15 = vadd.f32 %v4883_v56, %v4794_v5  ;;  %v7951_v56 = vld [vmem:[%s8213_s18 + $0x234] sm:$0xf]  ;;  %v7226_v49 = vld [vmem:[%s8213_s18 + $0x238] sm:$0xf0]  ;;  %v7480_v45 = vld [vmem:[%s8213_s18 + $0x350] sm:$0xf] }
 0x4c5   : > { %5184 = vmatmul.bf16.gmra.mxu2 %v5076_v59  ;;  %v4982_v28 = vmul.f32 %v9847_v50, %v4946_v52  ;;  %v8000_v59 = vld [vmem:[%s8213_s18 + $0x354] sm:$0xf0]  ;;  %v7229_v52 = vor.u32 %v7951_v56, %v7226_v49  ;;  %v9959_v13 = vpop.f32.mrf.mxu2 }
 0x4c6   : > { %v4352_v39 = vpop.f32.mrf.mxu3  ;;  %v7481_v30 = vor.u32 %v8000_v59, %v7480_v45 }
 0x4c7   : > { %v4353_v48 = vadd.f32 %v4352_v39, %v9773_v7  ;;  %v5018_v7 = vadd.f32 %v9856_v18, %v4982_v28  ;;  %v7485_v39 = vor.u32 %v7999_v27, %v7482_v29 }
 0x4c8   : > { %v4797_v6 = vpop.f32.mrf.mxu0 }
 0x4c9   : > { %v4416_v60 = vadd.f32 %v4353_v48, %v9628_v46  ;;  %v5050_v5 = vmax.f32 %v5018_v7, 0.0 }
 0x4ca   : > { %v4886_v37 = vpop.f32.mrf.mxu1 }
 0x4cb   : > { %v4947_v8 = vadd.f32 %v4884_v15, %v4416_v60  ;;  %4394 = vmatmul.bf16.gmra.mxu3 %v7221_v63  ;;  %4836 = vmatmul.bf16.gmra.mxu0 %v7473_v41  ;;  %v4887_v22 = vadd.f32 %v4886_v37, %v4797_v6 }
 0x4cd   : > { %4925 = vmatmul.bf16.gmra.mxu1 %v7477_v10  ;;  %v4983_v9 = vmul.f32 %v9847_v50, %v4947_v8 }
 0x4ce   : > { %v4355_v33 = vpop.f32.mrf.mxu3 }
 0x4cf   : > { %v4356_v57 = vadd.f32 %v4355_v33, %v9781_v23  ;;  %v5019_v46 = vadd.f32 %v9856_v18, %v4983_v9 }
 0x4d0   : > { %v4799_v44 = vpop.f32.mrf.mxu0 }
 0x4d1   : > { %v4417_v21 = vadd.f32 %v4356_v57, %v9635_v3  ;;  %v5051_v47 = vmax.f32 %v5019_v46, 0.0  ;;  %v9968_v46 = vpop.f32.mrf.mxu2 }
 0x4d2   : > { %v4888_v26 = vpop.f32.mrf.mxu1 }
 0x4d3   : > { %v5077_v19 = vpack.c.bf16 %v5051_v47, %v5050_v5  ;;  %v4948_v31 = vadd.f32 %v4887_v22, %v4417_v21  ;;  %v4889_v63 = vadd.f32 %v4888_v26, %v4799_v44 }
 0x4d5   : > { %5189 = vmatmul.bf16.gmra.mxu2 %v5077_v19  ;;  %v4984_v48 = vmul.f32 %v9847_v50, %v4948_v31 }
 0x4d6   : > { %v4357_v23 = vpop.f32.mrf.mxu3 }
 0x4d7   : > { %v4358_v1 = vadd.f32 %v4357_v23, %v9800_v51  ;;  %v5020_v51 = vadd.f32 %v9856_v18, %v4984_v48 }
 0x4d8   : > { %v4802_v3 = vpop.f32.mrf.mxu0 }
 0x4d9   : > { %v4418_v41 = vadd.f32 %v4358_v1, %v9648_v36  ;;  %v5052_v36 = vmax.f32 %v5020_v51, 0.0 }
 0x4da   : > { %v4891_v6 = vpop.f32.mrf.mxu1 }
 0x4db   : > { %v4949_v10 = vadd.f32 %v4889_v63, %v4418_v41  ;;  %4399 = vmatmul.bf16.gmra.mxu3 %v7229_v52  ;;  %4841 = vmatmul.bf16.gmra.mxu0 %v7481_v30  ;;  %v4892_v9 = vadd.f32 %v4891_v6, %v4802_v3 }
 0x4dd   : > { %4930 = vmatmul.bf16.gmra.mxu1 %v7485_v39  ;;  %v4985_v28 = vmul.f32 %v9847_v50, %v4949_v10 }
 0x4de   : > { %v4360_v15 = vpop.f32.mrf.mxu3 }
 0x4df   : > { %v4361_v60 = vadd.f32 %v4360_v15, %v9812_v34  ;;  %v5021_v37 = vadd.f32 %v9856_v18, %v4985_v28 }
 0x4e0   : > { %v4804_v8 = vpop.f32.mrf.mxu0 }
 0x4e1   : > { %v4419_v7 = vadd.f32 %v4361_v60, %v9658_v4  ;;  %v5053_v57 = vmax.f32 %v5021_v37, 0.0  ;;  %v9973_v4 = vpop.f32.mrf.mxu2 }
 0x4e2   : > { %v4893_v33 = vpop.f32.mrf.mxu1 }
 0x4e3   : > { %v5078_v44 = vpack.c.bf16 %v5053_v57, %v5052_v36  ;;  %v4950_v22 = vadd.f32 %v4892_v9, %v4419_v7  ;;  %v4894_v47 = vadd.f32 %v4893_v33, %v4804_v8 }
 0x4e5   : > { %5194 = vmatmul.bf16.gmra.mxu2 %v5078_v44  ;;  %v4986_v34 = vmul.f32 %v9847_v50, %v4950_v22 }
 0x4e6   : > { %v4362_v21 = vpop.f32.mrf.mxu3 }
 0x4e7   : > { %v4363_v26 = vadd.f32 %v4362_v21, %v9819_v12  ;;  %v5022_v59 = vadd.f32 %v9856_v18, %v4986_v34 }
 0x4e8   : > { %v4807_v5 = vpop.f32.mrf.mxu0 }
 0x4e9   : > { %v4420_v19 = vadd.f32 %v4363_v26, %v9671_v38  ;;  %v5054_v30 = vmax.f32 %v5022_v59, 0.0  ;;  %v9980_v48 = vpop.f32.mrf.mxu2  ;;  %v9995_v26 = vld [vmem:[%s10095_s5] ss:$0 sm:$0xff] }
 0x4ea   : > { %v4896_v56 = vpop.f32.mrf.mxu1 }
 0x4eb   : > { %v4951_v49 = vadd.f32 %v4894_v47, %v4420_v19  ;;  %v4897_v23 = vadd.f32 %v4896_v56, %v4807_v5 }
 0x4ed   : > { %v4987_v45 = vmul.f32 %v9847_v50, %v4951_v49 }
 0x4ee   : > { %v4365_v31 = vpop.f32.mrf.mxu3 }
 0x4ef   : > { %v4366_v27 = vadd.f32 %v4365_v31, %v9832_v40  ;;  %v5023_v29 = vadd.f32 %v9856_v18, %v4987_v45 }
 0x4f0   : > { %v4809_v12 = vpop.f32.mrf.mxu0 }
 0x4f1   : > { %v4421_v1 = vadd.f32 %v4366_v27, %v9678_v58  ;;  %v5055_v38 = vmax.f32 %v5023_v29, 0.0  ;;  %v9989_v7 = vpop.f32.mrf.mxu2 }
 0x4f2   : > { %v4898_v52 = vpop.f32.mrf.mxu1 }
 0x4f3   : > { %v5079_v3 = vpack.c.bf16 %v5055_v38, %v5054_v30  ;;  %v4952_v39 = vadd.f32 %v4897_v23, %v4421_v1  ;;  %v4899_v10 = vadd.f32 %v4898_v52, %v4809_v12 }
 0x4f5   : > { %5199 = vmatmul.bf16.gmra.mxu2 %v5079_v3  ;;  %v4988_v40 = vmul.f32 %v9847_v50, %v4952_v39 }
 0x4f6   : > { %v4367_v63 = vpop.f32.mrf.mxu3 }
 0x4f7   : > { %v4368_v41 = vadd.f32 %v4367_v63, %v9842_v20  ;;  %v5024_v60 = vadd.f32 %v9856_v18, %v4988_v40 }
 0x4f8   : > { %v4812_v6 = vpop.f32.mrf.mxu0 }
 0x4f9   : > { %v4422_v28 = vadd.f32 %v4368_v41, %v9691_v32  ;;  %v5056_v44 = vmax.f32 %v5024_v60, 0.0 }
 0x4fa   : > { %v4901_v51 = vpop.f32.mrf.mxu1 }
 0x4fb   : > { %v4953_v15 = vadd.f32 %v4899_v10, %v4422_v28  ;;  %v4902_v33 = vadd.f32 %v4901_v51, %v4812_v6 }
 0x4fd   : > { %v4989_v58 = vmul.f32 %v9847_v50, %v4953_v15 }
 0x4fe   : > { %v4370_v37 = vpop.f32.mrf.mxu3 }
 0x4ff   : > { %v4371_v8 = vadd.f32 %v4370_v37, %v9861_v24  ;;  %v5025_v9 = vadd.f32 %v9856_v18, %v4989_v58 }
 0x500   : > { %v4814_v20 = vpop.f32.mrf.mxu0 }
 0x501   : > { %v4423_v36 = vadd.f32 %v4371_v8, %v9701_v25  ;;  %v5057_v32 = vmax.f32 %v5025_v9, 0.0 }
 0x502   : > { %v4903_v57 = vpop.f32.mrf.mxu1 }
 0x503   : > { %v5080_v22 = vpack.c.bf16 %v5057_v32, %v5056_v44  ;;  %v4954_v21 = vadd.f32 %v4902_v33, %v4423_v36  ;;  %v4904_v56 = vadd.f32 %v4903_v57, %v4814_v20 }
 0x505   : > { %5204 = vmatmul.bf16.gmra.mxu2 %v5080_v22  ;;  %v4990_v19 = vmul.f32 %v9847_v50, %v4954_v21 }
 0x506   : > { %v4372_v24 = vpop.f32.mrf.mxu3 }
 0x507   : > { %v4373_v5 = vadd.f32 %v4372_v24, %v9873_v11  ;;  %v5026_v27 = vadd.f32 %v9856_v18, %v4990_v19 }
 0x508   : > { %v4817_v34 = vpop.f32.mrf.mxu0  ;;  %v5165_v47 = vpop.f32.mrf.mxu2 }
 0x509   : > { %v4424_v25 = vadd.f32 %v4373_v5, %v9714_v53  ;;  %v5166_v45 = vadd.f32 %v9995_v26, %v5165_v47  ;;  %v5058_v3 = vmax.f32 %v5026_v27, 0.0 }
 0x50a   : > { %v4906_v49 = vpop.f32.mrf.mxu1 }
 0x50b   : > { %v4955_v59 = vadd.f32 %v4904_v56, %v4424_v25  ;;  %5245 = vxpose.xlu0.b32.start [1/16] (narrow) %v5166_v45, 8  ;;  %v4907_v23 = vadd.f32 %v4906_v49, %v4817_v34 }
 0x50d   : > { %v4991_v31 = vmul.f32 %v9847_v50, %v4955_v59 }
 0x50e   : > { %v4375_v29 = vpop.f32.mrf.mxu3 }
 0x50f   : > { %v4376_v12 = vadd.f32 %v4375_v29, %v9882_v55  ;;  %v5027_v11 = vadd.f32 %v9856_v18, %v4991_v31 }
 0x510   : > { %v4819_v1 = vpop.f32.mrf.mxu0  ;;  %v5167_v52 = vpop.f32.mrf.mxu2 }
 0x511   : > { %v4425_v30 = vadd.f32 %v4376_v12, %v9721_v2  ;;  %v5168_v38 = vadd.f32 %v9995_v26, %v5167_v52  ;;  %v5059_v39 = vmax.f32 %v5027_v11, 0.0 }
 0x512   : > { %v4908_v53 = vpop.f32.mrf.mxu1 }
 0x513   : > { %5246 = vxpose.xlu0.b32.cont [2/16] (narrow) %v5168_v38, 8  ;;  %v5081_v63 = vpack.c.bf16 %v5059_v39, %v5058_v3  ;;  %v4956_v41 = vadd.f32 %v4907_v23, %v4425_v30  ;;  %v4909_v51 = vadd.f32 %v4908_v53, %v4819_v1 }
 0x515   : > { %5209 = vmatmul.bf16.gmra.mxu2 %v5081_v63  ;;  %v4992_v55 = vmul.f32 %v9847_v50, %v4956_v41 }
 0x516   : > { %v4377_v6 = vpop.f32.mrf.mxu3 }
 0x517   : > { %v4378_v40 = vadd.f32 %v4377_v6, %v9893_v42  ;;  %v5028_v37 = vadd.f32 %v9856_v18, %v4992_v55 }
 0x518   : > { %v4822_v10 = vpop.f32.mrf.mxu0  ;;  %v5170_v28 = vpop.f32.mrf.mxu2 }
 0x519   : > { %v4426_v15 = vadd.f32 %v4378_v40, %v9734_v35  ;;  %v5171_v58 = vadd.f32 %v9995_v26, %v5170_v28  ;;  %v5060_v57 = vmax.f32 %v5028_v37, 0.0 }
 0x51a   : > { %v4911_v2 = vpop.f32.mrf.mxu1 }
 0x51b   : > { %v4957_v60 = vadd.f32 %v4909_v51, %v4426_v15  ;;  %5247 = vxpose.xlu0.b32.cont [3/16] (narrow) %v5171_v58, 8  ;;  %v4912_v44 = vadd.f32 %v4911_v2, %v4822_v10  ;;  %v10128_v10 = vld [vmem:[#allocation7_spill] sm:$0xff] }
 0x51d   : > { %v4993_v8 = vmul.f32 %v9847_v50, %v4957_v60 }
 0x51e   : > { %v4380_v9 = vpop.f32.mrf.mxu3 }
 0x51f   : > { %v4381_v20 = vadd.f32 %v4380_v9, %v9906_v14  ;;  %v5029_v42 = vadd.f32 %v9856_v18, %v4993_v8 }
 0x520   : > { %v4824_v33 = vpop.f32.mrf.mxu0  ;;  %v5172_v36 = vpop.f32.mrf.mxu2 }
 0x521   : > { %v4427_v35 = vadd.f32 %v4381_v20, %v9744_v43  ;;  %v5173_v22 = vadd.f32 %v9995_v26, %v5172_v36  ;;  %v5061_v21 = vmax.f32 %v5029_v42, 0.0 }
 0x522   : > { %v4913_v32 = vpop.f32.mrf.mxu1 }
 0x523   : > { %5248 = vxpose.xlu0.b32.cont [4/16] (narrow) %v5173_v22, 8  ;;  %v5082_v24 = vpack.c.bf16 %v5061_v21, %v5060_v57  ;;  %v4958_v5 = vadd.f32 %v4912_v44, %v4427_v35  ;;  %v4914_v25 = vadd.f32 %v4913_v32, %v4824_v33  ;;  %v10129_v33 = vld [vmem:[#allocation8_spill] sm:$0xff] }
 0x525   : > { %5214 = vmatmul.bf16.gmra.mxu2 %v5082_v24  ;;  %v4994_v56 = vmul.f32 %v9847_v50, %v4958_v5 }
 0x526   : > { %v4382_v34 = vpop.f32.mrf.mxu3 }
 0x527   : > { %v4383_v47 = vadd.f32 %v4382_v34, %v9915_v16  ;;  %v5030_v27 = vadd.f32 %v9856_v18, %v4994_v56 }
 0x528   : > { %v4827_v14 = vpop.f32.mrf.mxu0  ;;  %v5175_v19 = vpop.f32.mrf.mxu2 }
 0x529   : > { %v4428_v49 = vadd.f32 %v4383_v47, %v9757_v0  ;;  %v5176_v43 = vadd.f32 %v9995_v26, %v5175_v19  ;;  %v5062_v53 = vmax.f32 %v5030_v27, 0.0 }
 0x52a   : > { %v4916_v45 = vpop.f32.mrf.mxu1 }
 0x52b   : > { %v4959_v59 = vadd.f32 %v4914_v25, %v4428_v49  ;;  %5249 = vxpose.xlu0.b32.cont [5/16] (narrow) %v5176_v43, 8  ;;  %v4917_v11 = vadd.f32 %v4916_v45, %v4827_v14  ;;  %v10130_v14 = vld [vmem:[#allocation2_spill] sm:$0xff] }
 0x52d   : > { %v4995_v31 = vmul.f32 %v9847_v50, %v4959_v59 }
 0x52e   : > { %v4385_v29 = vpop.f32.mrf.mxu3 }
 0x52f   : > { %v4386_v12 = vadd.f32 %v4385_v29, %v9927_v17  ;;  %v5031_v16 = vadd.f32 %v9856_v18, %v4995_v31 }
 0x530   : > { %v4829_v23 = vpop.f32.mrf.mxu0  ;;  %v5177_v1 = vpop.f32.mrf.mxu2 }
 0x531   : > { %v4429_v52 = vadd.f32 %v4386_v12, %v9764_v61  ;;  %v5178_v30 = vadd.f32 %v9995_v26, %v5177_v1  ;;  %v5063_v38 = vmax.f32 %v5031_v16, 0.0  ;;  %v10131_v12 = vld [vmem:[#allocation3_spill] sm:$0xff] }
 0x532   : > { %v4918_v0 = vpop.f32.mrf.mxu1 }
 0x533   : > { %5250 = vxpose.xlu0.b32.cont [6/16] (narrow) %v5178_v30, 8  ;;  %v5083_v3 = vpack.c.bf16 %v5063_v38, %v5062_v53  ;;  %v4960_v39 = vadd.f32 %v4917_v11, %v4429_v52  ;;  %v4919_v55 = vadd.f32 %v4918_v0, %v4829_v23 }
 0x535   : > { %5219 = vmatmul.bf16.gmra.mxu2 %v5083_v3  ;;  %v4996_v17 = vmul.f32 %v9847_v50, %v4960_v39 }
 0x536   : > { %v4387_v63 = vpop.f32.mrf.mxu3 }
 0x537   : > { %v4388_v41 = vadd.f32 %v4387_v63, %v9935_v54  ;;  %v5032_v2 = vadd.f32 %v9856_v18, %v4996_v17 }
 0x538   : > { %v4832_v6 = vpop.f32.mrf.mxu0  ;;  %v5180_v40 = vpop.f32.mrf.mxu2 }
 0x539   : > { %v4430_v28 = vadd.f32 %v4388_v41, %v10128_v10  ;;  %v5181_v51 = vadd.f32 %v9995_v26, %v5180_v40  ;;  %v5064_v20 = vmax.f32 %v5032_v2, 0.0  ;;  %v10132_v41 = vld [vmem:[#allocation4_spill] sm:$0xff] }
 0x53a   : > { %v4921_v61 = vpop.f32.mrf.mxu1 }
 0x53b   : > { %v4961_v15 = vadd.f32 %v4919_v55, %v4430_v28  ;;  %5251 = vxpose.xlu0.b32.cont [7/16] (narrow) %v5181_v51, 8  ;;  %v4922_v42 = vadd.f32 %v4921_v61, %v4832_v6 }
 0x53d   : > { %v4997_v58 = vmul.f32 %v9847_v50, %v4961_v15 }
 0x53e   : > { %v4390_v60 = vpop.f32.mrf.mxu3 }
 0x53f   : > { %v4391_v37 = vadd.f32 %v4390_v60, %v9947_v62  ;;  %v5033_v54 = vadd.f32 %v9856_v18, %v4997_v58 }
 0x540   : > { %v4834_v8 = vpop.f32.mrf.mxu0  ;;  %v5182_v9 = vpop.f32.mrf.mxu2 }
 0x541   : > { %v4431_v36 = vadd.f32 %v4391_v37, %v10129_v33  ;;  %v5183_v44 = vadd.f32 %v9995_v26, %v5182_v9  ;;  %v5065_v35 = vmax.f32 %v5033_v54, 0.0  ;;  %v10133_v37 = vld [vmem:[#allocation5_spill] sm:$0xff] }
 0x542   : > { %v4923_v57 = vpop.f32.mrf.mxu1 }
 0x543   : > { %5252 = vxpose.xlu0.b32.cont [8/16] (narrow) %v5183_v44, 8  ;;  %v5084_v32 = vpack.c.bf16 %v5065_v35, %v5064_v20  ;;  %v4962_v22 = vadd.f32 %v4922_v42, %v4431_v36  ;;  %v4924_v47 = vadd.f32 %v4923_v57, %v4834_v8 }
 0x545   : > { %5224 = vmatmul.bf16.gmra.mxu2 %v5084_v32  ;;  %v4998_v34 = vmul.f32 %v9847_v50, %v4962_v22  ;;  %v10134_v22 = vld [vmem:[#allocation9_spill] sm:$0xff] }
 0x546   : > { %v4392_v21 = vpop.f32.mrf.mxu3 }
 0x547   : > { %v4393_v24 = vadd.f32 %v4392_v21, %v9959_v13  ;;  %v5034_v43 = vadd.f32 %v9856_v18, %v4998_v34 }
 0x548   : > { %v4837_v62 = vpop.f32.mrf.mxu0  ;;  %v5185_v5 = vpop.f32.mrf.mxu2 }
 0x549   : > { %v4432_v19 = vadd.f32 %v4393_v24, %v10130_v14  ;;  %v5186_v25 = vadd.f32 %v9995_v26, %v5185_v5  ;;  %v5066_v1 = vmax.f32 %v5034_v43, 0.0 }
 0x54a   : > { %v4926_v56 = vpop.f32.mrf.mxu1 }
 0x54b   : > { %v4963_v49 = vadd.f32 %v4924_v47, %v4432_v19  ;;  %5253 = vxpose.xlu0.b32.cont [9/16] (narrow) %v5186_v25, 8  ;;  %v4927_v27 = vadd.f32 %v4926_v56, %v4837_v62 }
 0x54d   : > { %v4999_v45 = vmul.f32 %v9847_v50, %v4963_v49 }
 0x54e   : > { %v4395_v59 = vpop.f32.mrf.mxu3 }
 0x54f   : > { %v4396_v31 = vadd.f32 %v4395_v59, %v9968_v46  ;;  %v5035_v13 = vadd.f32 %v9856_v18, %v4999_v45 }
 0x550   : > { %v5187_v29 = vpop.f32.mrf.mxu2  ;;  %v4839_v11 = vpop.f32.mrf.mxu0 }
 0x551   : > { %v4433_v16 = vadd.f32 %v4396_v31, %v10131_v12  ;;  %v5188_v23 = vadd.f32 %v9995_v26, %v5187_v29  ;;  %v5067_v52 = vmax.f32 %v5035_v13, 0.0 }
 0x552   : > { %v4928_v0 = vpop.f32.mrf.mxu1 }
 0x553   : > { %5254 = vxpose.xlu0.b32.cont [10/16] (narrow) %v5188_v23, 8  ;;  %v5085_v30 = vpack.c.bf16 %v5067_v52, %v5066_v1  ;;  %v4964_v53 = vadd.f32 %v4927_v27, %v4433_v16  ;;  %v4929_v63 = vadd.f32 %v4928_v0, %v4839_v11 }
 0x555   : > { %5229 = vmatmul.bf16.gmra.mxu2 %v5085_v30  ;;  %v5000_v46 = vmul.f32 %v9847_v50, %v4964_v53 }
 0x556   : > { %v4397_v38 = vpop.f32.mrf.mxu3 }
 0x557   : > { %v4398_v3 = vadd.f32 %v4397_v38, %v9973_v4  ;;  %v5036_v28 = vadd.f32 %v9856_v18, %v5000_v46 }
 0x558   : > { %v5190_v39 = vpop.f32.mrf.mxu2  ;;  %v4842_v55 = vpop.f32.mrf.mxu0 }
 0x559   : > { %v4434_v17 = vadd.f32 %v4398_v3, %v10132_v41  ;;  %v5191_v6 = vadd.f32 %v9995_v26, %v5190_v39  ;;  %v5068_v58 = vmax.f32 %v5036_v28, 0.0 }
 0x55a   : > { %v4931_v10 = vpop.f32.mrf.mxu1 }
 0x55b   : > { %v4965_v40 = vadd.f32 %v4929_v63, %v4434_v17  ;;  %5255 = vxpose.xlu0.b32.cont [11/16] (narrow) %v5191_v6, 8  ;;  %v4932_v60 = vadd.f32 %v4931_v10, %v4842_v55 }
 0x55d   : > { %v5001_v61 = vmul.f32 %v9847_v50, %v4965_v40 }
 0x55e   : > { %v4400_v51 = vpop.f32.mrf.mxu3 }
 0x55f   : > { %v4401_v15 = vadd.f32 %v4400_v51, %v9980_v48  ;;  %v5037_v4 = vadd.f32 %v9856_v18, %v5001_v61 }
 0x560   : > { %v5192_v2 = vpop.f32.mrf.mxu2  ;;  %v4844_v33 = vpop.f32.mrf.mxu0 }
 0x561   : > { %v4435_v54 = vadd.f32 %v4401_v15, %v10133_v37  ;;  %v5193_v8 = vadd.f32 %v9995_v26, %v5192_v2  ;;  %v5069_v9 = vmax.f32 %v5037_v4, 0.0 }
 0x562   : > { %v4933_v36 = vpop.f32.mrf.mxu1 }
 0x563   : > { %5256 = vxpose.xlu0.b32.cont [12/16] (narrow) %v5193_v8, 8  ;;  %v5086_v20 = vpack.c.bf16 %v5069_v9, %v5068_v58  ;;  %v4966_v42 = vadd.f32 %v4932_v60, %v4435_v54  ;;  %v4934_v32 = vadd.f32 %v4933_v36, %v4844_v33 }
 0x565   : > { %5234 = vmatmul.bf16.gmra.mxu2 %v5086_v20  ;;  %v5002_v35 = vmul.f32 %v9847_v50, %v4966_v42 }
 0x566   : > { %v4402_v57 = vpop.f32.mrf.mxu3 }
 0x567   : > { %v4403_v44 = vadd.f32 %v4402_v57, %v9989_v7  ;;  %v5038_v34 = vadd.f32 %v9856_v18, %v5002_v35 }
 0x568   : > { %v5195_v48 = vpop.f32.mrf.mxu2 }
 0x569   : > { %v4436_v21 = vadd.f32 %v4403_v44, %v10134_v22  ;;  %v5196_v24 = vadd.f32 %v9995_v26, %v5195_v48  ;;  %v5070_v7 = vmax.f32 %v5038_v34, 0.0 }
 0x56b   : > { %v4967_v62 = vadd.f32 %v4934_v32, %v4436_v21  ;;  %5257 = vxpose.xlu0.b32.cont [13/16] (narrow) %v5196_v24, 8 }
 0x56d   : > { %v5003_v5 = vmul.f32 %v9847_v50, %v4967_v62 }
 0x56f   : > { %v5039_v47 = vadd.f32 %v9856_v18, %v5003_v5 }
 0x570   : > { %v5197_v14 = vpop.f32.mrf.mxu2 }
 0x571   : > { %v5198_v19 = vadd.f32 %v9995_v26, %v5197_v14  ;;  %v5071_v56 = vmax.f32 %v5039_v47, 0.0 }
 0x573   : > { %5258 = vxpose.xlu0.b32.cont [14/16] (narrow) %v5198_v19, 8  ;;  %v5087_v25 = vpack.c.bf16 %v5071_v56, %v5070_v7 }
 0x575   : > { %5239 = vmatmul.bf16.gmra.mxu2 %v5087_v25 }
 0x578   : > { %v5200_v49 = vpop.f32.mrf.mxu2 }
 0x579   : > { %v5201_v45 = vadd.f32 %v9995_v26, %v5200_v49 }
 0x57b   : > { %5259 = vxpose.xlu0.b32.cont [15/16] (narrow) %v5201_v45, 8 }
 0x580   : > { %v5202_v43 = vpop.f32.mrf.mxu2 }
 0x581   : > { %v5203_v59 = vadd.f32 %v9995_v26, %v5202_v43 }
 0x583   : > { %5260 = vxpose.xlu0.b32.end [16/16] (narrow) %v5203_v59, 8 }
 0x588   : > { %v5205_v50 = vpop.f32.mrf.mxu2 }
 0x589   : > { %v5206_v31 = vadd.f32 %v9995_v26, %v5205_v50 }
 0x58b   : > { %5277 = vxpose.xlu1.b32.start [1/16] (narrow) %v5206_v31, 8 }
 0x590   : > { %v5207_v18 = vpop.f32.mrf.mxu2 }
 0x591   : > { %v5208_v13 = vadd.f32 %v9995_v26, %v5207_v18 }
 0x593   : > { %5278 = vxpose.xlu1.b32.cont [2/16] (narrow) %v5208_v13, 8 }
 0x598   : > { %v5210_v27 = vpop.f32.mrf.mxu2 }
 0x599   : > { %v5211_v29 = vadd.f32 %v9995_v26, %v5210_v27 }
 0x59b   : > { %5279 = vxpose.xlu1.b32.cont [3/16] (narrow) %v5211_v29, 8 }
 0x5a0   : > { %v5212_v12 = vpop.f32.mrf.mxu2 }
 0x5a1   : > { %v5213_v16 = vadd.f32 %v9995_v26, %v5212_v12 }
 0x5a3   : > { %5280 = vxpose.xlu1.b32.cont [4/16] (narrow) %v5213_v16, 8 }
 0x5a8   : > { %v5215_v11 = vpop.f32.mrf.mxu2 }
 0x5a9   : > { %v5216_v23 = vadd.f32 %v9995_v26, %v5215_v11 }
 0x5ab   : > { %5281 = vxpose.xlu1.b32.cont [5/16] (narrow) %v5216_v23, 8 }
 0x5af   : > { %v5261_v58 = vpop.trf.xlu0 }
 0x5b0   : > { %v5217_v1 = vpop.f32.mrf.mxu2  ;;  %5309 = vst [vmem:[%s251_s20] sm:$0xff] %v5261_v58 }
 0x5b1   : > { %v5218_v52 = vadd.f32 %v9995_v26, %v5217_v1 }
 0x5b3   : > { %5282 = vxpose.xlu1.b32.cont [6/16] (narrow) %v5218_v52, 8 }
 0x5b8   : > { %v5220_v0 = vpop.f32.mrf.mxu2 }
 0x5b9   : > { %v5221_v30 = vadd.f32 %v9995_v26, %v5220_v0 }
 0x5bb   : > { %5283 = vxpose.xlu1.b32.cont [7/16] (narrow) %v5221_v30, 8 }
 0x5c0   : > { %v5222_v53 = vpop.f32.mrf.mxu2 }
 0x5c1   : > { %v5223_v38 = vadd.f32 %v9995_v26, %v5222_v53 }
 0x5c3   : > { %5284 = vxpose.xlu1.b32.cont [8/16] (narrow) %v5223_v38, 8 }
 0x5c8   : > { %v5225_v3 = vpop.f32.mrf.mxu2 }
 0x5c9   : > { %v5226_v46 = vadd.f32 %v9995_v26, %v5225_v3 }
 0x5cb   : > { %5285 = vxpose.xlu1.b32.cont [9/16] (narrow) %v5226_v46, 8 }
 0x5d0   : > { %v5227_v39 = vpop.f32.mrf.mxu2 }
 0x5d1   : > { %v5228_v63 = vadd.f32 %v9995_v26, %v5227_v39 }
 0x5d3   : > { %5286 = vxpose.xlu1.b32.cont [10/16] (narrow) %v5228_v63, 8 }
 0x5d8   : > { %v5230_v41 = vpop.f32.mrf.mxu2 }
 0x5d9   : > { %v5231_v17 = vadd.f32 %v9995_v26, %v5230_v41 }
 0x5db   : > { %5287 = vxpose.xlu1.b32.cont [11/16] (narrow) %v5231_v17, 8 }
 0x5e0   : > { %v5232_v6 = vpop.f32.mrf.mxu2 }
 0x5e1   : > { %v5233_v40 = vadd.f32 %v9995_v26, %v5232_v6 }
 0x5e3   : > { %5288 = vxpose.xlu1.b32.cont [12/16] (narrow) %v5233_v40, 8 }
 0x5e8   : > { %v5235_v55 = vpop.f32.mrf.mxu2 }
 0x5e9   : > { %v5236_v10 = vadd.f32 %v9995_v26, %v5235_v55 }
 0x5eb   : > { %5289 = vxpose.xlu1.b32.cont [13/16] (narrow) %v5236_v10, 8 }
 0x5f0   : > { %v5237_v28 = vpop.f32.mrf.mxu2 }
 0x5f1   : > { %v5238_v61 = vadd.f32 %v9995_v26, %v5237_v28 }
 0x5f3   : > { %5290 = vxpose.xlu1.b32.cont [14/16] (narrow) %v5238_v61, 8 }
 0x5f8   : > { %v5240_v51 = vpop.f32.mrf.mxu2 }
 0x5f9   : > { %v5241_v15 = vadd.f32 %v9995_v26, %v5240_v51 }
 0x5fb   : > { %5291 = vxpose.xlu1.b32.cont [15/16] (narrow) %v5241_v15, 8 }
 0x600   : > { %v5242_v4 = vpop.f32.mrf.mxu2 }
 0x601   : > { %v5243_v2 = vadd.f32 %v9995_v26, %v5242_v4 }
 0x603   : > { %5292 = vxpose.xlu1.b32.end [16/16] (narrow) %v5243_v2, 8 }
 0x62f   : > { %v5293_v60 = vpop.trf.xlu1 }
 0x630   : > { %5310 = vst [vmem:[%s251_s20 + $0x8] sm:$0xff] %v5293_v60 }
 0x631 PF: > { %s16_s21 = sadd.s32 1, %s8067_s21  }
 0x632   : > { %p13_p4 = scmp.ge.s32.totalorder %s16_s21, 4  }
 0x634   :  { %15 = sbr.rel (!%p13_p4) target bundleno = 1 (0x1), region = 84 }

</bundles_post_ra>
